<compile_context>
chip_gen: v6e
topology: v6e:2x2x1
jax: 0.10.0
libtpu: 0.0.40
codegen_flags: <defaults>
</compile_context>

<pallas_src>
import functools

import numpy as np
import jax
import jax.numpy as jnp
from jax import lax
from jax.experimental import pallas as pl
from jax.experimental.pallas import tpu as pltpu


_HIGHEST = jax.lax.Precision.HIGHEST


# ----------------------------- shared helpers -----------------------------

def _full_spec(shape):
    # Whole array as a single block (block_shape == array shape), grid=(1,).
    return pl.BlockSpec(shape, lambda *_: (0,) * len(shape))


def _dot(a, b):
    # MXU matmul. f32 + HIGHEST keeps exact agreement with the plain-JAX
    # reference at toy size; when the packed weights are bf16
    # (pack_params(mxu_dtype=jnp.bfloat16), the v6e/v7x production lever) the
    # activation operand is cast and HIGHEST is dropped.
    if b.dtype == jnp.float32:
        return jnp.dot(a, b, preferred_element_type=jnp.float32, precision=_HIGHEST)
    return jnp.dot(a.astype(b.dtype), b, preferred_element_type=jnp.float32)


def _layernorm(x, w, b, eps=1e-5):
    mu = jnp.mean(x, axis=-1, keepdims=True)
    xc = x - mu
    var = jnp.mean(xc * xc, axis=-1, keepdims=True)
    return xc * lax.rsqrt(var + eps) * w + b


def _rmsnorm(x, w, eps=1e-6):
    # TODO(synk): RMSNorm class body is not in the provided source; standard
    # x * rsqrt(mean(x^2) + 1e-6) * weight is assumed (same in the reference).
    return x * lax.rsqrt(jnp.mean(x * x, axis=-1, keepdims=True) + eps) * w


def _sigmoid(x):
    # exp on the EUP, division replaced by approx reciprocal (EUP) + 1 Newton
    # step on the VPU — no vector divide.
    e = jnp.exp(-x)
    den = 1.0 + e
    r = pl.reciprocal(den, approx=True)
    return r * (2.0 - den * r)


def _erf(x):
    # Abramowitz & Stegun 7.1.26 (|err| < 1.5e-7): exact-GELU semantics without
    # relying on a lax.erf lowering inside Mosaic.
    a1, a2, a3, a4, a5 = 0.254829592, -0.284496736, 1.421413741, -1.453152027, 1.061405429
    p = 0.3275911
    ax = jnp.abs(x)
    t = 1.0 / (1.0 + p * ax)
    poly = ((((a5 * t + a4) * t + a3) * t + a2) * t + a1) * t
    y = 1.0 - poly * jnp.exp(-ax * ax)
    return jnp.where(x >= 0.0, y, -y)


def _gelu_exact(x):
    return 0.5 * x * (1.0 + _erf(x * 0.7071067811865476))


# ------------- input-feature glue (plain JAX, pure input preprocessing) -------------

def _fourier_pe(x, num_frequencies):
    # TODO(synk): FourierPositionalEncoding3D body is not in the provided source;
    # NeRF-style encoding with include_input=True is assumed:
    #   [x, sin(2^i * pi * x), cos(2^i * pi * x)], i = 0..nf-1   -> [B, 3 + 6*nf]
    freqs = (2.0 ** np.arange(num_frequencies, dtype=np.float32)) * np.pi
    xf = x[:, None, :] * freqs[None, :, None]                     # [B, nf, 3]
    B = x.shape[0]
    return jnp.concatenate(
        [x, jnp.sin(xf).reshape(B, -1), jnp.cos(xf).reshape(B, -1)],
        axis=-1).astype(jnp.float32)


def _time_features(t):
    # TimeEncoder feature construction: freqs = 2*pi*logspace(0, 16, 16, base=2)
    exponents = np.linspace(0.0, 16.0, 16, dtype=np.float64)
    freqs = (2.0 * np.pi * (2.0 ** exponents)).astype(np.float32)
    tt = t.reshape(-1, 1).astype(jnp.float32)
    arg = tt * freqs[None, :]
    return jnp.concatenate([jnp.sin(arg), jnp.cos(arg)], axis=-1)  # [B, 32]


# ----------------------------------- Pallas kernel -----------------------------------

def _velocity_kernel(x_pe_ref, tfeat_ref, s_ref,
                     te_w1_ref, te_b1_ref, te_w2_ref, te_b2_ref,
                     pp_w_ref, wt_ref, bt_ref,
                     wq_ref, wkv_ref, wo_ref,
                     ca_w1_ref, ca_w2_ref, blk_w1_ref, blk_w2_ref,
                     vecs_ref, b4_ref,
                     seg_k_ref, exp_k_ref, seg_hd_ref,
                     wf_ref, bf_ref,
                     out_ref, *, n_heads):
    B = x_pe_ref.shape[0]
    d = wq_ref.shape[0]
    k = s_ref.shape[0] // B
    H = n_heads
    hd = d // H
    inv_sqrt_hd = 1.0 / float(hd) ** 0.5

    # ----- TimeEncoder MLP (sin/cos features precomputed in the wrapper) -----
    h1 = _dot(tfeat_ref[...], te_w1_ref[...]) + te_b1_ref[...]
    h1 = h1 * _sigmoid(h1)                                    # SiLU
    t_emb = _dot(h1, te_w2_ref[...]) + te_b2_ref[...]

    # ----- packed per-block vectors (one [19, d] DMA instead of 19 tiny ones) -----
    vecs = vecs_ref[...]
    row = lambda i: vecs[i:i + 1, :]
    pp_b, ln1_w, ln1_b = row(0), row(1), row(2)
    lnq_w, lnq_b, lnkv_w, lnkv_b = row(3), row(4), row(5), row(6)
    bq, bk_, bv = row(7), row(8), row(9)
    rmsq_w, rmsk_w = row(10), row(11)
    bo, lnm_w, lnm_b, ca_b2 = row(12), row(13), row(14), row(15)
    ada_w, ada_b, blk_b2 = row(16), row(17), row(18)
    b4 = b4_ref[...]
    ca_b1, blk_b1 = b4[0:1, :], b4[1:2, :]

    x_pe = x_pe_ref[...]
    s_flat = s_ref[...]                                       # [B*k, d]

    # point projection + LayerNorm1
    x_proj = _dot(x_pe, pp_w_ref[...]) + pp_b
    x_norm = _layernorm(x_proj, ln1_w, ln1_b)

    # all eight t_emb-conditioned affine projections in one MXU call
    tmods = _dot(t_emb, wt_ref[...]) + bt_ref[...]            # [B, 8d]
    shift1, scale1 = tmods[:, 0 * d:1 * d], tmods[:, 1 * d:2 * d]
    gate1p = tmods[:, 2 * d:3 * d]
    ada_shift, ada_scale = tmods[:, 3 * d:4 * d], tmods[:, 4 * d:5 * d]
    shift2, scale2 = tmods[:, 5 * d:6 * d], tmods[:, 6 * d:7 * d]
    gate2p = tmods[:, 7 * d:8 * d]

    query = x_norm * (1.0 + scale1) + shift1

    # ------------------ CrossAttentionBlock (fully fused, whole-tile) ------------------
    qn = _layernorm(query, lnq_w, lnq_b)
    kvn = _layernorm(s_flat, lnkv_w, lnkv_b)
    q_proj = _rmsnorm(_dot(qn, wq_ref[...]) + bq, rmsq_w)     # [B, d]
    kv_lin = _dot(kvn, wkv_ref[...])                          # packed k|v projection
    k_proj = _rmsnorm(kv_lin[:, :d] + bk_, rmsk_w)            # [B*k, d]
    v_proj = kv_lin[:, d:] + bv                               # [B*k, d]

    # Exact PyTorch head view: .view(B, H, k, hd) of the contiguous [B, k, d]
    # buffer == per-batch flat buffer regrouped into rows of k*hd per head.
    # (When k == H, as here, this reshape is shape-preserving i.e. a no-op.)
    kh = k_proj.reshape(B * H, k * hd)                        # kh[b*H+h, j*hd+e] = k_h[b,h,j,e]
    vh = v_proj.reshape(B * H, k * hd)

    # q replicated to the same [B*H, k*hd] layout: q_rep[b*H+h, j*hd+e] = q[b, h*hd+e]
    q_pieces = [q_proj[:, h * hd:(h + 1) * hd] for h in range(H)]   # H lane slices
    qh3 = jnp.stack(q_pieces, axis=1)                         # [B, H, hd]
    q_rep = jnp.concatenate([qh3] * k, axis=2).reshape(B * H, k * hd)

    # scores: full-tile VPU multiply + ONE segment-sum matmul on the MXU
    scores = _dot(q_rep * kh, seg_k_ref[...]) * inv_sqrt_hd   # [B*H, k]
    m = jnp.max(scores, axis=-1, keepdims=True)
    p = jnp.exp(scores - m)
    denom = jnp.sum(p, axis=-1, keepdims=True)
    r = pl.reciprocal(denom, approx=True)                     # EUP slot
    r = r * (2.0 - denom * r)                                 # one Newton step
    attn = p * r                                              # [B*H, k]

    # weighted value sum: expand attn back with a static [k, k*hd] matrix,
    # multiply on the VPU, reduce hd-segments with a static [k*hd, hd] matrix.
    a_exp = _dot(attn, exp_k_ref[...])                        # [B*H, k*hd]
    heads = _dot(a_exp * vh, seg_hd_ref[...])                 # [B*H, hd]

    # head-major concat back to [B, d]; the PyTorch .squeeze(2).transpose(1,2)
    # .reshape(B, d) merge is folded into wo_ref's row permutation (done once
    # on the weights in pack_params).
    heads3 = heads.reshape(B, H, hd)
    attn_cat = jnp.concatenate([heads3[:, h, :] for h in range(H)], axis=1)   # [B, d]

    ca_out = _dot(attn_cat, wo_ref[...]) + bo + query
    hm = _layernorm(ca_out, lnm_w, lnm_b)
    hm = _gelu_exact(_dot(hm, ca_w1_ref[...]) + ca_b1)
    hm = _dot(hm, ca_w2_ref[...]) + ca_b2
    attn_out = ca_out + hm
    # ------------------------------------------------------------------------

    hh = attn_out * _sigmoid(gate1p) + x_norm
    # AdaLayerNorm -> block MLP -> modulation -> gate2
    h2 = _layernorm(hh, ada_w, ada_b) * (1.0 + ada_scale) + ada_shift
    h2 = _gelu_exact(_dot(h2, blk_w1_ref[...]) + blk_b1)
    h2 = _dot(h2, blk_w2_ref[...]) + blk_b2
    h2 = h2 * (1.0 + scale2) + shift2
    h2 = h2 * _sigmoid(gate2p)
    h_out = hh + h2

    # lane-dense final projection (padded to 128 output columns in pack_params)
    out_ref[...] = _dot(h_out, wf_ref[...]) + bf_ref[...]


# ----------------------------------- weight packing -----------------------------------

def pack_params(params, *, n_heads, mxu_dtype=jnp.float32):
    """One-time weight packing (transposes / concats / Wo row permutation / padding).

    Only the LAST block is packed: in the PyTorch forward every block reads
    only (x_pe, s, t_emb) and `h` is overwritten each iteration, so only the
    final block's output ever reaches `self.final` — earlier blocks are dead
    compute and are skipped (bit-identical semantics).

    Pass mxu_dtype=jnp.bfloat16 on v6e/v7x at production d for ~2x MXU
    throughput and half the weight VMEM/HBM traffic.
    """
    blk = params['blocks'][-1]
    te = params['time']
    d = int(blk['ln1_w'].shape[0])
    hd = d // n_heads
    f32 = jnp.float32

    def t_(w):  # PyTorch Linear weight [out, in] -> [in, out] for x @ W layout
        return jnp.asarray(w).T.astype(mxu_dtype)

    # Fold the .squeeze(2).transpose(1,2).reshape(B, d) head-merge into Wo.
    perm = np.array([(c % hd) * n_heads + c // hd for c in range(d)], dtype=np.int32)

    wf = jnp.zeros((d, 128), mxu_dtype).at[:, :3].set(
        jnp.asarray(params['final_w']).T.astype(mxu_dtype))
    bf = jnp.zeros((1, 128), f32).at[:, :3].set(jnp.asarray(params['final_b'])[None, :])

    return dict(
        te_w1=t_(te['w1']), te_b1=jnp.asarray(te['b1'], f32)[None, :],
        te_w2=t_(te['w2']), te_b2=jnp.asarray(te['b2'], f32)[None, :],
        pp_w=t_(blk['pp_w']),
        wt=jnp.concatenate(
            [t_(blk['shift1_w']), t_(blk['scale1_w']), t_(blk['gate1_w']),
             t_(blk['ada_shift_w']), t_(blk['ada_scale_w']),
             t_(blk['shift2_w']), t_(blk['scale2_w']), t_(blk['gate2_w'])], axis=1),
        bt=jnp.concatenate(
            [blk['shift1_b'], blk['scale1_b'], blk['gate1_b'],
             blk['ada_shift_b'], blk['ada_scale_b'],
             blk['shift2_b'], blk['scale2_b'], blk['gate2_b']]).astype(f32)[None, :],
        wq=t_(blk['ca']['wq']),
        wkv=jnp.concatenate([t_(blk['ca']['wk']), t_(blk['ca']['wv'])], axis=1),
        wo=t_(blk['ca']['wo'])[perm, :],
        ca_w1=t_(blk['ca']['w1']), ca_w2=t_(blk['ca']['w2']),
        blk_w1=t_(blk['m1_w']), blk_w2=t_(blk['m2_w']),
        vecs=jnp.stack(
            [blk['pp_b'], blk['ln1_w'], blk['ln1_b'],
             blk['ca']['lnq_w'], blk['ca']['lnq_b'],
             blk['ca']['lnkv_w'], blk['ca']['lnkv_b'],
             blk['ca']['bq'], blk['ca']['bk'], blk['ca']['bv'],
             blk['ca']['rmsq_w'], blk['ca']['rmsk_w'],
             blk['ca']['bo'], blk['ca']['lnm_w'], blk['ca']['lnm_b'], blk['ca']['b2'],
             blk['ada_w'], blk['ada_b'], blk['m2_b']], axis=0).astype(f32),
        b4=jnp.stack([blk['ca']['b1'], blk['m1_b']], axis=0).astype(f32),
        wf=wf, bf=bf,
    )


# ----------------------------------- wrapper -----------------------------------

@functools.partial(jax.jit, static_argnames=("n_heads", "num_frequencies"))
def velocity_estimator_forward(x, s, t, packed, *, n_heads=8, num_frequencies=16):
    """Full VelocityEstimator forward as one fused Pallas TPU kernel."""
    B = x.shape[0]
    _, k, d = s.shape
    assert d % n_heads == 0
    hd = d // n_heads
    f32 = jnp.float32

    # ---- input-feature glue (cheap elementwise preprocessing, plain JAX) ----
    x_pe = _fourier_pe(x.astype(f32), num_frequencies)        # [B, pe_dim]
    tfeat = _time_features(t)                                 # [B, 32]
    s_flat = s.astype(f32).reshape(B * k, d)

    # Static 0/1 segment matrices for the whole-tile attention (trace-time consts).
    seg_k = np.kron(np.eye(k, dtype=np.float32), np.ones((hd, 1), np.float32))   # [k*hd, k]
    exp_k = np.ascontiguousarray(seg_k.T)                                          # [k, k*hd]
    seg_hd = np.tile(np.eye(hd, dtype=np.float32), (k, 1))                         # [k*hd, hd]

    inputs = (x_pe, tfeat, s_flat,
              packed['te_w1'], packed['te_b1'], packed['te_w2'], packed['te_b2'],
              packed['pp_w'], packed['wt'], packed['bt'],
              packed['wq'], packed['wkv'], packed['wo'],
              packed['ca_w1'], packed['ca_w2'], packed['blk_w1'], packed['blk_w2'],
              packed['vecs'], packed['b4'],
              jnp.asarray(seg_k), jnp.asarray(exp_k), jnp.asarray(seg_hd),
              packed['wf'], packed['bf'])

    # Explicit scoped-VMEM limit sized from the packed-input footprint (plus
    # generous headroom for intermediates); avoids relying on the 16/32 MiB
    # per-generation defaults as d / k grow.
    in_bytes = sum(int(np.prod(a.shape)) * jnp.dtype(a.dtype).itemsize for a in inputs)
    vmem_limit = int(min(96 << 20, max(8 << 20, 4 * in_bytes + (8 << 20))))

    kernel = functools.partial(_velocity_kernel, n_heads=n_heads)
    # NOTE(v7x): for production batch sizes add a leading grid axis over B marked
    # "parallel" so work shards across the 2 TensorCores; at B=4 a single program
    # is cheapest (per-grid-step overhead would dominate the ~100 KFLOPs).
    out = pl.pallas_call(
        kernel,
        grid=(1,),
        in_specs=[_full_spec(a.shape) for a in inputs],
        out_specs=_full_spec((B, 128)),
        out_shape=jax.ShapeDtypeStruct((B, 128), jnp.float32),
        compiler_params=pltpu.CompilerParams(
            dimension_semantics=("arbitrary",),
            vmem_limit_bytes=vmem_limit),
    )(*inputs)
    return out[:, :3]                                         # drop the lane padding


# ------------------------------ reference (plain JAX) ------------------------------

def reference_forward(x, s, t, params, *, n_heads, num_frequencies):
    def mm(a, b):
        return jnp.dot(a, b, precision=_HIGHEST)

    def ln(xv, w, b, eps=1e-5):
        mu = xv.mean(-1, keepdims=True)
        var = ((xv - mu) ** 2).mean(-1, keepdims=True)
        return (xv - mu) / jnp.sqrt(var + eps) * w + b

    def rms(xv, w, eps=1e-6):
        return xv / jnp.sqrt((xv * xv).mean(-1, keepdims=True) + eps) * w

    B, k, d = s.shape
    hd = d // n_heads

    x_pe = _fourier_pe(x, num_frequencies)
    tfeat = _time_features(t)
    te = params['time']
    h1 = mm(tfeat, te['w1'].T) + te['b1']
    h1 = h1 * jax.nn.sigmoid(h1)
    t_emb = mm(h1, te['w2'].T) + te['b2']

    def cross_attn(query, pf, ca):
        qn = ln(query, ca['lnq_w'], ca['lnq_b'])
        kvn = ln(pf, ca['lnkv_w'], ca['lnkv_b'])
        q_proj = rms(mm(qn, ca['wq'].T) + ca['bq'], ca['rmsq_w'])
        k_proj = rms(mm(kvn, ca['wk'].T) + ca['bk'], ca['rmsk_w'])
        v_proj = mm(kvn, ca['wv'].T) + ca['bv']
        q_h = q_proj.reshape(B, n_heads, 1, hd)
        k_h = k_proj.reshape(B, n_heads, k, hd)
        v_h = v_proj.reshape(B, n_heads, k, hd)
        sc = jnp.einsum('bhqe,bhke->bhqk', q_h, k_h, precision=_HIGHEST) / float(hd) ** 0.5
        a = jax.nn.softmax(sc, axis=-1)
        o = jnp.einsum('bhqk,bhke->bhqe', a, v_h, precision=_HIGHEST)
        merged = jnp.transpose(o[:, :, 0, :], (0, 2, 1)).reshape(B, d)
        out = mm(merged, ca['wo'].T) + ca['bo'] + query
        hmid = ln(out, ca['lnm_w'], ca['lnm_b'])
        mlp = mm(jax.nn.gelu(mm(hmid, ca['w1'].T) + ca['b1'], approximate=False),
                 ca['w2'].T) + ca['b2']
        return out + mlp

    h = None
    for blk in params['blocks']:
        x_proj = mm(x_pe, blk['pp_w'].T) + blk['pp_b']
        x_norm = ln(x_proj, blk['ln1_w'], blk['ln1_b'])
        shift1 = mm(t_emb, blk['shift1_w'].T) + blk['shift1_b']
        scale1 = mm(t_emb, blk['scale1_w'].T) + blk['scale1_b']
        query = x_norm * (1.0 + scale1) + shift1
        attn_out = cross_attn(query, s, blk['ca'])
        gate1 = jax.nn.sigmoid(mm(t_emb, blk['gate1_w'].T) + blk['gate1_b'])
        hh = attn_out * gate1 + x_norm
        ada_shift = mm(t_emb, blk['ada_shift_w'].T) + blk['ada_shift_b']
        ada_scale = mm(t_emb, blk['ada_scale_w'].T) + blk['ada_scale_b']
        h2 = ln(hh, blk['ada_w'], blk['ada_b']) * (1.0 + ada_scale) + ada_shift
        shift2 = mm(t_emb, blk['shift2_w'].T) + blk['shift2_b']
        scale2 = mm(t_emb, blk['scale2_w'].T) + blk['scale2_b']
        h2 = mm(jax.nn.gelu(mm(h2, blk['m1_w'].T) + blk['m1_b'], approximate=False),
                blk['m2_w'].T) + blk['m2_b']
        gate2 = jax.nn.sigmoid(mm(t_emb, blk['gate2_w'].T) + blk['gate2_b'])
        h2 = h2 * (1.0 + scale2) + shift2
        h2 = h2 * gate2
        h = hh + h2
    return mm(h, params['final_w'].T) + params['final_b']


# ------------------------------ deterministic params ------------------------------

def init_params(key, d, pe_dim, n_blocks):
    def linear(kk, out_dim, in_dim):
        kw, kb = jax.random.split(kk)
        bound = 1.0 / np.sqrt(in_dim)
        w = jax.random.uniform(kw, (out_dim, in_dim), jnp.float32, -bound, bound)
        b = jax.random.uniform(kb, (out_dim,), jnp.float32, -bound, bound)
        return w, b

    def affine(kk, n):
        kw, kb = jax.random.split(kk)
        return (1.0 + 0.1 * jax.random.normal(kw, (n,), jnp.float32),
                0.1 * jax.random.normal(kb, (n,), jnp.float32))

    keys = jax.random.split(key, 3 + n_blocks)
    te_w1, te_b1 = linear(keys[0], 64, 32)
    te_w2, te_b2 = linear(keys[1], d, 64)
    wf, bf = linear(keys[2], 3, d)

    blocks = []
    for i in range(n_blocks):
        bk = jax.random.split(keys[3 + i], 24)
        wq, bq = linear(bk[0], d, d)
        wk, bkk = linear(bk[1], d, d)
        wv, bv = linear(bk[2], d, d)
        wo, bo = linear(bk[3], d, d)
        caw1, cab1 = linear(bk[4], 4 * d, d)
        caw2, cab2 = linear(bk[5], d, 4 * d)
        lnq_w, lnq_b = affine(bk[6], d)
        lnkv_w, lnkv_b = affine(bk[7], d)
        lnm_w, lnm_b = affine(bk[8], d)
        rmsq_w = 1.0 + 0.1 * jax.random.normal(bk[9], (d,), jnp.float32)
        rmsk_w = 1.0 + 0.1 * jax.random.normal(bk[10], (d,), jnp.float32)
        ca = dict(wq=wq, bq=bq, wk=wk, bk=bkk, wv=wv, bv=bv, wo=wo, bo=bo,
                  w1=caw1, b1=cab1, w2=caw2, b2=cab2,
                  lnq_w=lnq_w, lnq_b=lnq_b, lnkv_w=lnkv_w, lnkv_b=lnkv_b,
                  lnm_w=lnm_w, lnm_b=lnm_b, rmsq_w=rmsq_w, rmsk_w=rmsk_w)
        pp_w, pp_b = linear(bk[11], d, pe_dim)
        ln1_w, ln1_b = affine(bk[12], d)
        s1w, s1b = linear(bk[13], d, d)
        sc1w, sc1b = linear(bk[14], d, d)
        g1w, g1b = linear(bk[15], d, d)
        m1w, m1b = linear(bk[16], 4 * d, d)
        m2w, m2b = linear(bk[17], d, 4 * d)
        ada_w, ada_b = affine(bk[18], d)
        adash_w, adash_b = linear(bk[19], d, d)
        adasc_w, adasc_b = linear(bk[20], d, d)
        s2w, s2b = linear(bk[21], d, d)
        sc2w, sc2b = linear(bk[22], d, d)
        g2w, g2b = linear(bk[23], d, d)
        blocks.append(dict(
            pp_w=pp_w, pp_b=pp_b, ln1_w=ln1_w, ln1_b=ln1_b,
            shift1_w=s1w, shift1_b=s1b, scale1_w=sc1w, scale1_b=sc1b,
            gate1_w=g1w, gate1_b=g1b, ca=ca,
            m1_w=m1w, m1_b=m1b, m2_w=m2w, m2_b=m2b,
            ada_w=ada_w, ada_b=ada_b,
            ada_shift_w=adash_w, ada_shift_b=adash_b,
            ada_scale_w=adasc_w, ada_scale_b=adasc_b,
            shift2_w=s2w, shift2_b=s2b, scale2_w=sc2w, scale2_b=sc2b,
            gate2_w=g2w, gate2_b=g2b))

    return dict(time=dict(w1=te_w1, b1=te_b1, w2=te_w2, b2=te_b2),
                blocks=blocks, final_w=wf, final_b=bf)


# ----------------------------------- main -----------------------------------

if __name__ == "__main__":
    B, k, d = 4, 8, 32
    n_heads = 8              # hard-coded to 8 inside VelocityEstimatorBlock
    n_blocks = 2
    num_frequencies = 4      # pe_dim = 3 + 6*4 = 27

    key = jax.random.PRNGKey(0)
    kx, ks, kt, kp = jax.random.split(key, 4)
    x = jax.random.normal(kx, (B, 3), jnp.float32)
    s = jax.random.normal(ks, (B, k, d), jnp.float32)
    t = jax.random.uniform(kt, (B,), jnp.float32)
    params = init_params(kp, d=d, pe_dim=3 + 6 * num_frequencies, n_blocks=n_blocks)

    # One-time weight packing (outside the jitted forward). Use
    # mxu_dtype=jnp.bfloat16 on v6e/v7x at production d.
    packed = pack_params(params, n_heads=n_heads, mxu_dtype=jnp.float32)

    out = velocity_estimator_forward(x, s, t, packed,
                                     n_heads=n_heads, num_frequencies=num_frequencies)
    out = jax.block_until_ready(out)

    ref = jax.block_until_ready(
        reference_forward(x, s, t, params,
                          n_heads=n_heads, num_frequencies=num_frequencies))

    np.testing.assert_allclose(np.asarray(out), np.asarray(ref), atol=2e-3, rtol=2e-3)
    print("KERNEL_OK")
</pallas_src>

<mosaic_0001>
module attributes {stable_mosaic.version = 11 : i64} {
  func.func @_velocity_kernel(%arg0: i32, %arg1: memref<4x27xf32, #tpu.memory_space<vmem>>, %arg2: memref<4x32xf32, #tpu.memory_space<vmem>>, %arg3: memref<32x32xf32, #tpu.memory_space<vmem>>, %arg4: memref<32x64xf32, #tpu.memory_space<vmem>>, %arg5: memref<1x64xf32, #tpu.memory_space<vmem>>, %arg6: memref<64x32xf32, #tpu.memory_space<vmem>>, %arg7: memref<1x32xf32, #tpu.memory_space<vmem>>, %arg8: memref<27x32xf32, #tpu.memory_space<vmem>>, %arg9: memref<32x256xf32, #tpu.memory_space<vmem>>, %arg10: memref<1x256xf32, #tpu.memory_space<vmem>>, %arg11: memref<32x32xf32, #tpu.memory_space<vmem>>, %arg12: memref<32x64xf32, #tpu.memory_space<vmem>>, %arg13: memref<32x32xf32, #tpu.memory_space<vmem>>, %arg14: memref<32x128xf32, #tpu.memory_space<vmem>>, %arg15: memref<128x32xf32, #tpu.memory_space<vmem>>, %arg16: memref<32x128xf32, #tpu.memory_space<vmem>>, %arg17: memref<128x32xf32, #tpu.memory_space<vmem>>, %arg18: memref<19x32xf32, #tpu.memory_space<vmem>>, %arg19: memref<2x128xf32, #tpu.memory_space<vmem>>, %arg20: memref<32x8xf32, #tpu.memory_space<vmem>>, %arg21: memref<8x32xf32, #tpu.memory_space<vmem>>, %arg22: memref<32x4xf32, #tpu.memory_space<vmem>>, %arg23: memref<32x128xf32, #tpu.memory_space<vmem>>, %arg24: memref<1x128xf32, #tpu.memory_space<vmem>>, %arg25: memref<4x128xf32, #tpu.memory_space<vmem>>) attributes {dimension_semantics = [#tpu.dimension_semantics<arbitrary>], iteration_bounds = array<i64: 1>, scalar_prefetch = 0 : i64, scratch_operands = 0 : i64, tpu.core_type = #tpu.core_type<tc>, window_params = [{pipeline_mode = #tpu.pipeline_mode<synchronous>, transform_indices = @transform_0, window_bounds = array<i64: 4, 27>}, {pipeline_mode = #tpu.pipeline_mode<synchronous>, transform_indices = @transform_1, window_bounds = array<i64: 4, 32>}, {pipeline_mode = #tpu.pipeline_mode<synchronous>, transform_indices = @transform_2, window_bounds = array<i64: 32, 32>}, {pipeline_mode = #tpu.pipeline_mode<synchronous>, transform_indices = @transform_3, window_bounds = array<i64: 32, 64>}, {pipeline_mode = #tpu.pipeline_mode<synchronous>, transform_indices = @transform_4, window_bounds = array<i64: 1, 64>}, {pipeline_mode = #tpu.pipeline_mode<synchronous>, transform_indices = @transform_5, window_bounds = array<i64: 64, 32>}, {pipeline_mode = #tpu.pipeline_mode<synchronous>, transform_indices = @transform_6, window_bounds = array<i64: 1, 32>}, {pipeline_mode = #tpu.pipeline_mode<synchronous>, transform_indices = @transform_7, window_bounds = array<i64: 27, 32>}, {pipeline_mode = #tpu.pipeline_mode<synchronous>, transform_indices = @transform_8, window_bounds = array<i64: 32, 256>}, {pipeline_mode = #tpu.pipeline_mode<synchronous>, transform_indices = @transform_9, window_bounds = array<i64: 1, 256>}, {pipeline_mode = #tpu.pipeline_mode<synchronous>, transform_indices = @transform_10, window_bounds = array<i64: 32, 32>}, {pipeline_mode = #tpu.pipeline_mode<synchronous>, transform_indices = @transform_11, window_bounds = array<i64: 32, 64>}, {pipeline_mode = #tpu.pipeline_mode<synchronous>, transform_indices = @transform_12, window_bounds = array<i64: 32, 32>}, {pipeline_mode = #tpu.pipeline_mode<synchronous>, transform_indices = @transform_13, window_bounds = array<i64: 32, 128>}, {pipeline_mode = #tpu.pipeline_mode<synchronous>, transform_indices = @transform_14, window_bounds = array<i64: 128, 32>}, {pipeline_mode = #tpu.pipeline_mode<synchronous>, transform_indices = @transform_15, window_bounds = array<i64: 32, 128>}, {pipeline_mode = #tpu.pipeline_mode<synchronous>, transform_indices = @transform_16, window_bounds = array<i64: 128, 32>}, {pipeline_mode = #tpu.pipeline_mode<synchronous>, transform_indices = @transform_17, window_bounds = array<i64: 19, 32>}, {pipeline_mode = #tpu.pipeline_mode<synchronous>, transform_indices = @transform_18, window_bounds = array<i64: 2, 128>}, {pipeline_mode = #tpu.pipeline_mode<synchronous>, transform_indices = @transform_19, window_bounds = array<i64: 32, 8>}, {pipeline_mode = #tpu.pipeline_mode<synchronous>, transform_indices = @transform_20, window_bounds = array<i64: 8, 32>}, {pipeline_mode = #tpu.pipeline_mode<synchronous>, transform_indices = @transform_21, window_bounds = array<i64: 32, 4>}, {pipeline_mode = #tpu.pipeline_mode<synchronous>, transform_indices = @transform_22, window_bounds = array<i64: 32, 128>}, {pipeline_mode = #tpu.pipeline_mode<synchronous>, transform_indices = @transform_23, window_bounds = array<i64: 1, 128>}, {pipeline_mode = #tpu.pipeline_mode<synchronous>, transform_indices = @transform_24, window_bounds = array<i64: 4, 128>}]} {
    %c0 = arith.constant 0 : index
    %c0_0 = arith.constant 0 : index
    %0 = vector.load %arg2[%c0, %c0_0] : memref<4x32xf32, #tpu.memory_space<vmem>>, vector<4x32xf32>
    %c0_1 = arith.constant 0 : index
    %c0_2 = arith.constant 0 : index
    %1 = vector.load %arg4[%c0_1, %c0_2] : memref<32x64xf32, #tpu.memory_space<vmem>>, vector<32x64xf32>
    %cst = arith.constant dense<0.000000e+00> : vector<4x64xf32>
    %2 = tpu.matmul %0, %1, %cst {dimension_numbers = #tpu.dot_dimension_numbers<[1], [0], [0], [1], [0, 0, 1, 1], [], []>, precision = #tpu.contract_precision<fp32>} : vector<4x32xf32>, vector<32x64xf32>, vector<4x64xf32> -> vector<4x64xf32>
    %c0_3 = arith.constant 0 : index
    %c0_4 = arith.constant 0 : index
    %3 = vector.load %arg5[%c0_3, %c0_4] : memref<1x64xf32, #tpu.memory_space<vmem>>, vector<1x64xf32>
    %4 = vector.broadcast %3 : vector<1x64xf32> to vector<4x64xf32>
    %5 = arith.addf %2, %4 : vector<4x64xf32>
    %cst_5 = arith.constant 0.000000e+00 : f32
    %6 = vector.broadcast %cst_5 : f32 to vector<4x64xf32>
    %7 = arith.subf %6, %5 : vector<4x64xf32>
    %8 = math.exp %7 : vector<4x64xf32>
    %cst_6 = arith.constant 1.000000e+00 : f32
    %9 = vector.broadcast %cst_6 : f32 to vector<4x64xf32>
    %10 = arith.addf %9, %8 : vector<4x64xf32>
    %11 = tpu.reciprocal %10 {approx = true} : vector<4x64xf32> -> vector<4x64xf32>
    %12 = arith.mulf %10, %11 : vector<4x64xf32>
    %cst_7 = arith.constant 2.000000e+00 : f32
    %13 = vector.broadcast %cst_7 : f32 to vector<4x64xf32>
    %14 = arith.subf %13, %12 : vector<4x64xf32>
    %15 = arith.mulf %11, %14 : vector<4x64xf32>
    %16 = arith.mulf %5, %15 : vector<4x64xf32>
    %c0_8 = arith.constant 0 : index
    %c0_9 = arith.constant 0 : index
    %17 = vector.load %arg6[%c0_8, %c0_9] : memref<64x32xf32, #tpu.memory_space<vmem>>, vector<64x32xf32>
    %cst_10 = arith.constant dense<0.000000e+00> : vector<4x32xf32>
    %18 = tpu.matmul %16, %17, %cst_10 {dimension_numbers = #tpu.dot_dimension_numbers<[1], [0], [0], [1], [0, 0, 1, 1], [], []>, precision = #tpu.contract_precision<fp32>} : vector<4x64xf32>, vector<64x32xf32>, vector<4x32xf32> -> vector<4x32xf32>
    %c0_11 = arith.constant 0 : index
    %c0_12 = arith.constant 0 : index
    %19 = vector.load %arg7[%c0_11, %c0_12] : memref<1x32xf32, #tpu.memory_space<vmem>>, vector<1x32xf32>
    %20 = vector.broadcast %19 : vector<1x32xf32> to vector<4x32xf32>
    %21 = arith.addf %18, %20 : vector<4x32xf32>
    %c0_13 = arith.constant 0 : index
    %c0_14 = arith.constant 0 : index
    %22 = vector.load %arg18[%c0_13, %c0_14] : memref<19x32xf32, #tpu.memory_space<vmem>>, vector<19x32xf32>
    %23 = vector.extract_strided_slice %22 {offsets = [0, 0], sizes = [1, 32], strides = [1, 1]} : vector<19x32xf32> to vector<1x32xf32>
    %24 = vector.extract_strided_slice %22 {offsets = [1, 0], sizes = [1, 32], strides = [1, 1]} : vector<19x32xf32> to vector<1x32xf32>
    %25 = vector.extract_strided_slice %22 {offsets = [2, 0], sizes = [1, 32], strides = [1, 1]} : vector<19x32xf32> to vector<1x32xf32>
    %26 = vector.extract_strided_slice %22 {offsets = [3, 0], sizes = [1, 32], strides = [1, 1]} : vector<19x32xf32> to vector<1x32xf32>
    %27 = vector.extract_strided_slice %22 {offsets = [4, 0], sizes = [1, 32], strides = [1, 1]} : vector<19x32xf32> to vector<1x32xf32>
    %28 = vector.extract_strided_slice %22 {offsets = [5, 0], sizes = [1, 32], strides = [1, 1]} : vector<19x32xf32> to vector<1x32xf32>
    %29 = vector.extract_strided_slice %22 {offsets = [6, 0], sizes = [1, 32], strides = [1, 1]} : vector<19x32xf32> to vector<1x32xf32>
    %30 = vector.extract_strided_slice %22 {offsets = [7, 0], sizes = [1, 32], strides = [1, 1]} : vector<19x32xf32> to vector<1x32xf32>
    %31 = vector.extract_strided_slice %22 {offsets = [8, 0], sizes = [1, 32], strides = [1, 1]} : vector<19x32xf32> to vector<1x32xf32>
    %32 = vector.extract_strided_slice %22 {offsets = [9, 0], sizes = [1, 32], strides = [1, 1]} : vector<19x32xf32> to vector<1x32xf32>
    %33 = vector.extract_strided_slice %22 {offsets = [10, 0], sizes = [1, 32], strides = [1, 1]} : vector<19x32xf32> to vector<1x32xf32>
    %34 = vector.extract_strided_slice %22 {offsets = [11, 0], sizes = [1, 32], strides = [1, 1]} : vector<19x32xf32> to vector<1x32xf32>
    %35 = vector.extract_strided_slice %22 {offsets = [12, 0], sizes = [1, 32], strides = [1, 1]} : vector<19x32xf32> to vector<1x32xf32>
    %36 = vector.extract_strided_slice %22 {offsets = [13, 0], sizes = [1, 32], strides = [1, 1]} : vector<19x32xf32> to vector<1x32xf32>
    %37 = vector.extract_strided_slice %22 {offsets = [14, 0], sizes = [1, 32], strides = [1, 1]} : vector<19x32xf32> to vector<1x32xf32>
    %38 = vector.extract_strided_slice %22 {offsets = [15, 0], sizes = [1, 32], strides = [1, 1]} : vector<19x32xf32> to vector<1x32xf32>
    %39 = vector.extract_strided_slice %22 {offsets = [16, 0], sizes = [1, 32], strides = [1, 1]} : vector<19x32xf32> to vector<1x32xf32>
    %40 = vector.extract_strided_slice %22 {offsets = [17, 0], sizes = [1, 32], strides = [1, 1]} : vector<19x32xf32> to vector<1x32xf32>
    %41 = vector.extract_strided_slice %22 {offsets = [18, 0], sizes = [1, 32], strides = [1, 1]} : vector<19x32xf32> to vector<1x32xf32>
    %c0_15 = arith.constant 0 : index
    %c0_16 = arith.constant 0 : index
    %42 = vector.load %arg19[%c0_15, %c0_16] : memref<2x128xf32, #tpu.memory_space<vmem>>, vector<2x128xf32>
    %43 = vector.extract_strided_slice %42 {offsets = [0, 0], sizes = [1, 128], strides = [1, 1]} : vector<2x128xf32> to vector<1x128xf32>
    %44 = vector.extract_strided_slice %42 {offsets = [1, 0], sizes = [1, 128], strides = [1, 1]} : vector<2x128xf32> to vector<1x128xf32>
    %c0_17 = arith.constant 0 : index
    %c0_18 = arith.constant 0 : index
    %45 = vector.load %arg1[%c0_17, %c0_18] : memref<4x27xf32, #tpu.memory_space<vmem>>, vector<4x27xf32>
    %c0_19 = arith.constant 0 : index
    %c0_20 = arith.constant 0 : index
    %46 = vector.load %arg3[%c0_19, %c0_20] : memref<32x32xf32, #tpu.memory_space<vmem>>, vector<32x32xf32>
    %c0_21 = arith.constant 0 : index
    %c0_22 = arith.constant 0 : index
    %47 = vector.load %arg8[%c0_21, %c0_22] : memref<27x32xf32, #tpu.memory_space<vmem>>, vector<27x32xf32>
    %cst_23 = arith.constant dense<0.000000e+00> : vector<4x32xf32>
    %48 = tpu.matmul %45, %47, %cst_23 {dimension_numbers = #tpu.dot_dimension_numbers<[1], [0], [0], [1], [0, 0, 1, 1], [], []>, precision = #tpu.contract_precision<fp32>} : vector<4x27xf32>, vector<27x32xf32>, vector<4x32xf32> -> vector<4x32xf32>
    %49 = vector.broadcast %23 : vector<1x32xf32> to vector<4x32xf32>
    %50 = arith.addf %48, %49 : vector<4x32xf32>
    %cst_24 = arith.constant dense<0.000000e+00> : vector<4xf32>
    %51 = vector.multi_reduction <add>, %50, %cst_24 [1] : vector<4x32xf32> to vector<4xf32>
    %52 = vector.shape_cast %51 : vector<4xf32> to vector<4x1xf32>
    %cst_25 = arith.constant 3.200000e+01 : f32
    %53 = vector.broadcast %cst_25 : f32 to vector<4x1xf32>
    %54 = arith.divf %52, %53 : vector<4x1xf32>
    %55 = vector.broadcast %54 : vector<4x1xf32> to vector<4x32xf32>
    %56 = arith.subf %50, %55 : vector<4x32xf32>
    %57 = arith.mulf %56, %56 : vector<4x32xf32>
    %cst_26 = arith.constant dense<0.000000e+00> : vector<4xf32>
    %58 = vector.multi_reduction <add>, %57, %cst_26 [1] : vector<4x32xf32> to vector<4xf32>
    %59 = vector.shape_cast %58 : vector<4xf32> to vector<4x1xf32>
    %cst_27 = arith.constant 3.200000e+01 : f32
    %60 = vector.broadcast %cst_27 : f32 to vector<4x1xf32>
    %61 = arith.divf %59, %60 : vector<4x1xf32>
    %cst_28 = arith.constant 9.99999974E-6 : f32
    %62 = vector.broadcast %cst_28 : f32 to vector<4x1xf32>
    %63 = arith.addf %61, %62 : vector<4x1xf32>
    %64 = math.rsqrt %63 : vector<4x1xf32>
    %65 = vector.broadcast %64 : vector<4x1xf32> to vector<4x32xf32>
    %66 = arith.mulf %56, %65 : vector<4x32xf32>
    %67 = vector.broadcast %24 : vector<1x32xf32> to vector<4x32xf32>
    %68 = arith.mulf %66, %67 : vector<4x32xf32>
    %69 = vector.broadcast %25 : vector<1x32xf32> to vector<4x32xf32>
    %70 = arith.addf %68, %69 : vector<4x32xf32>
    %c0_29 = arith.constant 0 : index
    %c0_30 = arith.constant 0 : index
    %71 = vector.load %arg9[%c0_29, %c0_30] : memref<32x256xf32, #tpu.memory_space<vmem>>, vector<32x256xf32>
    %cst_31 = arith.constant dense<0.000000e+00> : vector<4x256xf32>
    %72 = tpu.matmul %21, %71, %cst_31 {dimension_numbers = #tpu.dot_dimension_numbers<[1], [0], [0], [1], [0, 0, 1, 1], [], []>, precision = #tpu.contract_precision<fp32>} : vector<4x32xf32>, vector<32x256xf32>, vector<4x256xf32> -> vector<4x256xf32>
    %c0_32 = arith.constant 0 : index
    %c0_33 = arith.constant 0 : index
    %73 = vector.load %arg10[%c0_32, %c0_33] : memref<1x256xf32, #tpu.memory_space<vmem>>, vector<1x256xf32>
    %74 = vector.broadcast %73 : vector<1x256xf32> to vector<4x256xf32>
    %75 = arith.addf %72, %74 : vector<4x256xf32>
    %76 = vector.extract_strided_slice %75 {offsets = [0, 0], sizes = [4, 32], strides = [1, 1]} : vector<4x256xf32> to vector<4x32xf32>
    %77 = vector.extract_strided_slice %75 {offsets = [0, 32], sizes = [4, 32], strides = [1, 1]} : vector<4x256xf32> to vector<4x32xf32>
    %78 = vector.extract_strided_slice %75 {offsets = [0, 64], sizes = [4, 32], strides = [1, 1]} : vector<4x256xf32> to vector<4x32xf32>
    %79 = vector.extract_strided_slice %75 {offsets = [0, 96], sizes = [4, 32], strides = [1, 1]} : vector<4x256xf32> to vector<4x32xf32>
    %80 = vector.extract_strided_slice %75 {offsets = [0, 128], sizes = [4, 32], strides = [1, 1]} : vector<4x256xf32> to vector<4x32xf32>
    %81 = vector.extract_strided_slice %75 {offsets = [0, 160], sizes = [4, 32], strides = [1, 1]} : vector<4x256xf32> to vector<4x32xf32>
    %82 = vector.extract_strided_slice %75 {offsets = [0, 192], sizes = [4, 32], strides = [1, 1]} : vector<4x256xf32> to vector<4x32xf32>
    %83 = vector.extract_strided_slice %75 {offsets = [0, 224], sizes = [4, 32], strides = [1, 1]} : vector<4x256xf32> to vector<4x32xf32>
    %cst_34 = arith.constant 1.000000e+00 : f32
    %84 = vector.broadcast %cst_34 : f32 to vector<4x32xf32>
    %85 = arith.addf %84, %77 : vector<4x32xf32>
    %86 = arith.mulf %70, %85 : vector<4x32xf32>
    %87 = arith.addf %86, %76 : vector<4x32xf32>
    %cst_35 = arith.constant dense<0.000000e+00> : vector<4xf32>
    %88 = vector.multi_reduction <add>, %87, %cst_35 [1] : vector<4x32xf32> to vector<4xf32>
    %89 = vector.shape_cast %88 : vector<4xf32> to vector<4x1xf32>
    %cst_36 = arith.constant 3.200000e+01 : f32
    %90 = vector.broadcast %cst_36 : f32 to vector<4x1xf32>
    %91 = arith.divf %89, %90 : vector<4x1xf32>
    %92 = vector.broadcast %91 : vector<4x1xf32> to vector<4x32xf32>
    %93 = arith.subf %87, %92 : vector<4x32xf32>
    %94 = arith.mulf %93, %93 : vector<4x32xf32>
    %cst_37 = arith.constant dense<0.000000e+00> : vector<4xf32>
    %95 = vector.multi_reduction <add>, %94, %cst_37 [1] : vector<4x32xf32> to vector<4xf32>
    %96 = vector.shape_cast %95 : vector<4xf32> to vector<4x1xf32>
    %cst_38 = arith.constant 3.200000e+01 : f32
    %97 = vector.broadcast %cst_38 : f32 to vector<4x1xf32>
    %98 = arith.divf %96, %97 : vector<4x1xf32>
    %cst_39 = arith.constant 9.99999974E-6 : f32
    %99 = vector.broadcast %cst_39 : f32 to vector<4x1xf32>
    %100 = arith.addf %98, %99 : vector<4x1xf32>
    %101 = math.rsqrt %100 : vector<4x1xf32>
    %102 = vector.broadcast %101 : vector<4x1xf32> to vector<4x32xf32>
    %103 = arith.mulf %93, %102 : vector<4x32xf32>
    %104 = vector.broadcast %26 : vector<1x32xf32> to vector<4x32xf32>
    %105 = arith.mulf %103, %104 : vector<4x32xf32>
    %106 = vector.broadcast %27 : vector<1x32xf32> to vector<4x32xf32>
    %107 = arith.addf %105, %106 : vector<4x32xf32>
    %cst_40 = arith.constant dense<0.000000e+00> : vector<32xf32>
    %108 = vector.multi_reduction <add>, %46, %cst_40 [1] : vector<32x32xf32> to vector<32xf32>
    %109 = vector.shape_cast %108 : vector<32xf32> to vector<32x1xf32>
    %cst_41 = arith.constant 3.200000e+01 : f32
    %110 = vector.broadcast %cst_41 : f32 to vector<32x1xf32>
    %111 = arith.divf %109, %110 : vector<32x1xf32>
    %112 = vector.broadcast %111 : vector<32x1xf32> to vector<32x32xf32>
    %113 = arith.subf %46, %112 : vector<32x32xf32>
    %114 = arith.mulf %113, %113 : vector<32x32xf32>
    %cst_42 = arith.constant dense<0.000000e+00> : vector<32xf32>
    %115 = vector.multi_reduction <add>, %114, %cst_42 [1] : vector<32x32xf32> to vector<32xf32>
    %116 = vector.shape_cast %115 : vector<32xf32> to vector<32x1xf32>
    %cst_43 = arith.constant 3.200000e+01 : f32
    %117 = vector.broadcast %cst_43 : f32 to vector<32x1xf32>
    %118 = arith.divf %116, %117 : vector<32x1xf32>
    %cst_44 = arith.constant 9.99999974E-6 : f32
    %119 = vector.broadcast %cst_44 : f32 to vector<32x1xf32>
    %120 = arith.addf %118, %119 : vector<32x1xf32>
    %121 = math.rsqrt %120 : vector<32x1xf32>
    %122 = vector.broadcast %121 : vector<32x1xf32> to vector<32x32xf32>
    %123 = arith.mulf %113, %122 : vector<32x32xf32>
    %124 = vector.broadcast %28 : vector<1x32xf32> to vector<32x32xf32>
    %125 = arith.mulf %123, %124 : vector<32x32xf32>
    %126 = vector.broadcast %29 : vector<1x32xf32> to vector<32x32xf32>
    %127 = arith.addf %125, %126 : vector<32x32xf32>
    %c0_45 = arith.constant 0 : index
    %c0_46 = arith.constant 0 : index
    %128 = vector.load %arg11[%c0_45, %c0_46] : memref<32x32xf32, #tpu.memory_space<vmem>>, vector<32x32xf32>
    %cst_47 = arith.constant dense<0.000000e+00> : vector<4x32xf32>
    %129 = tpu.matmul %107, %128, %cst_47 {dimension_numbers = #tpu.dot_dimension_numbers<[1], [0], [0], [1], [0, 0, 1, 1], [], []>, precision = #tpu.contract_precision<fp32>} : vector<4x32xf32>, vector<32x32xf32>, vector<4x32xf32> -> vector<4x32xf32>
    %130 = vector.broadcast %30 : vector<1x32xf32> to vector<4x32xf32>
    %131 = arith.addf %129, %130 : vector<4x32xf32>
    %132 = arith.mulf %131, %131 : vector<4x32xf32>
    %cst_48 = arith.constant dense<0.000000e+00> : vector<4xf32>
    %133 = vector.multi_reduction <add>, %132, %cst_48 [1] : vector<4x32xf32> to vector<4xf32>
    %134 = vector.shape_cast %133 : vector<4xf32> to vector<4x1xf32>
    %cst_49 = arith.constant 3.200000e+01 : f32
    %135 = vector.broadcast %cst_49 : f32 to vector<4x1xf32>
    %136 = arith.divf %134, %135 : vector<4x1xf32>
    %cst_50 = arith.constant 9.99999997E-7 : f32
    %137 = vector.broadcast %cst_50 : f32 to vector<4x1xf32>
    %138 = arith.addf %136, %137 : vector<4x1xf32>
    %139 = math.rsqrt %138 : vector<4x1xf32>
    %140 = vector.broadcast %139 : vector<4x1xf32> to vector<4x32xf32>
    %141 = arith.mulf %131, %140 : vector<4x32xf32>
    %142 = vector.broadcast %33 : vector<1x32xf32> to vector<4x32xf32>
    %143 = arith.mulf %141, %142 : vector<4x32xf32>
    %c0_51 = arith.constant 0 : index
    %c0_52 = arith.constant 0 : index
    %144 = vector.load %arg12[%c0_51, %c0_52] : memref<32x64xf32, #tpu.memory_space<vmem>>, vector<32x64xf32>
    %cst_53 = arith.constant dense<0.000000e+00> : vector<32x64xf32>
    %145 = tpu.matmul %127, %144, %cst_53 {dimension_numbers = #tpu.dot_dimension_numbers<[1], [0], [0], [1], [0, 0, 1, 1], [], []>, precision = #tpu.contract_precision<fp32>} : vector<32x32xf32>, vector<32x64xf32>, vector<32x64xf32> -> vector<32x64xf32>
    %146 = vector.extract_strided_slice %145 {offsets = [0, 0], sizes = [32, 32], strides = [1, 1]} : vector<32x64xf32> to vector<32x32xf32>
    %147 = vector.broadcast %31 : vector<1x32xf32> to vector<32x32xf32>
    %148 = arith.addf %146, %147 : vector<32x32xf32>
    %149 = arith.mulf %148, %148 : vector<32x32xf32>
    %cst_54 = arith.constant dense<0.000000e+00> : vector<32xf32>
    %150 = vector.multi_reduction <add>, %149, %cst_54 [1] : vector<32x32xf32> to vector<32xf32>
    %151 = vector.shape_cast %150 : vector<32xf32> to vector<32x1xf32>
    %cst_55 = arith.constant 3.200000e+01 : f32
    %152 = vector.broadcast %cst_55 : f32 to vector<32x1xf32>
    %153 = arith.divf %151, %152 : vector<32x1xf32>
    %cst_56 = arith.constant 9.99999997E-7 : f32
    %154 = vector.broadcast %cst_56 : f32 to vector<32x1xf32>
    %155 = arith.addf %153, %154 : vector<32x1xf32>
    %156 = math.rsqrt %155 : vector<32x1xf32>
    %157 = vector.broadcast %156 : vector<32x1xf32> to vector<32x32xf32>
    %158 = arith.mulf %148, %157 : vector<32x32xf32>
    %159 = vector.broadcast %34 : vector<1x32xf32> to vector<32x32xf32>
    %160 = arith.mulf %158, %159 : vector<32x32xf32>
    %161 = vector.extract_strided_slice %145 {offsets = [0, 32], sizes = [32, 32], strides = [1, 1]} : vector<32x64xf32> to vector<32x32xf32>
    %162 = vector.broadcast %32 : vector<1x32xf32> to vector<32x32xf32>
    %163 = arith.addf %161, %162 : vector<32x32xf32>
    %164 = vector.extract_strided_slice %143 {offsets = [0, 0], sizes = [4, 4], strides = [1, 1]} : vector<4x32xf32> to vector<4x4xf32>
    %165 = vector.extract_strided_slice %143 {offsets = [0, 4], sizes = [4, 4], strides = [1, 1]} : vector<4x32xf32> to vector<4x4xf32>
    %166 = vector.extract_strided_slice %143 {offsets = [0, 8], sizes = [4, 4], strides = [1, 1]} : vector<4x32xf32> to vector<4x4xf32>
    %167 = vector.extract_strided_slice %143 {offsets = [0, 12], sizes = [4, 4], strides = [1, 1]} : vector<4x32xf32> to vector<4x4xf32>
    %168 = vector.extract_strided_slice %143 {offsets = [0, 16], sizes = [4, 4], strides = [1, 1]} : vector<4x32xf32> to vector<4x4xf32>
    %169 = vector.extract_strided_slice %143 {offsets = [0, 20], sizes = [4, 4], strides = [1, 1]} : vector<4x32xf32> to vector<4x4xf32>
    %170 = vector.extract_strided_slice %143 {offsets = [0, 24], sizes = [4, 4], strides = [1, 1]} : vector<4x32xf32> to vector<4x4xf32>
    %171 = vector.extract_strided_slice %143 {offsets = [0, 28], sizes = [4, 4], strides = [1, 1]} : vector<4x32xf32> to vector<4x4xf32>
    %172 = vector.shape_cast %164 : vector<4x4xf32> to vector<4x1x4xf32>
    %173 = vector.shape_cast %165 : vector<4x4xf32> to vector<4x1x4xf32>
    %174 = vector.shape_cast %166 : vector<4x4xf32> to vector<4x1x4xf32>
    %175 = vector.shape_cast %167 : vector<4x4xf32> to vector<4x1x4xf32>
    %176 = vector.shape_cast %168 : vector<4x4xf32> to vector<4x1x4xf32>
    %177 = vector.shape_cast %169 : vector<4x4xf32> to vector<4x1x4xf32>
    %178 = vector.shape_cast %170 : vector<4x4xf32> to vector<4x1x4xf32>
    %179 = vector.shape_cast %171 : vector<4x4xf32> to vector<4x1x4xf32>
    %180 = tpu.concatenate %172, %173, %174, %175, %176, %177, %178, %179 in 1 : vector<4x1x4xf32>, vector<4x1x4xf32>, vector<4x1x4xf32>, vector<4x1x4xf32>, vector<4x1x4xf32>, vector<4x1x4xf32>, vector<4x1x4xf32>, vector<4x1x4xf32> -> vector<4x8x4xf32>
    %181 = tpu.concatenate %180, %180, %180, %180, %180, %180, %180, %180 in 2 : vector<4x8x4xf32>, vector<4x8x4xf32>, vector<4x8x4xf32>, vector<4x8x4xf32>, vector<4x8x4xf32>, vector<4x8x4xf32>, vector<4x8x4xf32>, vector<4x8x4xf32> -> vector<4x8x32xf32>
    %182 = vector.shape_cast %181 : vector<4x8x32xf32> to vector<32x32xf32>
    %183 = arith.mulf %182, %160 : vector<32x32xf32>
    %c0_57 = arith.constant 0 : index
    %c0_58 = arith.constant 0 : index
    %184 = vector.load %arg20[%c0_57, %c0_58] : memref<32x8xf32, #tpu.memory_space<vmem>>, vector<32x8xf32>
    %cst_59 = arith.constant dense<0.000000e+00> : vector<32x8xf32>
    %185 = tpu.matmul %183, %184, %cst_59 {dimension_numbers = #tpu.dot_dimension_numbers<[1], [0], [0], [1], [0, 0, 1, 1], [], []>, precision = #tpu.contract_precision<fp32>} : vector<32x32xf32>, vector<32x8xf32>, vector<32x8xf32> -> vector<32x8xf32>
    %cst_60 = arith.constant 5.000000e-01 : f32
    %186 = vector.broadcast %cst_60 : f32 to vector<32x8xf32>
    %187 = arith.mulf %185, %186 : vector<32x8xf32>
    %cst_61 = arith.constant dense<0xFF800000> : vector<32xf32>
    %188 = vector.multi_reduction <maximumf>, %187, %cst_61 [1] : vector<32x8xf32> to vector<32xf32>
    %189 = vector.shape_cast %188 : vector<32xf32> to vector<32x1xf32>
    %190 = vector.broadcast %189 : vector<32x1xf32> to vector<32x8xf32>
    %191 = arith.subf %187, %190 : vector<32x8xf32>
    %192 = math.exp %191 : vector<32x8xf32>
    %cst_62 = arith.constant dense<0.000000e+00> : vector<32xf32>
    %193 = vector.multi_reduction <add>, %192, %cst_62 [1] : vector<32x8xf32> to vector<32xf32>
    %194 = vector.shape_cast %193 : vector<32xf32> to vector<32x1xf32>
    %195 = tpu.reciprocal %194 {approx = true} : vector<32x1xf32> -> vector<32x1xf32>
    %196 = arith.mulf %194, %195 : vector<32x1xf32>
    %cst_63 = arith.constant 2.000000e+00 : f32
    %197 = vector.broadcast %cst_63 : f32 to vector<32x1xf32>
    %198 = arith.subf %197, %196 : vector<32x1xf32>
    %199 = arith.mulf %195, %198 : vector<32x1xf32>
    %200 = vector.broadcast %199 : vector<32x1xf32> to vector<32x8xf32>
    %201 = arith.mulf %192, %200 : vector<32x8xf32>
    %c0_64 = arith.constant 0 : index
    %c0_65 = arith.constant 0 : index
    %202 = vector.load %arg21[%c0_64, %c0_65] : memref<8x32xf32, #tpu.memory_space<vmem>>, vector<8x32xf32>
    %cst_66 = arith.constant dense<0.000000e+00> : vector<32x32xf32>
    %203 = tpu.matmul %201, %202, %cst_66 {dimension_numbers = #tpu.dot_dimension_numbers<[1], [0], [0], [1], [0, 0, 1, 1], [], []>, precision = #tpu.contract_precision<fp32>} : vector<32x8xf32>, vector<8x32xf32>, vector<32x32xf32> -> vector<32x32xf32>
    %204 = arith.mulf %203, %163 : vector<32x32xf32>
    %c0_67 = arith.constant 0 : index
    %c0_68 = arith.constant 0 : index
    %205 = vector.load %arg22[%c0_67, %c0_68] : memref<32x4xf32, #tpu.memory_space<vmem>>, vector<32x4xf32>
    %cst_69 = arith.constant dense<0.000000e+00> : vector<32x4xf32>
    %206 = tpu.matmul %204, %205, %cst_69 {dimension_numbers = #tpu.dot_dimension_numbers<[1], [0], [0], [1], [0, 0, 1, 1], [], []>, precision = #tpu.contract_precision<fp32>} : vector<32x32xf32>, vector<32x4xf32>, vector<32x4xf32> -> vector<32x4xf32>
    %207 = vector.shape_cast %206 : vector<32x4xf32> to vector<4x8x4xf32>
    %208 = vector.extract_strided_slice %207 {offsets = [0, 0, 0], sizes = [4, 1, 4], strides = [1, 1, 1]} : vector<4x8x4xf32> to vector<4x1x4xf32>
    %209 = vector.shape_cast %208 : vector<4x1x4xf32> to vector<4x4xf32>
    %210 = vector.extract_strided_slice %207 {offsets = [0, 1, 0], sizes = [4, 1, 4], strides = [1, 1, 1]} : vector<4x8x4xf32> to vector<4x1x4xf32>
    %211 = vector.shape_cast %210 : vector<4x1x4xf32> to vector<4x4xf32>
    %212 = vector.extract_strided_slice %207 {offsets = [0, 2, 0], sizes = [4, 1, 4], strides = [1, 1, 1]} : vector<4x8x4xf32> to vector<4x1x4xf32>
    %213 = vector.shape_cast %212 : vector<4x1x4xf32> to vector<4x4xf32>
    %214 = vector.extract_strided_slice %207 {offsets = [0, 3, 0], sizes = [4, 1, 4], strides = [1, 1, 1]} : vector<4x8x4xf32> to vector<4x1x4xf32>
    %215 = vector.shape_cast %214 : vector<4x1x4xf32> to vector<4x4xf32>
    %216 = vector.extract_strided_slice %207 {offsets = [0, 4, 0], sizes = [4, 1, 4], strides = [1, 1, 1]} : vector<4x8x4xf32> to vector<4x1x4xf32>
    %217 = vector.shape_cast %216 : vector<4x1x4xf32> to vector<4x4xf32>
    %218 = vector.extract_strided_slice %207 {offsets = [0, 5, 0], sizes = [4, 1, 4], strides = [1, 1, 1]} : vector<4x8x4xf32> to vector<4x1x4xf32>
    %219 = vector.shape_cast %218 : vector<4x1x4xf32> to vector<4x4xf32>
    %220 = vector.extract_strided_slice %207 {offsets = [0, 6, 0], sizes = [4, 1, 4], strides = [1, 1, 1]} : vector<4x8x4xf32> to vector<4x1x4xf32>
    %221 = vector.shape_cast %220 : vector<4x1x4xf32> to vector<4x4xf32>
    %222 = vector.extract_strided_slice %207 {offsets = [0, 7, 0], sizes = [4, 1, 4], strides = [1, 1, 1]} : vector<4x8x4xf32> to vector<4x1x4xf32>
    %223 = vector.shape_cast %222 : vector<4x1x4xf32> to vector<4x4xf32>
    %224 = tpu.concatenate %209, %211, %213, %215, %217, %219, %221, %223 in 1 : vector<4x4xf32>, vector<4x4xf32>, vector<4x4xf32>, vector<4x4xf32>, vector<4x4xf32>, vector<4x4xf32>, vector<4x4xf32>, vector<4x4xf32> -> vector<4x32xf32>
    %c0_70 = arith.constant 0 : index
    %c0_71 = arith.constant 0 : index
    %225 = vector.load %arg13[%c0_70, %c0_71] : memref<32x32xf32, #tpu.memory_space<vmem>>, vector<32x32xf32>
    %cst_72 = arith.constant dense<0.000000e+00> : vector<4x32xf32>
    %226 = tpu.matmul %224, %225, %cst_72 {dimension_numbers = #tpu.dot_dimension_numbers<[1], [0], [0], [1], [0, 0, 1, 1], [], []>, precision = #tpu.contract_precision<fp32>} : vector<4x32xf32>, vector<32x32xf32>, vector<4x32xf32> -> vector<4x32xf32>
    %227 = vector.broadcast %35 : vector<1x32xf32> to vector<4x32xf32>
    %228 = arith.addf %226, %227 : vector<4x32xf32>
    %229 = arith.addf %228, %87 : vector<4x32xf32>
    %cst_73 = arith.constant dense<0.000000e+00> : vector<4xf32>
    %230 = vector.multi_reduction <add>, %229, %cst_73 [1] : vector<4x32xf32> to vector<4xf32>
    %231 = vector.shape_cast %230 : vector<4xf32> to vector<4x1xf32>
    %cst_74 = arith.constant 3.200000e+01 : f32
    %232 = vector.broadcast %cst_74 : f32 to vector<4x1xf32>
    %233 = arith.divf %231, %232 : vector<4x1xf32>
    %234 = vector.broadcast %233 : vector<4x1xf32> to vector<4x32xf32>
    %235 = arith.subf %229, %234 : vector<4x32xf32>
    %236 = arith.mulf %235, %235 : vector<4x32xf32>
    %cst_75 = arith.constant dense<0.000000e+00> : vector<4xf32>
    %237 = vector.multi_reduction <add>, %236, %cst_75 [1] : vector<4x32xf32> to vector<4xf32>
    %238 = vector.shape_cast %237 : vector<4xf32> to vector<4x1xf32>
    %cst_76 = arith.constant 3.200000e+01 : f32
    %239 = vector.broadcast %cst_76 : f32 to vector<4x1xf32>
    %240 = arith.divf %238, %239 : vector<4x1xf32>
    %cst_77 = arith.constant 9.99999974E-6 : f32
    %241 = vector.broadcast %cst_77 : f32 to vector<4x1xf32>
    %242 = arith.addf %240, %241 : vector<4x1xf32>
    %243 = math.rsqrt %242 : vector<4x1xf32>
    %244 = vector.broadcast %243 : vector<4x1xf32> to vector<4x32xf32>
    %245 = arith.mulf %235, %244 : vector<4x32xf32>
    %246 = vector.broadcast %36 : vector<1x32xf32> to vector<4x32xf32>
    %247 = arith.mulf %245, %246 : vector<4x32xf32>
    %248 = vector.broadcast %37 : vector<1x32xf32> to vector<4x32xf32>
    %249 = arith.addf %247, %248 : vector<4x32xf32>
    %c0_78 = arith.constant 0 : index
    %c0_79 = arith.constant 0 : index
    %250 = vector.load %arg14[%c0_78, %c0_79] : memref<32x128xf32, #tpu.memory_space<vmem>>, vector<32x128xf32>
    %cst_80 = arith.constant dense<0.000000e+00> : vector<4x128xf32>
    %251 = tpu.matmul %249, %250, %cst_80 {dimension_numbers = #tpu.dot_dimension_numbers<[1], [0], [0], [1], [0, 0, 1, 1], [], []>, precision = #tpu.contract_precision<fp32>} : vector<4x32xf32>, vector<32x128xf32>, vector<4x128xf32> -> vector<4x128xf32>
    %252 = vector.broadcast %43 : vector<1x128xf32> to vector<4x128xf32>
    %253 = arith.addf %251, %252 : vector<4x128xf32>
    %cst_81 = arith.constant 5.000000e-01 : f32
    %254 = vector.broadcast %cst_81 : f32 to vector<4x128xf32>
    %255 = arith.mulf %254, %253 : vector<4x128xf32>
    %cst_82 = arith.constant 0.707106769 : f32
    %256 = vector.broadcast %cst_82 : f32 to vector<4x128xf32>
    %257 = arith.mulf %253, %256 : vector<4x128xf32>
    %258 = math.absf %257 : vector<4x128xf32>
    %cst_83 = arith.constant 0.327591091 : f32
    %259 = vector.broadcast %cst_83 : f32 to vector<4x128xf32>
    %260 = arith.mulf %259, %258 : vector<4x128xf32>
    %cst_84 = arith.constant 1.000000e+00 : f32
    %261 = vector.broadcast %cst_84 : f32 to vector<4x128xf32>
    %262 = arith.addf %261, %260 : vector<4x128xf32>
    %cst_85 = arith.constant 1.000000e+00 : f32
    %263 = vector.broadcast %cst_85 : f32 to vector<4x128xf32>
    %264 = arith.divf %263, %262 : vector<4x128xf32>
    %cst_86 = arith.constant 1.06140542 : f32
    %265 = vector.broadcast %cst_86 : f32 to vector<4x128xf32>
    %266 = arith.mulf %265, %264 : vector<4x128xf32>
    %cst_87 = arith.constant -1.45315206 : f32
    %267 = vector.broadcast %cst_87 : f32 to vector<4x128xf32>
    %268 = arith.addf %266, %267 : vector<4x128xf32>
    %269 = arith.mulf %268, %264 : vector<4x128xf32>
    %cst_88 = arith.constant 1.42141378 : f32
    %270 = vector.broadcast %cst_88 : f32 to vector<4x128xf32>
    %271 = arith.addf %269, %270 : vector<4x128xf32>
    %272 = arith.mulf %271, %264 : vector<4x128xf32>
    %cst_89 = arith.constant -0.284496725 : f32
    %273 = vector.broadcast %cst_89 : f32 to vector<4x128xf32>
    %274 = arith.addf %272, %273 : vector<4x128xf32>
    %275 = arith.mulf %274, %264 : vector<4x128xf32>
    %cst_90 = arith.constant 0.254829586 : f32
    %276 = vector.broadcast %cst_90 : f32 to vector<4x128xf32>
    %277 = arith.addf %275, %276 : vector<4x128xf32>
    %278 = arith.mulf %277, %264 : vector<4x128xf32>
    %cst_91 = arith.constant 0.000000e+00 : f32
    %279 = vector.broadcast %cst_91 : f32 to vector<4x128xf32>
    %280 = arith.subf %279, %258 : vector<4x128xf32>
    %281 = arith.mulf %280, %258 : vector<4x128xf32>
    %282 = math.exp %281 : vector<4x128xf32>
    %283 = arith.mulf %278, %282 : vector<4x128xf32>
    %cst_92 = arith.constant 1.000000e+00 : f32
    %284 = vector.broadcast %cst_92 : f32 to vector<4x128xf32>
    %285 = arith.subf %284, %283 : vector<4x128xf32>
    %cst_93 = arith.constant 0.000000e+00 : f32
    %286 = vector.broadcast %cst_93 : f32 to vector<4x128xf32>
    %287 = arith.cmpf oge, %257, %286 : vector<4x128xf32>
    %cst_94 = arith.constant 0.000000e+00 : f32
    %288 = vector.broadcast %cst_94 : f32 to vector<4x128xf32>
    %289 = arith.subf %288, %285 : vector<4x128xf32>
    %290 = arith.select %287, %285, %289 : vector<4x128xi1>, vector<4x128xf32>
    %cst_95 = arith.constant 1.000000e+00 : f32
    %291 = vector.broadcast %cst_95 : f32 to vector<4x128xf32>
    %292 = arith.addf %291, %290 : vector<4x128xf32>
    %293 = arith.mulf %255, %292 : vector<4x128xf32>
    %c0_96 = arith.constant 0 : index
    %c0_97 = arith.constant 0 : index
    %294 = vector.load %arg15[%c0_96, %c0_97] : memref<128x32xf32, #tpu.memory_space<vmem>>, vector<128x32xf32>
    %cst_98 = arith.constant dense<0.000000e+00> : vector<4x32xf32>
    %295 = tpu.matmul %293, %294, %cst_98 {dimension_numbers = #tpu.dot_dimension_numbers<[1], [0], [0], [1], [0, 0, 1, 1], [], []>, precision = #tpu.contract_precision<fp32>} : vector<4x128xf32>, vector<128x32xf32>, vector<4x32xf32> -> vector<4x32xf32>
    %296 = vector.broadcast %38 : vector<1x32xf32> to vector<4x32xf32>
    %297 = arith.addf %295, %296 : vector<4x32xf32>
    %298 = arith.addf %229, %297 : vector<4x32xf32>
    %cst_99 = arith.constant 0.000000e+00 : f32
    %299 = vector.broadcast %cst_99 : f32 to vector<4x32xf32>
    %300 = arith.subf %299, %78 : vector<4x32xf32>
    %301 = math.exp %300 : vector<4x32xf32>
    %cst_100 = arith.constant 1.000000e+00 : f32
    %302 = vector.broadcast %cst_100 : f32 to vector<4x32xf32>
    %303 = arith.addf %302, %301 : vector<4x32xf32>
    %304 = tpu.reciprocal %303 {approx = true} : vector<4x32xf32> -> vector<4x32xf32>
    %305 = arith.mulf %303, %304 : vector<4x32xf32>
    %cst_101 = arith.constant 2.000000e+00 : f32
    %306 = vector.broadcast %cst_101 : f32 to vector<4x32xf32>
    %307 = arith.subf %306, %305 : vector<4x32xf32>
    %308 = arith.mulf %304, %307 : vector<4x32xf32>
    %309 = arith.mulf %298, %308 : vector<4x32xf32>
    %310 = arith.addf %309, %70 : vector<4x32xf32>
    %cst_102 = arith.constant dense<0.000000e+00> : vector<4xf32>
    %311 = vector.multi_reduction <add>, %310, %cst_102 [1] : vector<4x32xf32> to vector<4xf32>
    %312 = vector.shape_cast %311 : vector<4xf32> to vector<4x1xf32>
    %cst_103 = arith.constant 3.200000e+01 : f32
    %313 = vector.broadcast %cst_103 : f32 to vector<4x1xf32>
    %314 = arith.divf %312, %313 : vector<4x1xf32>
    %315 = vector.broadcast %314 : vector<4x1xf32> to vector<4x32xf32>
    %316 = arith.subf %310, %315 : vector<4x32xf32>
    %317 = arith.mulf %316, %316 : vector<4x32xf32>
    %cst_104 = arith.constant dense<0.000000e+00> : vector<4xf32>
    %318 = vector.multi_reduction <add>, %317, %cst_104 [1] : vector<4x32xf32> to vector<4xf32>
    %319 = vector.shape_cast %318 : vector<4xf32> to vector<4x1xf32>
    %cst_105 = arith.constant 3.200000e+01 : f32
    %320 = vector.broadcast %cst_105 : f32 to vector<4x1xf32>
    %321 = arith.divf %319, %320 : vector<4x1xf32>
    %cst_106 = arith.constant 9.99999974E-6 : f32
    %322 = vector.broadcast %cst_106 : f32 to vector<4x1xf32>
    %323 = arith.addf %321, %322 : vector<4x1xf32>
    %324 = math.rsqrt %323 : vector<4x1xf32>
    %325 = vector.broadcast %324 : vector<4x1xf32> to vector<4x32xf32>
    %326 = arith.mulf %316, %325 : vector<4x32xf32>
    %327 = vector.broadcast %39 : vector<1x32xf32> to vector<4x32xf32>
    %328 = arith.mulf %326, %327 : vector<4x32xf32>
    %329 = vector.broadcast %40 : vector<1x32xf32> to vector<4x32xf32>
    %330 = arith.addf %328, %329 : vector<4x32xf32>
    %cst_107 = arith.constant 1.000000e+00 : f32
    %331 = vector.broadcast %cst_107 : f32 to vector<4x32xf32>
    %332 = arith.addf %331, %80 : vector<4x32xf32>
    %333 = arith.mulf %330, %332 : vector<4x32xf32>
    %334 = arith.addf %333, %79 : vector<4x32xf32>
    %c0_108 = arith.constant 0 : index
    %c0_109 = arith.constant 0 : index
    %335 = vector.load %arg16[%c0_108, %c0_109] : memref<32x128xf32, #tpu.memory_space<vmem>>, vector<32x128xf32>
    %cst_110 = arith.constant dense<0.000000e+00> : vector<4x128xf32>
    %336 = tpu.matmul %334, %335, %cst_110 {dimension_numbers = #tpu.dot_dimension_numbers<[1], [0], [0], [1], [0, 0, 1, 1], [], []>, precision = #tpu.contract_precision<fp32>} : vector<4x32xf32>, vector<32x128xf32>, vector<4x128xf32> -> vector<4x128xf32>
    %337 = vector.broadcast %44 : vector<1x128xf32> to vector<4x128xf32>
    %338 = arith.addf %336, %337 : vector<4x128xf32>
    %cst_111 = arith.constant 5.000000e-01 : f32
    %339 = vector.broadcast %cst_111 : f32 to vector<4x128xf32>
    %340 = arith.mulf %339, %338 : vector<4x128xf32>
    %cst_112 = arith.constant 0.707106769 : f32
    %341 = vector.broadcast %cst_112 : f32 to vector<4x128xf32>
    %342 = arith.mulf %338, %341 : vector<4x128xf32>
    %343 = math.absf %342 : vector<4x128xf32>
    %cst_113 = arith.constant 0.327591091 : f32
    %344 = vector.broadcast %cst_113 : f32 to vector<4x128xf32>
    %345 = arith.mulf %344, %343 : vector<4x128xf32>
    %cst_114 = arith.constant 1.000000e+00 : f32
    %346 = vector.broadcast %cst_114 : f32 to vector<4x128xf32>
    %347 = arith.addf %346, %345 : vector<4x128xf32>
    %cst_115 = arith.constant 1.000000e+00 : f32
    %348 = vector.broadcast %cst_115 : f32 to vector<4x128xf32>
    %349 = arith.divf %348, %347 : vector<4x128xf32>
    %cst_116 = arith.constant 1.06140542 : f32
    %350 = vector.broadcast %cst_116 : f32 to vector<4x128xf32>
    %351 = arith.mulf %350, %349 : vector<4x128xf32>
    %cst_117 = arith.constant -1.45315206 : f32
    %352 = vector.broadcast %cst_117 : f32 to vector<4x128xf32>
    %353 = arith.addf %351, %352 : vector<4x128xf32>
    %354 = arith.mulf %353, %349 : vector<4x128xf32>
    %cst_118 = arith.constant 1.42141378 : f32
    %355 = vector.broadcast %cst_118 : f32 to vector<4x128xf32>
    %356 = arith.addf %354, %355 : vector<4x128xf32>
    %357 = arith.mulf %356, %349 : vector<4x128xf32>
    %cst_119 = arith.constant -0.284496725 : f32
    %358 = vector.broadcast %cst_119 : f32 to vector<4x128xf32>
    %359 = arith.addf %357, %358 : vector<4x128xf32>
    %360 = arith.mulf %359, %349 : vector<4x128xf32>
    %cst_120 = arith.constant 0.254829586 : f32
    %361 = vector.broadcast %cst_120 : f32 to vector<4x128xf32>
    %362 = arith.addf %360, %361 : vector<4x128xf32>
    %363 = arith.mulf %362, %349 : vector<4x128xf32>
    %cst_121 = arith.constant 0.000000e+00 : f32
    %364 = vector.broadcast %cst_121 : f32 to vector<4x128xf32>
    %365 = arith.subf %364, %343 : vector<4x128xf32>
    %366 = arith.mulf %365, %343 : vector<4x128xf32>
    %367 = math.exp %366 : vector<4x128xf32>
    %368 = arith.mulf %363, %367 : vector<4x128xf32>
    %cst_122 = arith.constant 1.000000e+00 : f32
    %369 = vector.broadcast %cst_122 : f32 to vector<4x128xf32>
    %370 = arith.subf %369, %368 : vector<4x128xf32>
    %cst_123 = arith.constant 0.000000e+00 : f32
    %371 = vector.broadcast %cst_123 : f32 to vector<4x128xf32>
    %372 = arith.cmpf oge, %342, %371 : vector<4x128xf32>
    %cst_124 = arith.constant 0.000000e+00 : f32
    %373 = vector.broadcast %cst_124 : f32 to vector<4x128xf32>
    %374 = arith.subf %373, %370 : vector<4x128xf32>
    %375 = arith.select %372, %370, %374 : vector<4x128xi1>, vector<4x128xf32>
    %cst_125 = arith.constant 1.000000e+00 : f32
    %376 = vector.broadcast %cst_125 : f32 to vector<4x128xf32>
    %377 = arith.addf %376, %375 : vector<4x128xf32>
    %378 = arith.mulf %340, %377 : vector<4x128xf32>
    %c0_126 = arith.constant 0 : index
    %c0_127 = arith.constant 0 : index
    %379 = vector.load %arg17[%c0_126, %c0_127] : memref<128x32xf32, #tpu.memory_space<vmem>>, vector<128x32xf32>
    %cst_128 = arith.constant dense<0.000000e+00> : vector<4x32xf32>
    %380 = tpu.matmul %378, %379, %cst_128 {dimension_numbers = #tpu.dot_dimension_numbers<[1], [0], [0], [1], [0, 0, 1, 1], [], []>, precision = #tpu.contract_precision<fp32>} : vector<4x128xf32>, vector<128x32xf32>, vector<4x32xf32> -> vector<4x32xf32>
    %381 = vector.broadcast %41 : vector<1x32xf32> to vector<4x32xf32>
    %382 = arith.addf %380, %381 : vector<4x32xf32>
    %cst_129 = arith.constant 1.000000e+00 : f32
    %383 = vector.broadcast %cst_129 : f32 to vector<4x32xf32>
    %384 = arith.addf %383, %82 : vector<4x32xf32>
    %385 = arith.mulf %382, %384 : vector<4x32xf32>
    %386 = arith.addf %385, %81 : vector<4x32xf32>
    %cst_130 = arith.constant 0.000000e+00 : f32
    %387 = vector.broadcast %cst_130 : f32 to vector<4x32xf32>
    %388 = arith.subf %387, %83 : vector<4x32xf32>
    %389 = math.exp %388 : vector<4x32xf32>
    %cst_131 = arith.constant 1.000000e+00 : f32
    %390 = vector.broadcast %cst_131 : f32 to vector<4x32xf32>
    %391 = arith.addf %390, %389 : vector<4x32xf32>
    %392 = tpu.reciprocal %391 {approx = true} : vector<4x32xf32> -> vector<4x32xf32>
    %393 = arith.mulf %391, %392 : vector<4x32xf32>
    %cst_132 = arith.constant 2.000000e+00 : f32
    %394 = vector.broadcast %cst_132 : f32 to vector<4x32xf32>
    %395 = arith.subf %394, %393 : vector<4x32xf32>
    %396 = arith.mulf %392, %395 : vector<4x32xf32>
    %397 = arith.mulf %386, %396 : vector<4x32xf32>
    %398 = arith.addf %310, %397 : vector<4x32xf32>
    %c0_133 = arith.constant 0 : index
    %c0_134 = arith.constant 0 : index
    %399 = vector.load %arg23[%c0_133, %c0_134] : memref<32x128xf32, #tpu.memory_space<vmem>>, vector<32x128xf32>
    %cst_135 = arith.constant dense<0.000000e+00> : vector<4x128xf32>
    %400 = tpu.matmul %398, %399, %cst_135 {dimension_numbers = #tpu.dot_dimension_numbers<[1], [0], [0], [1], [0, 0, 1, 1], [], []>, precision = #tpu.contract_precision<fp32>} : vector<4x32xf32>, vector<32x128xf32>, vector<4x128xf32> -> vector<4x128xf32>
    %c0_136 = arith.constant 0 : index
    %c0_137 = arith.constant 0 : index
    %401 = vector.load %arg24[%c0_136, %c0_137] : memref<1x128xf32, #tpu.memory_space<vmem>>, vector<1x128xf32>
    %402 = vector.broadcast %401 : vector<1x128xf32> to vector<4x128xf32>
    %403 = arith.addf %400, %402 : vector<4x128xf32>
    %c0_138 = arith.constant 0 : index
    %c0_139 = arith.constant 0 : index
    %404 = vector.load %arg25[%c0_138, %c0_139] : memref<4x128xf32, #tpu.memory_space<vmem>>, vector<4x128xf32>
    tpu.vector_store %arg25[%c0_138, %c0_139], %403 {strides = array<i32>} : memref<4x128xf32, #tpu.memory_space<vmem>>, vector<4x128xf32>,
    return
  }
  func.func @transform_0(%arg0: i32) -> (i32, i32) {
    %c0_i32 = arith.constant 0 : i32
    %c0_i32_0 = arith.constant 0 : i32
    %c0_i32_1 = arith.constant 0 : i32
    return %c0_i32, %c0_i32_0 : i32, i32
  }
  func.func @transform_1(%arg0: i32) -> (i32, i32) {
    %c0_i32 = arith.constant 0 : i32
    %c0_i32_0 = arith.constant 0 : i32
    %c0_i32_1 = arith.constant 0 : i32
    return %c0_i32, %c0_i32_0 : i32, i32
  }
  func.func @transform_2(%arg0: i32) -> (i32, i32) {
    %c0_i32 = arith.constant 0 : i32
    %c0_i32_0 = arith.constant 0 : i32
    %c0_i32_1 = arith.constant 0 : i32
    return %c0_i32, %c0_i32_0 : i32, i32
  }
  func.func @transform_3(%arg0: i32) -> (i32, i32) {
    %c0_i32 = arith.constant 0 : i32
    %c0_i32_0 = arith.constant 0 : i32
    %c0_i32_1 = arith.constant 0 : i32
    return %c0_i32, %c0_i32_0 : i32, i32
  }
  func.func @transform_4(%arg0: i32) -> (i32, i32) {
    %c0_i32 = arith.constant 0 : i32
    %c0_i32_0 = arith.constant 0 : i32
    %c0_i32_1 = arith.constant 0 : i32
    return %c0_i32, %c0_i32_0 : i32, i32
  }
  func.func @transform_5(%arg0: i32) -> (i32, i32) {
    %c0_i32 = arith.constant 0 : i32
    %c0_i32_0 = arith.constant 0 : i32
    %c0_i32_1 = arith.constant 0 : i32
    return %c0_i32, %c0_i32_0 : i32, i32
  }
  func.func @transform_6(%arg0: i32) -> (i32, i32) {
    %c0_i32 = arith.constant 0 : i32
    %c0_i32_0 = arith.constant 0 : i32
    %c0_i32_1 = arith.constant 0 : i32
    return %c0_i32, %c0_i32_0 : i32, i32
  }
  func.func @transform_7(%arg0: i32) -> (i32, i32) {
    %c0_i32 = arith.constant 0 : i32
    %c0_i32_0 = arith.constant 0 : i32
    %c0_i32_1 = arith.constant 0 : i32
    return %c0_i32, %c0_i32_0 : i32, i32
  }
  func.func @transform_8(%arg0: i32) -> (i32, i32) {
    %c0_i32 = arith.constant 0 : i32
    %c0_i32_0 = arith.constant 0 : i32
    %c0_i32_1 = arith.constant 0 : i32
    return %c0_i32, %c0_i32_0 : i32, i32
  }
  func.func @transform_9(%arg0: i32) -> (i32, i32) {
    %c0_i32 = arith.constant 0 : i32
    %c0_i32_0 = arith.constant 0 : i32
    %c0_i32_1 = arith.constant 0 : i32
    return %c0_i32, %c0_i32_0 : i32, i32
  }
  func.func @transform_10(%arg0: i32) -> (i32, i32) {
    %c0_i32 = arith.constant 0 : i32
    %c0_i32_0 = arith.constant 0 : i32
    %c0_i32_1 = arith.constant 0 : i32
    return %c0_i32, %c0_i32_0 : i32, i32
  }
  func.func @transform_11(%arg0: i32) -> (i32, i32) {
    %c0_i32 = arith.constant 0 : i32
    %c0_i32_0 = arith.constant 0 : i32
    %c0_i32_1 = arith.constant 0 : i32
    return %c0_i32, %c0_i32_0 : i32, i32
  }
  func.func @transform_12(%arg0: i32) -> (i32, i32) {
    %c0_i32 = arith.constant 0 : i32
    %c0_i32_0 = arith.constant 0 : i32
    %c0_i32_1 = arith.constant 0 : i32
    return %c0_i32, %c0_i32_0 : i32, i32
  }
  func.func @transform_13(%arg0: i32) -> (i32, i32) {
    %c0_i32 = arith.constant 0 : i32
    %c0_i32_0 = arith.constant 0 : i32
    %c0_i32_1 = arith.constant 0 : i32
    return %c0_i32, %c0_i32_0 : i32, i32
  }
  func.func @transform_14(%arg0: i32) -> (i32, i32) {
    %c0_i32 = arith.constant 0 : i32
    %c0_i32_0 = arith.constant 0 : i32
    %c0_i32_1 = arith.constant 0 : i32
    return %c0_i32, %c0_i32_0 : i32, i32
  }
  func.func @transform_15(%arg0: i32) -> (i32, i32) {
    %c0_i32 = arith.constant 0 : i32
    %c0_i32_0 = arith.constant 0 : i32
    %c0_i32_1 = arith.constant 0 : i32
    return %c0_i32, %c0_i32_0 : i32, i32
  }
  func.func @transform_16(%arg0: i32) -> (i32, i32) {
    %c0_i32 = arith.constant 0 : i32
    %c0_i32_0 = arith.constant 0 : i32
    %c0_i32_1 = arith.constant 0 : i32
    return %c0_i32, %c0_i32_0 : i32, i32
  }
  func.func @transform_17(%arg0: i32) -> (i32, i32) {
    %c0_i32 = arith.constant 0 : i32
    %c0_i32_0 = arith.constant 0 : i32
    %c0_i32_1 = arith.constant 0 : i32
    return %c0_i32, %c0_i32_0 : i32, i32
  }
  func.func @transform_18(%arg0: i32) -> (i32, i32) {
    %c0_i32 = arith.constant 0 : i32
    %c0_i32_0 = arith.constant 0 : i32
    %c0_i32_1 = arith.constant 0 : i32
    return %c0_i32, %c0_i32_0 : i32, i32
  }
  func.func @transform_19(%arg0: i32) -> (i32, i32) {
    %c0_i32 = arith.constant 0 : i32
    %c0_i32_0 = arith.constant 0 : i32
    %c0_i32_1 = arith.constant 0 : i32
    return %c0_i32, %c0_i32_0 : i32, i32
  }
  func.func @transform_20(%arg0: i32) -> (i32, i32) {
    %c0_i32 = arith.constant 0 : i32
    %c0_i32_0 = arith.constant 0 : i32
    %c0_i32_1 = arith.constant 0 : i32
    return %c0_i32, %c0_i32_0 : i32, i32
  }
  func.func @transform_21(%arg0: i32) -> (i32, i32) {
    %c0_i32 = arith.constant 0 : i32
    %c0_i32_0 = arith.constant 0 : i32
    %c0_i32_1 = arith.constant 0 : i32
    return %c0_i32, %c0_i32_0 : i32, i32
  }
  func.func @transform_22(%arg0: i32) -> (i32, i32) {
    %c0_i32 = arith.constant 0 : i32
    %c0_i32_0 = arith.constant 0 : i32
    %c0_i32_1 = arith.constant 0 : i32
    return %c0_i32, %c0_i32_0 : i32, i32
  }
  func.func @transform_23(%arg0: i32) -> (i32, i32) {
    %c0_i32 = arith.constant 0 : i32
    %c0_i32_0 = arith.constant 0 : i32
    %c0_i32_1 = arith.constant 0 : i32
    return %c0_i32, %c0_i32_0 : i32, i32
  }
  func.func @transform_24(%arg0: i32) -> (i32, i32) {
    %c0_i32 = arith.constant 0 : i32
    %c0_i32_0 = arith.constant 0 : i32
    %c0_i32_1 = arith.constant 0 : i32
    return %c0_i32, %c0_i32_0 : i32, i32
  }
}

</mosaic_0001>

<bundles_post_ra>
// kernel: velocity_estimator_forward.1
= control target key start
LH: loop header
LB: loop body
LE: loop exit
PB: predicated region body
PF: predicated region fallthrough
CT: control target
= control target key end

     0   :  { %s14512_s0 = inlined_call_operand.vmem [shape: f32[4,27], index: 0, kind: input, shape index: {}]   ;;  %s14513_s1 = inlined_call_operand.vmem [shape: f32[4,32], index: 1, kind: input, shape index: {}]   ;;  %s14514_s2 = inlined_call_operand.vmem [shape: f32[32,32], index: 2, kind: input, shape index: {}]   ;;  %s14515_s3 = inlined_call_operand.vmem [shape: f32[32,64], index: 3, kind: input, shape index: {}]   ;;  %s14516_s4 = inlined_call_operand.hbm [shape: f32[1,64], index: 4, kind: input, shape index: {}]   ;;  %s14517_s5 = inlined_call_operand.vmem [shape: f32[64,32], index: 5, kind: input, shape index: {}]   ;;  %s14518_s6 = inlined_call_operand.vmem [shape: f32[1,32], index: 6, kind: input, shape index: {}]   ;;  %s14519_s7 = inlined_call_operand.vmem [shape: f32[27,32], index: 7, kind: input, shape index: {}]   ;;  %s14520_s8 = inlined_call_operand.vmem [shape: f32[32,256], index: 8, kind: input, shape index: {}]   ;;  %s14521_s9 = inlined_call_operand.hbm [shape: f32[1,256], index: 9, kind: input, shape index: {}]   ;;  %s14522_s10 = inlined_call_operand.vmem [shape: f32[32,32], index: 10, kind: input, shape index: {}]   ;;  %s14523_s11 = inlined_call_operand.vmem [shape: f32[32,64], index: 11, kind: input, shape index: {}]   ;;  %s14524_s12 = inlined_call_operand.vmem [shape: f32[32,32], index: 12, kind: input, shape index: {}]   ;;  %s14525_s13 = inlined_call_operand.vmem [shape: f32[32,128], index: 13, kind: input, shape index: {}]   ;;  %s14526_s14 = inlined_call_operand.vmem [shape: f32[128,32], index: 14, kind: input, shape index: {}]   ;;  %s14527_s15 = inlined_call_operand.vmem [shape: f32[32,128], index: 15, kind: input, shape index: {}]   ;;  %s14528_s16 = inlined_call_operand.vmem [shape: f32[128,32], index: 16, kind: input, shape index: {}]   ;;  %s14529_s17 = inlined_call_operand.vmem [shape: f32[19,32], index: 17, kind: input, shape index: {}]   ;;  %s14530_s18 = inlined_call_operand.hbm [shape: f32[2,128], index: 18, kind: input, shape index: {}]   ;;  %s14531_s19 = inlined_call_operand.vmem [shape: f32[32,8], index: 19, kind: input, shape index: {}]   ;;  %s14532_s20 = inlined_call_operand.vmem [shape: f32[8,32], index: 20, kind: input, shape index: {}]   ;;  %s14533_s21 = inlined_call_operand.vmem [shape: f32[32,4], index: 21, kind: input, shape index: {}]   ;;  %s14534_s22 = inlined_call_operand.vmem [shape: f32[32,128], index: 22, kind: input, shape index: {}]   ;;  %s14535_s23 = inlined_call_operand.hbm [shape: f32[1,128], index: 23, kind: input, shape index: {}]   ;;  %s14536_s24 = inlined_call_operand.hbm [shape: f32[4,128], index: 24, kind: output, shape index: {}]  }
   0x1   :  { %14574 = sst [smem:[#allocation17_spill]] %s14512_s0 }
   0x2   :  { %14575 = sst [smem:[#allocation18_spill]] %s14513_s1 }
   0x3   :  { %14576 = sst [smem:[#allocation19_spill]] %s14514_s2 }
   0x4   :  { %14577 = sst [smem:[#allocation20_spill]] %s14515_s3 }
   0x5   :  { %14578 = sst [smem:[#allocation21_spill]] %s14516_s4 }
   0x6   :  { %14579 = sst [smem:[#allocation22_spill]] %s14517_s5 }
   0x7   :  { %14580 = sst [smem:[#allocation23_spill]] %s14518_s6 }
   0x8   :  { %14581 = sst [smem:[#allocation24_spill]] %s14519_s7 }
   0x9   :  { %14582 = sst [smem:[#allocation25_spill]] %s14520_s8 }
   0xa   :  { %29 = vsyncpa [#allocation3], 0 }
   0xb   :  { %30 = vsyncpa [#allocation6], 0 }
   0xc   :  { %31 = vsyncpa [#allocation9], 0 }
   0xd   :  { %32 = vsyncpa [#allocation4], 0  ;;  %s11506_s5 = smov [#allocation5]   ;;  %s11507_s27 = smov [#allocation2]  }
   0xe   :  { %s65_s26 = sshll.u32 %s11506_s5, 4  ;;  %s47_s28 = sshll.u32 %s11507_s27, 4  ;;  %s66_s26 = int_to_ptr.vmem [resolvable:$true] %s65_s26  ;;  %s48_s28 = int_to_ptr.vmem [resolvable:$true] %s47_s28 }
   0xf   :  { %s11406_s6 = scalar_lea.vmem %s66_s26, 32  ;;  %p11411_p1 = scmp.lt.s32.totalorder %s66_s26, %s66_s26 }
  0x10   :  { %p11407_p0 = scmp.ne.s32.totalorder %s66_s26, %s11406_s6  ;;  %p11412_p2 = scmp.lt.s32.totalorder %s11406_s6, %s11406_s6 }
  0x12   :  { %p11413_p3 = por %p11412_p2, %p11411_p1 }
  0x14   :  { %p11414_p4 = pnand %p11413_p3, %p11407_p0 }
  0x16   :  { %11417 = shalt.err (!%p11414_p4)
}
  0x17   :  { %68 = dma.hbm_to_vmem [thread:$0]  %s14521_s9, 32, %s66_s26, [#allocation6]  }
  0x18   :  { %s11426_s0 = scalar_lea.vmem %s48_s28, 16  ;;  %s11430_s7 = scalar_lea.vmem %s48_s28, 32 }
  0x19   :  { %p11427_p5 = scmp.ne.s32.totalorder %s48_s28, %s11426_s0  ;;  %p11431_p6 = scmp.lt.s32.totalorder %s48_s28, %s48_s28 }
  0x1a   :  { %p11432_p7 = scmp.lt.s32.totalorder %s11430_s7, %s11426_s0 }
  0x1c   :  { %p11433_p8 = por %p11432_p7, %p11431_p6 }
  0x1e   :  { %p11434_p9 = pnand %p11433_p8, %p11427_p5 }
  0x20   :  { %11437 = shalt.err (!%p11434_p9)
}
  0x21   :  { %s14583_s25 = sld [smem:[#allocation21_spill]]  ;;  %s11508_s8 = smov [#allocation7]  }
  0x22   :  { %s91_s4 = sshll.u32 %s11508_s8, 4  ;;  %s11509_s1 = smov [#allocation8]   ;;  %s92_s4 = int_to_ptr.vmem [resolvable:$true] %s91_s4 }
  0x23   :  { %s109_s5 = sshll.u32 %s11509_s1, 4  ;;  %s11446_s27 = scalar_lea.vmem %s92_s4, 32  ;;  %s110_s5 = int_to_ptr.vmem [resolvable:$true] %s109_s5 }
  0x24   :  { %p11447_p10 = scmp.ne.s32.totalorder %s92_s4, %s11446_s27  ;;  %p11451_p11 = scmp.lt.s32.totalorder %s92_s4, %s92_s4 }
  0x25   :  { %p11452_p12 = scmp.lt.s32.totalorder %s11446_s27, %s11446_s27 }
  0x27   :  { %50 = dma.hbm_to_vmem [thread:$0]  %s14583_s25, 16, %s48_s28, [#allocation3]  }
  0x28   :  { %p11453_p13 = por %p11452_p12, %p11451_p11 }
  0x2a   :  { %p11454_p0 = pnand %p11453_p13, %p11447_p10 }
  0x2c   :  { %11457 = shalt.err (!%p11454_p0)
}
  0x2d   :  { %94 = dma.hbm_to_vmem [thread:$0]  %s14530_s18, 32, %s92_s4, [#allocation6]  }
  0x2e   :  { %s11466_s6 = scalar_lea.vmem %s110_s5, 16  ;;  %s11470_s28 = scalar_lea.vmem %s110_s5, 32 }
  0x2f   :  { %p11467_p1 = scmp.ne.s32.totalorder %s110_s5, %s11466_s6  ;;  %p11471_p2 = scmp.lt.s32.totalorder %s110_s5, %s110_s5 }
  0x30   :  { %p11472_p3 = scmp.lt.s32.totalorder %s11470_s28, %s11466_s6 }
  0x32   :  { %p11473_p4 = por %p11472_p3, %p11471_p2 }
  0x34   :  { %p11474_p5 = pnand %p11473_p4, %p11467_p1 }
  0x36   :  { %11477 = shalt.err (!%p11474_p5)
}
  0x37   :  { %112 = dma.hbm_to_vmem [thread:$0]  %s14535_s23, 16, %s110_s5, [#allocation9]  }
  0x38   :  { %11498 = dma.done.wait [#allocation3], 16  }
  0x39   :  { %11499 = vsyncadd [#allocation3], 4294967280 }
  0x3a   :  { %11500 = dma.done.wait [#allocation6], 64  }
  0x3b   :  { %11501 = vsyncadd [#allocation6], 4294967232 }
  0x3c   :  { %11502 = dma.done.wait [#allocation9], 16  }
  0x3d   :  { %11503 = vsyncadd [#allocation9], 4294967280  ;;  %v14559_v0 = vmov 0.0   ;;  %vm11511_vm0 = vmmov 0   ;;  %vm137_vm1 = vcmask 261120   ;;  %s14584_s0 = sld [smem:[#allocation20_spill]] }
  0x3e   :  { %10014 = vmatprep.subr.mxu0 %v14559_v0  ;;  %10025 = vmatprep.subr.mxu1 %v14559_v0  ;;  %s14585_s27 = sld [smem:[#allocation18_spill]]  ;;  %vm650_vm2 = vcmask 523264   ;;  %vm1212_vm3 = vcmask 1042432   ;;  %vm1208_vm4 = vcmask 220160   ;;  %vm1701_vm5 = vcmask 257024   ;;  %s11512_s1 = smov 96  }
  0x3f   :  { %10022 = vmatprep.mubr.msk.f32.mxu0 %vm11511_vm0, %v14559_v0  ;;  %10033 = vmatprep.mubr.msk.f32.mxu1 %vm11511_vm0, %v14559_v0  ;;  %s14586_s6 = sld [smem:[#allocation22_spill]]  ;;  %s11514_s18 = smov 120   ;;  %vm3718_vm6 = vcmask 1040384   ;;  %vm3723_vm7 = vcmask 1041408   ;;  %vm3732_vm8 = vcmask 1043456   ;;  %vm3737_vm9 = vcmask 1044480  }
  0x40   :  { %s14587_s26 = sld [smem:[#allocation24_spill]]  ;;  %s11515_s23 = smov 108   ;;  %vm3742_vm10 = vcmask 1045504   ;;  %vm3747_vm11 = vcmask 1046528   ;;  %vm3840_vm12 = vcmask 31744   ;;  %vm3845_vm13 = vcmask 64512  }
  0x41   :  { %s14588_s30 = sld [smem:[#allocation17_spill]]  ;;  %s11517_s7 = smov 100   ;;  %vm3850_vm14 = vcmask 97280   ;;  %vm3855_vm15 = vcmask 130048  }
  0x42   :  { %s14589_s8 = sld [smem:[#allocation25_spill]]  ;;  %s11519_s3 = smov 116  }
  0x43   :  { %v129_v1 = vld [vmem:[%s14584_s0 + $0x18] sm:$0xff]  ;;  %v128_v2 = vld [vmem:[%s14584_s0 + $0x10] sm:$0xff]  ;;  %v127_v3 = vld [vmem:[%s14584_s0 + $0x8] sm:$0xff]  ;;  %s14590_s25 = sld [smem:[#allocation23_spill]]  ;;  %s11522_s4 = smov 4  }
  0x44   :  { %v11683_v4 = vand.u32 4294901760, %v129_v1  ;;  %v11685_v5 = vand.u32 4294901760, %v128_v2  ;;  %v11687_v6 = vand.u32 4294901760, %v127_v3  ;;  %v126_v7 = vld [vmem:[%s14584_s0] sm:$0xff]  ;;  %s14592_s9 = sld [smem:[#allocation19_spill]]  ;;  %s11516_s0 = smov 104  }
  0x45   :  { %v125_v8 = vld [vmem:[%s14585_s27] sm:$0xf]  ;;  %v11695_v9 = vand.u32 4294901760, %v126_v7  ;;  %v642_v32 = vld [vmem:[%s14586_s6 + $0x38] sm:$0xff]  ;;  %v641_v34 = vld [vmem:[%s14586_s6 + $0x30] sm:$0xff]  ;;  %s11523_s27 = smov 20  }
  0x46   :  { %v139_v10 = vsel %vm137_vm1, %v125_v8, 0  ;;  %10015 = vmatpush3.msra.mxu0 %v11683_v4  ;;  %v246_v11 = vsub.f32 %v129_v1, %v11683_v4  ;;  %v253_v13 = vsub.f32 %v128_v2, %v11685_v5  ;;  %v260_v14 = vsub.f32 %v127_v3, %v11687_v6  ;;  %v640_v37 = vld [vmem:[%s14586_s6 + $0x28] sm:$0xff]  ;;  %v639_v41 = vld [vmem:[%s14586_s6 + $0x20] sm:$0xff]  ;;  %v638_v46 = vld [vmem:[%s14586_s6 + $0x18] sm:$0xff]  ;;  %s11526_s29 = smov 16  }
  0x47   :  { %v11700_v12 = vand.u32 4294901760, %v139_v10  ;;  %10016 = vmatprep.subr.mxu0 %v14559_v0  ;;  %v267_v15 = vsub.f32 %v126_v7, %v11695_v9  ;;  %v11759_v33 = vand.u32 4294901760, %v642_v32  ;;  %v11767_v36 = vand.u32 4294901760, %v641_v34  ;;  %v637_v52 = vld [vmem:[%s14586_s6 + $0x10] sm:$0xff]  ;;  %v636_v58 = vld [vmem:[%s14586_s6 + $0x8] sm:$0xff]  ;;  %v635_v1 = vld [vmem:[%s14586_s6] sm:$0xff] }
  0x48   :  { %10017 = vmatpush3.msra.mxu0 %v11685_v5  ;;  %v247_v16 = vand.u32 4294901760, %v246_v11  ;;  %v254_v18 = vand.u32 4294901760, %v253_v13  ;;  %v261_v19 = vand.u32 4294901760, %v260_v14  ;;  %v11778_v40 = vand.u32 4294901760, %v640_v37 }
  0x49   :  { %v211_v17 = vsub.f32 %v139_v10, %v11700_v12  ;;  %10018 = vmatprep.subr.mxu0 %v14559_v0  ;;  %v268_v20 = vand.u32 4294901760, %v267_v15  ;;  %v11765_v35 = vsub.f32 %v642_v32, %v11759_v33  ;;  %v11776_v39 = vsub.f32 %v641_v34, %v11767_v36 }
  0x4a   :  { %10019 = vmatpush3.msra.mxu0 %v11687_v6  ;;  %v248_v21 = vsub.f32 %v246_v11, %v247_v16  ;;  %v255_v23 = vsub.f32 %v253_v13, %v254_v18  ;;  %v262_v24 = vsub.f32 %v260_v14, %v261_v19  ;;  %v11790_v44 = vsub.f32 %v640_v37, %v11778_v40 }
  0x4b   :  { %v212_v22 = vand.u32 4294901760, %v211_v17  ;;  %10020 = vmatprep.subr.mxu0 %v14559_v0  ;;  %v269_v28 = vsub.f32 %v267_v15, %v268_v20  ;;  %v756_v38 = vand.u32 4294901760, %v11765_v35  ;;  %v763_v43 = vand.u32 4294901760, %v11776_v39 }
  0x4c   :  { %10021 = vmatpush3.msra.mxu0 %v11695_v9  ;;  %v249_v25 = vand.u32 4294901760, %v248_v21  ;;  %v256_v27 = vand.u32 4294901760, %v255_v23  ;;  %v263_v30 = vand.u32 4294901760, %v262_v24  ;;  %v11792_v45 = vand.u32 4294901760, %v639_v41 }
  0x4d   :  { %v213_v26 = vsub.f32 %v211_v17, %v212_v22  ;;  %10036 = vmatprep.subr.mxu0 %v14559_v0  ;;  %v270_v31 = vand.u32 4294901760, %v269_v28  ;;  %v757_v42 = vsub.f32 %v11765_v35, %v756_v38  ;;  %v764_v48 = vsub.f32 %v11776_v39, %v763_v43 }
  0x4e   :  { %10026 = vmatpush3.msra.mxu1 %v249_v25  ;;  %v770_v49 = vand.u32 4294901760, %v11790_v44  ;;  %v11804_v50 = vsub.f32 %v639_v41, %v11792_v45  ;;  %v11807_v51 = vand.u32 4294901760, %v638_v46  ;;  %v11817_v56 = vand.u32 4294901760, %v637_v52 }
  0x4f   :  { %v214_v29 = vand.u32 4294901760, %v213_v26  ;;  %10027 = vmatprep.subr.mxu1 %v14559_v0  ;;  %v758_v47 = vand.u32 4294901760, %v757_v42  ;;  %v765_v53 = vand.u32 4294901760, %v764_v48  ;;  %v11833_v62 = vand.u32 4294901760, %v636_v58 }
  0x50   :  { %10028 = vmatpush3.msra.mxu1 %v256_v27  ;;  %v771_v54 = vsub.f32 %v11790_v44, %v770_v49  ;;  %v777_v55 = vand.u32 4294901760, %v11804_v50  ;;  %v11821_v57 = vsub.f32 %v638_v46, %v11807_v51  ;;  %v11831_v61 = vsub.f32 %v637_v52, %v11817_v56 }
  0x51   :  { %10023 = vmatmul.mubr.f32.vlgmr.msra.gmra.mxu0 %v214_v29  ;;  %10029 = vmatprep.subr.mxu1 %v14559_v0 }
  0x52   :  { %10037 = vmatpush3.msra.mxu0 %v246_v11  ;;  %10030 = vmatpush3.msra.mxu1 %v263_v30  ;;  %v772_v59 = vand.u32 4294901760, %v771_v54  ;;  %v778_v60 = vsub.f32 %v11804_v50, %v777_v55  ;;  %v784_v63 = vand.u32 4294901760, %v11821_v57  ;;  %v791_v3 = vand.u32 4294901760, %v11831_v61 }
  0x53   :  { %10038 = vmatprep.subr.mxu0 %v14559_v0  ;;  %10031 = vmatprep.subr.mxu1 %v14559_v0 }
  0x54   :  { %10039 = vmatpush3.msra.mxu0 %v253_v13  ;;  %10032 = vmatpush3.msra.mxu1 %v270_v31  ;;  %v779_v2 = vand.u32 4294901760, %v778_v60  ;;  %v792_v7 = vsub.f32 %v11831_v61, %v791_v3 }
  0x55   :  { %10040 = vmatprep.subr.mxu0 %v14559_v0  ;;  %10034 = vmatmul.mubr.f32.vlgmr.msra.gmra.mxu1 %v11700_v12 }
  0x56   :  { %10041 = vmatpush3.msra.mxu0 %v260_v14  ;;  %10047 = vmatprep.subr.mxu1 %v14559_v0  ;;  %v793_v11 = vand.u32 4294901760, %v792_v7 }
  0x57   :  { %10042 = vmatprep.subr.mxu0 %v14559_v0  ;;  %10048 = vmatpush3.msra.mxu1 %v11683_v4 }
  0x58   :  { %10043 = vmatpush3.msra.mxu0 %v267_v15  ;;  %10044 = vmatprep.mubr.msk.f32.mxu0 %vm11511_vm0, %v14559_v0 }
  0x59   :  { %10049 = vmatprep.subr.mxu1 %v14559_v0  ;;  %10058 = vmatprep.subr.mxu0 %v14559_v0 }
  0x5a   :  { %10045 = vmatmul.mubr.f32.vlgmr.msra.gmra.mxu0 %v211_v17  ;;  %10050 = vmatpush3.msra.mxu1 %v11685_v5 }
  0x5b   :  { %10059 = vmatpush3.msra.mxu0 %v247_v16  ;;  %10051 = vmatprep.subr.mxu1 %v14559_v0 }
  0x5c   :  { %10060 = vmatprep.subr.mxu0 %v14559_v0  ;;  %10052 = vmatpush3.msra.mxu1 %v11687_v6 }
  0x5d   :  { %10061 = vmatpush3.msra.mxu0 %v254_v18  ;;  %10053 = vmatprep.subr.mxu1 %v14559_v0 }
  0x5e   :  { %10062 = vmatprep.subr.mxu0 %v14559_v0  ;;  %10054 = vmatpush3.msra.mxu1 %v11695_v9 }
  0x5f   :  { %10055 = vmatprep.mubr.msk.f32.mxu1 %vm11511_vm0, %v14559_v0  ;;  %10063 = vmatpush3.msra.mxu0 %v261_v19 }
  0x60   :  { %10056 = vmatmul.mubr.f32.vlgmr.msra.gmra.mxu1 %v212_v22  ;;  %10064 = vmatprep.subr.mxu0 %v14559_v0 }
  0x61   :  { %10069 = vmatprep.subr.mxu1 %v14559_v0  ;;  %10065 = vmatpush3.msra.mxu0 %v268_v20  ;;  %v9369_v20 = vld [vmem:[#allocation2] ss:$0 sm:$0xff] }
  0x62   :  { %10066 = vmatprep.mubr.msk.f32.mxu0 %vm11511_vm0, %v14559_v0  ;;  %10070 = vmatpush3.msra.mxu1 %v11683_v4  ;;  %v11844_v4 = vsub.f32 %v636_v58, %v11833_v62 }
  0x63   :  { %10067 = vmatmul.mubr.f32.vlgmr.msra.gmra.mxu0 %v11700_v12  ;;  %10071 = vmatprep.subr.mxu1 %v14559_v0 }
  0x64   :  { %10077 = vmatprep.mubr.msk.f32.mxu1 %vm11511_vm0, %v14559_v0  ;;  %10072 = vmatpush3.msra.mxu1 %v11685_v5  ;;  %v11846_v5 = vand.u32 4294901760, %v635_v1  ;;  %v798_v8 = vand.u32 4294901760, %v11844_v4 }
  0x65   :  { %10080 = vmatprep.subr.mxu0 %v14559_v0  ;;  %10073 = vmatprep.subr.mxu1 %v14559_v0 }
  0x66   :  { %10096 = vmatprep.mubr.msk.f32.mxu0 %vm11511_vm0, %v14559_v0  ;;  %10074 = vmatpush3.msra.mxu1 %v11687_v6  ;;  %v785_v6 = vsub.f32 %v11821_v57, %v784_v63 }
  0x67   :  { %10075 = vmatprep.subr.mxu1 %v14559_v0  ;;  %10081 = vmatpush3.msra.mxu0 %v11759_v33 }
  0x68   :  { %10076 = vmatpush3.msra.mxu1 %v11695_v9  ;;  %10082 = vmatprep.subr.mxu0 %v14559_v0  ;;  %v11859_v9 = vsub.f32 %v635_v1, %v11846_v5  ;;  %v786_v10 = vand.u32 4294901760, %v785_v6 }
  0x69   :  { %10078 = vmatmul.mubr.f32.vlgmr.msra.gmra.mxu1 %v11700_v12  ;;  %10099 = vmatprep.subr.mxu1 %v14559_v0  ;;  %v799_v12 = vsub.f32 %v11844_v4, %v798_v8 }
  0x6a   :  { %10115 = vmatprep.mubr.msk.f32.mxu1 %vm11511_vm0, %v14559_v0  ;;  %10083 = vmatpush3.msra.mxu0 %v11767_v36  ;;  %v805_v13 = vand.u32 4294901760, %v11859_v9 }
  0x6b   :  { %10084 = vmatprep.subr.mxu0 %v14559_v0  ;;  %10100 = vmatpush3.msra.mxu1 %v758_v47  ;;  %v800_v14 = vand.u32 4294901760, %v799_v12 }
  0x6c   :  { %10085 = vmatpush3.msra.mxu0 %v11778_v40  ;;  %10101 = vmatprep.subr.mxu1 %v14559_v0  ;;  %v806_v15 = vsub.f32 %v11859_v9, %v805_v13 }
  0x6d   :  { %10086 = vmatprep.subr.mxu0 %v14559_v0  ;;  %10102 = vmatpush3.msra.mxu1 %v765_v53 }
  0x6e   :  { %10087 = vmatpush3.msra.mxu0 %v11792_v45  ;;  %10103 = vmatprep.subr.mxu1 %v14559_v0  ;;  %v807_v16 = vand.u32 4294901760, %v806_v15 }
  0x6f   :  { %10088 = vmatprep.subr.mxu0 %v14559_v0  ;;  %10104 = vmatpush3.msra.mxu1 %v772_v59 }
  0x70   :  { %10089 = vmatpush3.msra.mxu0 %v11807_v51  ;;  %10105 = vmatprep.subr.mxu1 %v14559_v0 }
  0x71   :  { %10090 = vmatprep.subr.mxu0 %v14559_v0  ;;  %10106 = vmatpush3.msra.mxu1 %v779_v2 }
  0x72   :  { %10091 = vmatpush3.msra.mxu0 %v11817_v56  ;;  %10107 = vmatprep.subr.mxu1 %v14559_v0 }
  0x73   :  { %10092 = vmatprep.subr.mxu0 %v14559_v0  ;;  %10108 = vmatpush3.msra.mxu1 %v786_v10 }
  0x74   :  { %10093 = vmatpush3.msra.mxu0 %v11833_v62  ;;  %10109 = vmatprep.subr.mxu1 %v14559_v0 }
  0x75   :  { %10094 = vmatprep.subr.mxu0 %v14559_v0  ;;  %10110 = vmatpush3.msra.mxu1 %v793_v11  ;;  %v1203_v11 = vld [vmem:[%s14587_s26 + $0x18] sm:$0x7] }
  0x76   :  { %10095 = vmatpush3.msra.mxu0 %v11846_v5  ;;  %10111 = vmatprep.subr.mxu1 %v14559_v0  ;;  %v1214_v12 = vsel %vm1212_vm3, %v1203_v11, 0 }
  0x77   :  { %10118 = vmatprep.subr.mxu0 %v14559_v0  ;;  %10112 = vmatpush3.msra.mxu1 %v800_v14  ;;  %v1202_v14 = vld [vmem:[%s14587_s26 + $0x10] sm:$0xff]  ;;  %v11914_v15 = vand.u32 4294901760, %v1214_v12 }
  0x78   :  { %10113 = vmatprep.subr.mxu1 %v14559_v0 }
  0x79   :  { %10114 = vmatpush3.msra.mxu1 %v807_v16  ;;  %v1201_v16 = vld [vmem:[%s14587_s26 + $0x8] sm:$0xff] }
  0x7a   :  { %10137 = vmatprep.subr.mxu1 %v14559_v0 }
 0x111   :  { %v216_v17 = vpop.f32.mrf.mxu0 }
 0x112   :  { %v217_v23 = vadd.f32 %v9369_v20, %v216_v17  ;;  %v11923_v17 = vand.u32 4294901760, %v1202_v14 }
 0x113   :  { %v10024_v18 = vpop.f32.mrf.mxu0 }
 0x114   :  { %v11932_v18 = vand.u32 4294901760, %v1201_v16 }
 0x115   :  { %v307_v19 = vpop.f32.mrf.mxu1 }
 0x116   :  { %v308_v25 = vadd.f32 %v307_v19, %v217_v23  ;;  %v1200_v19 = vld [vmem:[%s14587_s26] sm:$0xff] }
 0x117   :  { %v10035_v21 = vpop.f32.mrf.mxu1 }
 0x118   :  { %v11953_v21 = vsub.f32 %v1201_v16, %v11932_v18 }
 0x11a   :  { %v387_v22 = vpop.f32.mrf.mxu0 }
 0x11b   :  { %v388_v28 = vadd.f32 %v387_v22, %v308_v25  ;;  %v11955_v22 = vand.u32 4294901760, %v1200_v19 }
 0x11c   :  { %v10046_v24 = vpop.f32.mrf.mxu0 }
 0x11d   :  { %v1731_v24 = vld [vmem:[%s14589_s8 + $0x28] sm:$0xff] }
 0x120   :  { %v464_v26 = vpop.f32.mrf.mxu1 }
 0x121   :  { %v465_v30 = vadd.f32 %v464_v26, %v388_v28  ;;  %v12096_v26 = vand.u32 4294901760, %v1731_v24 }
 0x122   :  { %v10057_v27 = vpop.f32.mrf.mxu1 }
 0x123   :  { %v547_v29 = vpop.f32.mrf.mxu0  ;;  %v1730_v27 = vld [vmem:[%s14589_s8 + $0x20] sm:$0xff] }
 0x124   :  { %v548_v32 = vadd.f32 %v547_v29, %v465_v30  ;;  %v12105_v29 = vand.u32 4294901760, %v1730_v27  ;;  %v1729_v30 = vld [vmem:[%s14589_s8 + $0x18] sm:$0xff] }
 0x125   :  { %v10068_v31 = vpop.f32.mrf.mxu0 }
 0x129   :  { %v622_v34 = vpop.f32.mrf.mxu1 }
 0x12a   :  { %v623_v37 = vadd.f32 %v622_v34, %v548_v32  ;;  %v12113_v32 = vsub.f32 %v1731_v24, %v12096_v26  ;;  %v12115_v34 = vand.u32 4294901760, %v1729_v30 }
 0x12b   :  { %v10079_v41 = vpop.f32.mrf.mxu1 }
 0x12c   :  { %v626_v42 = vsub.f32 0.0, %v623_v37 }
 0x12e   :  { %v627_v46 = vmul.f32 1.442695, %v626_v42  ;;  %v12123_v42 = vsub.f32 %v1730_v27, %v12105_v29 }
 0x130   :  { %11335 = vpow2.f32 %v627_v46 }
 0x13d   :  { %v11336_v47 = vpop.eup %11335 }
 0x13e   :  { %v629_v48 = vadd.f32 1.0, %v11336_v47  ;;  %v1727_v47 = vld [vmem:[%s14589_s8 + $0x8] sm:$0xff] }
 0x140   :  { %11337 = vrcp.f32 %v629_v48 }
 0x14d   :  { %v11338_v52 = vpop.eup %11337 }
 0x14e   :  { %v631_v53 = vmul.f32 %v11338_v52, %v629_v48 }
 0x150   :  { %v632_v54 = vsub.f32 2.0, %v631_v53  ;;  %v12136_v53 = vsub.f32 %v1729_v30, %v12115_v34 }
 0x152   :  { %v633_v58 = vmul.f32 %v11338_v52, %v632_v54  ;;  %v1871_v52 = vand.u32 4294901760, %v12113_v32  ;;  %v12138_v54 = vand.u32 4294901760, %v1727_v47 }
 0x154   :  { %v634_v59 = vmul.f32 %v633_v58, %v623_v37  ;;  %v1728_v37 = vld [vmem:[%s14589_s8 + $0x10] sm:$0xff]  ;;  %v1726_v58 = vld [vmem:[%s14589_s8] sm:$0xff]  ;;  %v12159_v11 = vsub.f32 %v1727_v47, %v12138_v54 }
 0x155   :  { %v12125_v46 = vand.u32 4294901760, %v1728_v37 }
 0x156   :  { %v652_v60 = vsel %vm650_vm2, %v634_v59, 0  ;;  %vm3860_vm2 = vcmask 162816  }
 0x157   :  { %v11876_v1 = vand.u32 4294901760, %v652_v60 }
 0x159   :  { %v728_v2 = vsub.f32 %v652_v60, %v11876_v1  ;;  %10116 = vmatmul.mubr.f32.vlgmr.msra.gmra.mxu1 %v11876_v1  ;;  %v1877_v60 = vand.u32 4294901760, %v12123_v42 }
 0x15a   :  { %10138 = vmatpush3.msra.mxu1 %v11759_v33  ;;  %10153 = vmatprep.mubr.msk.f32.mxu1 %vm11511_vm0, %v14559_v0 }
 0x15b   :  { %10139 = vmatprep.subr.mxu1 %v14559_v0  ;;  %v729_v6 = vand.u32 4294901760, %v728_v2 }
 0x15c   :  { %10140 = vmatpush3.msra.mxu1 %v11767_v36 }
 0x15d   :  { %10141 = vmatprep.subr.mxu1 %v14559_v0  ;;  %v730_v7 = vsub.f32 %v728_v2, %v729_v6 }
 0x15e   :  { %10142 = vmatpush3.msra.mxu1 %v11778_v40 }
 0x15f   :  { %10143 = vmatprep.subr.mxu1 %v14559_v0  ;;  %v731_v10 = vand.u32 4294901760, %v730_v7  ;;  %v1872_v7 = vsub.f32 %v12113_v32, %v1871_v52 }
 0x160   :  { %10144 = vmatpush3.msra.mxu1 %v11792_v45 }
 0x161   :  { %10145 = vmatprep.subr.mxu1 %v14559_v0  ;;  %10097 = vmatmul.mubr.f32.vlgmr.msra.gmra.mxu0 %v731_v10  ;;  %v1883_v10 = vand.u32 4294901760, %v12136_v53 }
 0x162   :  { %10119 = vmatpush3.msra.mxu0 %v11765_v35  ;;  %10146 = vmatpush3.msra.mxu1 %v11807_v51 }
 0x163   :  { %10120 = vmatprep.subr.mxu0 %v14559_v0  ;;  %10147 = vmatprep.subr.mxu1 %v14559_v0 }
 0x164   :  { %10121 = vmatpush3.msra.mxu0 %v11776_v39  ;;  %10148 = vmatpush3.msra.mxu1 %v11817_v56 }
 0x165   :  { %10122 = vmatprep.subr.mxu0 %v14559_v0  ;;  %10149 = vmatprep.subr.mxu1 %v14559_v0 }
 0x166   :  { %10123 = vmatpush3.msra.mxu0 %v11790_v44  ;;  %10150 = vmatpush3.msra.mxu1 %v11833_v62 }
 0x167   :  { %10124 = vmatprep.subr.mxu0 %v14559_v0  ;;  %10151 = vmatprep.subr.mxu1 %v14559_v0 }
 0x168   :  { %10125 = vmatpush3.msra.mxu0 %v11804_v50  ;;  %10152 = vmatpush3.msra.mxu1 %v11846_v5 }
 0x169   :  { %10126 = vmatprep.subr.mxu0 %v14559_v0  ;;  %10154 = vmatmul.mubr.f32.vlgmr.msra.gmra.mxu1 %v729_v6 }
 0x16a   :  { %10175 = vmatprep.subr.mxu1 %v14559_v0  ;;  %10127 = vmatpush3.msra.mxu0 %v11821_v57 }
 0x16b   :  { %10176 = vmatpush3.msra.mxu1 %v11759_v33  ;;  %10128 = vmatprep.subr.mxu0 %v14559_v0  ;;  %v11930_v33 = vsub.f32 %v1214_v12, %v11914_v15 }
 0x16c   :  { %10177 = vmatprep.subr.mxu1 %v14559_v0  ;;  %10129 = vmatpush3.msra.mxu0 %v11831_v61 }
 0x16d   :  { %10178 = vmatpush3.msra.mxu1 %v11767_v36  ;;  %10130 = vmatprep.subr.mxu0 %v14559_v0  ;;  %v11942_v36 = vsub.f32 %v1202_v14, %v11923_v17  ;;  %v1322_v20 = vand.u32 4294901760, %v11930_v33  ;;  %v1878_v14 = vsub.f32 %v12123_v42, %v1877_v60 }
 0x16e   :  { %10179 = vmatprep.subr.mxu1 %v14559_v0  ;;  %10131 = vmatpush3.msra.mxu0 %v11844_v4  ;;  %v1733_v4 = vld [vmem:[%s14589_s8 + $0x38] sm:$0xff] }
 0x16f   :  { %10180 = vmatpush3.msra.mxu1 %v11778_v40  ;;  %10132 = vmatprep.subr.mxu0 %v14559_v0  ;;  %v1195_v40 = vld [vmem:[%s14588_s30] sm:$0xf]  ;;  %v1323_v35 = vsub.f32 %v11930_v33, %v1322_v20  ;;  %s11518_s30 = smov 124  }
 0x170   :  { %10181 = vmatprep.subr.mxu1 %v14559_v0  ;;  %10133 = vmatpush3.msra.mxu0 %v11859_v9  ;;  %v1210_v23 = vsel %vm1208_vm4, %v1195_v40, 0  ;;  %v1732_v9 = vld [vmem:[%s14589_s8 + $0x30] sm:$0xff]  ;;  %s11521_s8 = smov 8   ;;  %vm3870_vm4 = vcmask 228352  }
 0x171   :  { %10134 = vmatprep.mubr.msk.f32.mxu0 %vm11511_vm0, %v14559_v0  ;;  %10182 = vmatpush3.msra.mxu1 %v11792_v45  ;;  %v1329_v45 = vand.u32 4294901760, %v11942_v36  ;;  %v11978_v39 = vand.u32 4294901760, %v1210_v23  ;;  %v1324_v44 = vand.u32 4294901760, %v1323_v35 }
 0x172   :  { %10135 = vmatmul.mubr.f32.vlgmr.msra.gmra.mxu0 %v728_v2  ;;  %10156 = vmatprep.subr.mxu0 %v14559_v0  ;;  %v12151_v2 = vand.u32 4294901760, %v1726_v58 }
 0x173   :  { %10183 = vmatprep.subr.mxu1 %v14559_v0  ;;  %10157 = vmatpush3.msra.mxu0 %v756_v38  ;;  %v11972_v38 = vsub.f32 %v1200_v19, %v11955_v22  ;;  %v1879_v19 = vand.u32 4294901760, %v1878_v14 }
 0x174   :  { %10184 = vmatpush3.msra.mxu1 %v11807_v51  ;;  %10158 = vmatprep.subr.mxu0 %v14559_v0  ;;  %v1336_v51 = vand.u32 4294901760, %v11953_v21  ;;  %v12167_v16 = vsub.f32 %v1726_v58, %v12151_v2 }
 0x175   :  { %10185 = vmatprep.subr.mxu1 %v14559_v0  ;;  %10159 = vmatpush3.msra.mxu0 %v763_v43  ;;  %v1330_v43 = vsub.f32 %v11942_v36, %v1329_v45 }
 0x176   :  { %10186 = vmatpush3.msra.mxu1 %v11817_v56  ;;  %10160 = vmatprep.subr.mxu0 %v14559_v0  ;;  %v1343_v56 = vand.u32 4294901760, %v11972_v38  ;;  %v1901_v40 = vand.u32 4294901760, %v12167_v16 }
 0x177   :  { %10187 = vmatprep.subr.mxu1 %v14559_v0  ;;  %10161 = vmatpush3.msra.mxu0 %v770_v49  ;;  %v1337_v49 = vsub.f32 %v11953_v21, %v1336_v51  ;;  %v1331_v50 = vand.u32 4294901760, %v1330_v43 }
 0x178   :  { %10188 = vmatpush3.msra.mxu1 %v11833_v62  ;;  %10162 = vmatprep.subr.mxu0 %v14559_v0  ;;  %v1286_v62 = vsub.f32 %v1210_v23, %v11978_v39 }
 0x179   :  { %10189 = vmatprep.subr.mxu1 %v14559_v0  ;;  %10163 = vmatpush3.msra.mxu0 %v777_v55  ;;  %v1338_v55 = vand.u32 4294901760, %v1337_v49 }
 0x17a   :  { %10190 = vmatpush3.msra.mxu1 %v11846_v5  ;;  %10191 = vmatprep.mubr.msk.f32.mxu1 %vm11511_vm0, %v14559_v0  ;;  %v1344_v5 = vsub.f32 %v11972_v38, %v1343_v56  ;;  %v1287_v57 = vand.u32 4294901760, %v1286_v62 }
 0x17b   :  { %10164 = vmatprep.subr.mxu0 %v14559_v0  ;;  %10192 = vmatmul.mubr.f32.vlgmr.msra.gmra.mxu1 %v11876_v1 }
 0x17c   :  { %10165 = vmatpush3.msra.mxu0 %v784_v63  ;;  %10172 = vmatprep.mubr.msk.f32.mxu0 %vm11511_vm0, %v14559_v0  ;;  %v1345_v61 = vand.u32 4294901760, %v1344_v5  ;;  %v1288_v63 = vsub.f32 %v1286_v62, %v1287_v57 }
 0x17d   :  { %10166 = vmatprep.subr.mxu0 %v14559_v0  ;;  %10205 = vmatprep.subr.mxu1 %v14559_v0 }
 0x17e   :  { %10167 = vmatpush3.msra.mxu0 %v791_v3  ;;  %10206 = vmatpush3.msra.mxu1 %v1324_v44  ;;  %v1289_v3 = vand.u32 4294901760, %v1288_v63  ;;  %v1204_v63 = vlaneseq }
 0x17f   :  { %10168 = vmatprep.subr.mxu0 %v14559_v0  ;;  %10207 = vmatprep.subr.mxu1 %v14559_v0 }
 0x180   :  { %10169 = vmatpush3.msra.mxu0 %v798_v8  ;;  %10208 = vmatpush3.msra.mxu1 %v1331_v50  ;;  %v12083_v8 = vand.u32 4294901760, %v1733_v4  ;;  %v9370_v50 = vld [vmem:[%s14590_s25] ss:$0 sm:$0xff]  ;;  %s11520_s25 = smov 112  }
 0x181   :  { %10170 = vmatprep.subr.mxu0 %v14559_v0  ;;  %10209 = vmatprep.subr.mxu1 %v14559_v0 }
 0x182   :  { %10171 = vmatpush3.msra.mxu0 %v805_v13  ;;  %10210 = vmatpush3.msra.mxu1 %v1338_v55  ;;  %v12088_v13 = vand.u32 4294901760, %v1732_v9  ;;  %v12094_v25 = vsub.f32 %v1733_v4, %v12083_v8  ;;  %v12189_v4 = vshrl.u32 %v1204_v63, 7 }
 0x183   :  { %10173 = vmatmul.mubr.f32.vlgmr.msra.gmra.mxu0 %v11876_v1  ;;  %10194 = vmatprep.subr.mxu0 %v14559_v0  ;;  %v12149_v1 = vsub.f32 %v1728_v37, %v12125_v46 }
 0x184   :  { %10195 = vmatpush3.msra.mxu0 %v11914_v15  ;;  %10202 = vmatprep.mubr.msk.f32.mxu0 %vm11511_vm0, %v14559_v0  ;;  %v12103_v28 = vsub.f32 %v1732_v9, %v12088_v13  ;;  %v1859_v31 = vand.u32 4294901760, %v12094_v25  ;;  %v12192_v37 = vsub.s32 0, %v12189_v4 }
 0x185   :  { %10196 = vmatprep.subr.mxu0 %v14559_v0  ;;  %10211 = vmatprep.subr.mxu1 %v14559_v0 }
 0x186   :  { %10197 = vmatpush3.msra.mxu0 %v11923_v17  ;;  %10212 = vmatpush3.msra.mxu1 %v1345_v61  ;;  %v1865_v41 = vand.u32 4294901760, %v12103_v28  ;;  %v1860_v48 = vsub.f32 %v12094_v25, %v1859_v31 }
 0x187   :  { %10198 = vmatprep.subr.mxu0 %v14559_v0  ;;  %10213 = vmatprep.mubr.msk.f32.mxu1 %vm11511_vm0, %v14559_v0 }
 0x188   :  { %10199 = vmatpush3.msra.mxu0 %v11932_v18  ;;  %10227 = vmatprep.subr.mxu1 %v14559_v0  ;;  %v1866_v59 = vsub.f32 %v12103_v28, %v1865_v41  ;;  %v1861_v6 = vand.u32 4294901760, %v1860_v48  ;;  %v12197_v48 = vld [vmem:[%s14529_s17] sm:$0xff] }
 0x189   :  { %10200 = vmatprep.subr.mxu0 %v14559_v0  ;;  %10214 = vmatmul.mubr.f32.vlgmr.msra.gmra.mxu1 %v11978_v39 }
 0x18a   :  { %10201 = vmatpush3.msra.mxu0 %v11955_v22  ;;  %10228 = vmatpush3.msra.mxu1 %v11914_v15  ;;  %v1867_v12 = vand.u32 4294901760, %v1866_v59 }
 0x18b   :  { %10216 = vmatprep.subr.mxu0 %v14559_v0  ;;  %10203 = vmatmul.mubr.f32.vlgmr.msra.gmra.mxu0 %v1289_v3 }
 0x18c   :  { %10217 = vmatpush3.msra.mxu0 %v11930_v33  ;;  %10229 = vmatprep.subr.mxu1 %v14559_v0  ;;  %v1884_v33 = vsub.f32 %v12136_v53, %v1883_v10 }
 0x18d   :  { %10218 = vmatprep.subr.mxu0 %v14559_v0  ;;  %10230 = vmatpush3.msra.mxu1 %v11923_v17 }
 0x18e   :  { %10219 = vmatpush3.msra.mxu0 %v11942_v36  ;;  %10231 = vmatprep.subr.mxu1 %v14559_v0 }
 0x18f   :  { %10220 = vmatprep.subr.mxu0 %v14559_v0  ;;  %10232 = vmatpush3.msra.mxu1 %v11932_v18 }
 0x190   :  { %10221 = vmatpush3.msra.mxu0 %v11953_v21  ;;  %10224 = vmatprep.mubr.msk.f32.mxu0 %vm11511_vm0, %v14559_v0 }
 0x191   :  { %10222 = vmatprep.subr.mxu0 %v14559_v0  ;;  %10233 = vmatprep.subr.mxu1 %v14559_v0 }
 0x192   :  { %10223 = vmatpush3.msra.mxu0 %v11972_v38  ;;  %10234 = vmatpush3.msra.mxu1 %v11955_v22 }
 0x193   :  { %10238 = vmatprep.subr.mxu0 %v14559_v0  ;;  %10225 = vmatmul.mubr.f32.vlgmr.msra.gmra.mxu0 %v1286_v62 }
 0x194   :  { %10239 = vmatpush3.msra.mxu0 %v1322_v20  ;;  %10235 = vmatprep.mubr.msk.f32.mxu1 %vm11511_vm0, %v14559_v0  ;;  %v1885_v20 = vand.u32 4294901760, %v1884_v33 }
 0x195   :  { %10240 = vmatprep.subr.mxu0 %v14559_v0  ;;  %10249 = vmatprep.subr.mxu1 %v14559_v0 }
 0x196   :  { %10236 = vmatmul.mubr.f32.vlgmr.msra.gmra.mxu1 %v1287_v57  ;;  %10241 = vmatpush3.msra.mxu0 %v1329_v45  ;;  %v1902_v45 = vsub.f32 %v12167_v16, %v1901_v40 }
 0x197   :  { %10250 = vmatpush3.msra.mxu1 %v11914_v15  ;;  %10242 = vmatprep.subr.mxu0 %v14559_v0  ;;  %v1889_v15 = vand.u32 4294901760, %v12149_v1 }
 0x198   :  { %10251 = vmatprep.subr.mxu1 %v14559_v0  ;;  %10243 = vmatpush3.msra.mxu0 %v1336_v51  ;;  %v1903_v35 = vand.u32 4294901760, %v1902_v45 }
 0x199   :  { %10252 = vmatpush3.msra.mxu1 %v11923_v17  ;;  %10244 = vmatprep.subr.mxu0 %v14559_v0  ;;  %v1873_v17 = vand.u32 4294901760, %v1872_v7  ;;  %v1890_v36 = vsub.f32 %v12149_v1, %v1889_v15 }
 0x19a   :  { %10253 = vmatprep.subr.mxu1 %v14559_v0  ;;  %10245 = vmatpush3.msra.mxu0 %v1343_v56 }
 0x19b   :  { %10246 = vmatprep.mubr.msk.f32.mxu0 %vm11511_vm0, %v14559_v0  ;;  %10254 = vmatpush3.msra.mxu1 %v11932_v18  ;;  %v1895_v18 = vand.u32 4294901760, %v12159_v11 }
 0x19c   :  { %10247 = vmatmul.mubr.f32.vlgmr.msra.gmra.mxu0 %v11978_v39  ;;  %10255 = vmatprep.subr.mxu1 %v14559_v0 }
 0x19d   :  { %10256 = vmatpush3.msra.mxu1 %v11955_v22  ;;  %10257 = vmatprep.mubr.msk.f32.mxu1 %vm11511_vm0, %v14559_v0  ;;  %v1896_v21 = vsub.f32 %v12159_v11, %v1895_v18  ;;  %v1891_v22 = vand.u32 4294901760, %v1890_v36 }
 0x19e   :  { %10258 = vmatmul.mubr.f32.vlgmr.msra.gmra.mxu1 %v11978_v39  ;;  %1821 = vmatprep.mubr.f32.mxu0 %v14559_v0 }
 0x19f   :  { %1937 = vmatprep.mubr.f32.mxu1 %v14559_v0  ;;  %1774 = vmatprep.subr.mxu0 %v12083_v8  ;;  %v1897_v23 = vand.u32 4294901760, %v1896_v21 }
 0x1a0   :  { %1776 = vmatpush1.msra.mxu0 %v12088_v13  ;;  %1862 = vmatprep.subr.mxu1 %v1861_v6  ;;  %v1207_v6 = vrot.slane %v12197_v48, %v12192_v37 }
 0x1a1   :  { %1778 = vmatprep.subr.mxu0 %v12096_v26  ;;  %1868 = vmatpush1.msra.mxu1 %v1867_v12 }
 0x1a2   :  { %1780 = vmatpush1.msra.mxu0 %v12105_v29  ;;  %1874 = vmatprep.subr.mxu1 %v1873_v17 }
 0x1a3   :  { %1782 = vmatprep.subr.mxu0 %v12115_v34  ;;  %1880 = vmatpush1.msra.mxu1 %v1879_v19 }
 0x1a4   :  { %1784 = vmatpush1.msra.mxu0 %v12125_v46  ;;  %1886 = vmatprep.subr.mxu1 %v1885_v20 }
 0x1a5   :  { %1786 = vmatprep.subr.mxu0 %v12138_v54  ;;  %1892 = vmatpush1.msra.mxu1 %v1891_v22 }
 0x1a6   :  { %1788 = vmatpush1.msra.mxu0 %v12151_v2  ;;  %1898 = vmatprep.subr.mxu1 %v1897_v23 }
 0x1a7   :  { %1971 = vmatprep.subr.mxu0 %v12094_v25  ;;  %1904 = vmatpush1.msra.mxu1 %v1903_v35 }
 0x1a8   :  { %2059 = vmatprep.subr.mxu1 %v12083_v8 }
 0x219   :  { %v844_v38 = vpop.f32.mrf.mxu1 }
 0x21b   :  { %v10117_v51 = vpop.f32.mrf.mxu1 }
 0x221   :  { %v733_v39 = vpop.f32.mrf.mxu0 }
 0x222   :  { %v734_v55 = vadd.f32 %v9370_v50, %v733_v39 }
 0x223   :  { %v10098_v43 = vpop.f32.mrf.mxu0 }
 0x224   :  { %v845_v57 = vadd.f32 %v844_v38, %v734_v55 }
 0x229   :  { %v1013_v44 = vpop.f32.mrf.mxu1 }
 0x22b   :  { %v10155_v49 = vpop.f32.mrf.mxu1 }
 0x232   :  { %v932_v56 = vpop.f32.mrf.mxu0 }
 0x233   :  { %v933_v3 = vadd.f32 %v932_v56, %v845_v57 }
 0x234   :  { %v10136_v62 = vpop.f32.mrf.mxu0 }
 0x235   :  { %v1014_v9 = vadd.f32 %v1013_v44, %v933_v3 }
 0x23b   :  { %v1187_v5 = vpop.f32.mrf.mxu1 }
 0x23d   :  { %v10193_v61 = vpop.f32.mrf.mxu1 }
 0x243   :  { %v1108_v24 = vpop.f32.mrf.mxu0 }
 0x244   :  { %v1109_v27 = vadd.f32 %v1108_v24, %v1014_v9 }
 0x245   :  { %v10174_v30 = vpop.f32.mrf.mxu0 }
 0x246   :  { %v1188_v47 = vadd.f32 %v1187_v5, %v1109_v27 }
 0x248   :  { %v1747_v58 = vsel %vm137_vm1, %v1188_v47, 0 }
 0x249   :  { %v12200_v59 = vand.u32 4294901760, %v1747_v58  ;;  %v1382_v7 = vpop.f32.mrf.mxu1 }
 0x24b   :  { %v1823_v12 = vsub.f32 %v1747_v58, %v12200_v59  ;;  %1939 = vmatmul.mubr.f32.vlgmr.msra.gmra.mxu1 %v12200_v59  ;;  %v1291_v14 = vpop.f32.mrf.mxu0  ;;  %v10215_v17 = vpop.f32.mrf.mxu1 }
 0x24c   :  { %2061 = vmatpush1.msra.mxu1 %v12088_v13  ;;  %2106 = vmatprep.mubr.f32.mxu1 %v14559_v0  ;;  %v1292_v33 = vadd.f32 %v1291_v14, %v1207_v6  ;;  %v12272_v6 = vsub.s32 2, %v12189_v4 }
 0x24d   :  { %2063 = vmatprep.subr.mxu1 %v12096_v26  ;;  %v1824_v19 = vand.u32 4294901760, %v1823_v12  ;;  %v10204_v36 = vpop.f32.mrf.mxu0 }
 0x24e   :  { %2065 = vmatpush1.msra.mxu1 %v12105_v29  ;;  %v1383_v22 = vadd.f32 %v1382_v7, %v1292_v33  ;;  %14591 = vst [vmem:[#allocation15_spill] sm:$0xff] %v12272_v6 }
 0x24f   :  { %2067 = vmatprep.subr.mxu1 %v12115_v34  ;;  %v1825_v20 = vsub.f32 %v1823_v12, %v1824_v19 }
 0x250   :  { %2069 = vmatpush1.msra.mxu1 %v12125_v46 }
 0x251   :  { %2071 = vmatprep.subr.mxu1 %v12138_v54  ;;  %v1826_v21 = vand.u32 4294901760, %v1825_v20 }
 0x252   :  { %2073 = vmatpush1.msra.mxu1 %v12151_v2 }
 0x253   :  { %2110 = vmatmul.mubr.f32.vlgmr.msra.gmra.mxu1 %v1824_v19  ;;  %2237 = vmatprep.subr.mxu1 %v12083_v8  ;;  %v1462_v45 = vpop.f32.mrf.mxu0 }
 0x254   :  { %1827 = vmatmul.mubr.f32.vlgmr.msra.gmra.mxu0 %v1826_v21  ;;  %2239 = vmatpush1.msra.mxu1 %v12088_v13  ;;  %v1463_v23 = vadd.f32 %v1462_v45, %v1383_v22 }
 0x255   :  { %1974 = vmatpush1.msra.mxu0 %v12103_v28  ;;  %2241 = vmatprep.subr.mxu1 %v12096_v26  ;;  %v10226_v35 = vpop.f32.mrf.mxu0 }
 0x256   :  { %1977 = vmatprep.subr.mxu0 %v12113_v32  ;;  %2243 = vmatpush1.msra.mxu1 %v12105_v29  ;;  %v1539_v38 = vpop.f32.mrf.mxu1 }
 0x257   :  { %1980 = vmatpush1.msra.mxu0 %v12123_v42  ;;  %2245 = vmatprep.subr.mxu1 %v12115_v34  ;;  %v1540_v13 = vadd.f32 %v1539_v38, %v1463_v23  ;;  %v1196_v23 = vld [vmem:[%s14592_s9] sm:$0xff] }
 0x258   :  { %1983 = vmatprep.subr.mxu0 %v12136_v53  ;;  %2247 = vmatpush1.msra.mxu1 %v12125_v46  ;;  %v10237_v8 = vpop.f32.mrf.mxu1  ;;  %v12259_v53 = vsub.s32 1, %v12189_v4  ;;  %v2322_v38 = vsel %vm137_vm1, %v1196_v23, 0.0 }
 0x259   :  { %1986 = vmatpush1.msra.mxu0 %v12149_v1  ;;  %2249 = vmatprep.subr.mxu1 %v12138_v54  ;;  %v1197_v8 = vld [vmem:[%s14592_s9 + $0x8] sm:$0xff] }
 0x25a   :  { %1989 = vmatprep.subr.mxu0 %v12159_v11  ;;  %2025 = vmatprep.mubr.f32.mxu0 %v14559_v0 }
 0x25b   :  { %1992 = vmatpush1.msra.mxu0 %v12167_v16  ;;  %2251 = vmatpush1.msra.mxu1 %v12151_v2 }
 0x25c   :  { %2284 = vmatprep.mubr.f32.mxu1 %v14559_v0  ;;  %2028 = vmatmul.mubr.f32.vlgmr.msra.gmra.mxu0 %v1823_v12  ;;  %v1622_v26 = vpop.f32.mrf.mxu0  ;;  %v1724_v12 = vrot.slane %v12197_v48, %v12272_v6 }
 0x25d   :  { %2143 = vmatprep.subr.mxu0 %v1859_v31  ;;  %2286 = vmatmul.mubr.f32.vlgmr.msra.gmra.mxu1 %v12200_v59  ;;  %v1623_v29 = vadd.f32 %v1622_v26, %v1540_v13  ;;  %v2325_v13 = vsel %vm137_vm1, %v1197_v8, 0.0  ;;  %v12301_v26 = vld [vmem:[%s14592_s9 + $0x10] sm:$0xff] }
 0x25e   :  { %2147 = vmatpush1.msra.mxu0 %v1865_v41  ;;  %v1697_v34 = vpop.f32.mrf.mxu1  ;;  %2204 = vmatprep.mubr.f32.mxu0 %v14559_v0  ;;  %v10248_v46 = vpop.f32.mrf.mxu0 }
 0x25f   :  { %2151 = vmatprep.subr.mxu0 %v1871_v52  ;;  %v1698_v54 = vadd.f32 %v1697_v34, %v1623_v29  ;;  %10271 = vmatprep.subr.mxu1 %v14559_v0  ;;  %v2328_v29 = vsel %vm137_vm1, %v12301_v26, 0.0  ;;  %v12308_v34 = vld [vmem:[%s14592_s9 + $0x18] sm:$0xff]  ;;  %s11524_s9 = smov 12  }
 0x260   :  { %2155 = vmatpush1.msra.mxu0 %v1877_v60  ;;  %v10259_v25 = vpop.f32.mrf.mxu1  ;;  %10279 = vmatprep.mubr.msk.f32.mxu1 %vm11511_vm0, %v14559_v0  ;;  %v1734_v60 = vld [vmem:[#allocation5] sm:$0x3]  ;;  %v2331_v46 = vsel %vm137_vm1, %v12308_v34, 0.0 }
 0x261   :  { %2159 = vmatprep.subr.mxu0 %v1883_v10  ;;  %v1702_v28 = vsel %vm1701_vm5, %v1698_v54, 0.0  ;;  %v1743_v1 = vrot.slane %v1734_v60, %v12259_v53  ;;  %v1739_v11 = vrot.slane %v1734_v60, %v12192_v37 }
 0x262   :  { %2163 = vmatpush1.msra.mxu0 %v1889_v15  ;;  %1703 = vadd.xlane.f32.xlu0 %v1702_v28  ;;  %v2392_v28 = vld [vmem:[%s14522_s10 + $0x10] sm:$0xff] }
 0x263   :  { %2167 = vmatprep.subr.mxu0 %v1895_v18 }
 0x264   :  { %2171 = vmatpush1.msra.mxu0 %v1901_v40 }
 0x265   :  { %2206 = vmatmul.mubr.f32.vlgmr.msra.gmra.mxu0 %v12200_v59  ;;  %10260 = vmatprep.subr.mxu0 %v14559_v0  ;;  %v1719_v59 = vrot.slane %v12197_v48, %v12259_v53 }
 0x266   :  { %10268 = vmatprep.mubr.msk.f32.mxu0 %vm11511_vm0, %v14559_v0 }
 0x2eb   :  { %v1704_v31 = vpop.xlane.xlu0 %1703 }
 0x2ec   :  { %v1706_v32 = vmul.f32 0.03125, %v1704_v31 }
 0x2ee   :  { %v1707_v41 = vsub.f32 %v1698_v54, %v1706_v32  ;;  %v2393_v54 = vld [vmem:[%s14522_s10 + $0x18] sm:$0xff]  ;;  %v12323_v32 = vand.u32 4294901760, %v2392_v28 }
 0x2ef   :  { %v12315_v25 = vand.u32 4294901760, %v2393_v54 }
 0x2f0   :  { %v1708_v42 = vmul.f32 %v1707_v41, %v1707_v41 }
 0x2f1   :  { %v12321_v31 = vsub.f32 %v2393_v54, %v12315_v25  ;;  %10261 = vmatpush3.msra.mxu0 %v12315_v25 }
 0x2f2   :  { %v1709_v52 = vsel %vm1701_vm5, %v1708_v42, 0.0  ;;  %10262 = vmatprep.subr.mxu0 %v14559_v0 }
 0x2f3   :  { %1710 = vadd.xlane.f32.xlu0 %v1709_v52  ;;  %v2507_v42 = vand.u32 4294901760, %v12321_v31  ;;  %v12332_v52 = vsub.f32 %v2392_v28, %v12323_v32  ;;  %10263 = vmatpush3.msra.mxu0 %v12323_v32 }
 0x2f4   :  { %10264 = vmatprep.subr.mxu0 %v14559_v0 }
 0x30b   :  { %v1940_v2 = vpop.f32.mrf.mxu1 }
 0x30d   :  { %v1942_v18 = vpop.f32.mrf.mxu1 }
 0x313   :  { %v2111_v39 = vpop.f32.mrf.mxu1 }
 0x314   :  { %v1828_v10 = vpop.f32.mrf.mxu0 }
 0x315   :  { %v1829_v51 = vadd.f32 %v1828_v10, %v1739_v11  ;;  %v2113_v62 = vpop.f32.mrf.mxu1  ;;  %v2514_v10 = vand.u32 4294901760, %v12332_v52 }
 0x316   :  { %v1830_v15 = vpop.f32.mrf.mxu0 }
 0x317   :  { %v1831_v16 = vadd.f32 %v1830_v15, %v1743_v1  ;;  %v1941_v44 = vadd.f32 %v1940_v2, %v1829_v51  ;;  %v2390_v1 = vld [vmem:[%s14522_s10] sm:$0xff]  ;;  %v2508_v2 = vsub.f32 %v12321_v31, %v2507_v42 }
 0x318   :  { %v12348_v15 = vand.u32 4294901760, %v2390_v1 }
 0x319   :  { %v1943_v40 = vadd.f32 %v1942_v18, %v1831_v16  ;;  %v2509_v16 = vand.u32 4294901760, %v2508_v2  ;;  %v2515_v18 = vsub.f32 %v12332_v52, %v2514_v10 }
 0x31a   :  { %v12357_v51 = vsub.f32 %v2390_v1, %v12348_v15 }
 0x31b   :  { %10272 = vmatpush3.msra.mxu1 %v2509_v16 }
 0x31c   :  { %v2029_v43 = vpop.f32.mrf.mxu0  ;;  %10273 = vmatprep.subr.mxu1 %v14559_v0 }
 0x31d   :  { %v2030_v50 = vadd.f32 %v2029_v43, %v1941_v44  ;;  %v2287_v63 = vpop.f32.mrf.mxu1  ;;  %v2528_v44 = vand.u32 4294901760, %v12357_v51 }
 0x31e   :  { %v2031_v49 = vpop.f32.mrf.mxu0 }
 0x31f   :  { %v2032_v56 = vadd.f32 %v2031_v49, %v1943_v40  ;;  %v2112_v5 = vadd.f32 %v2111_v39, %v2030_v50  ;;  %v2516_v39 = vand.u32 4294901760, %v2515_v18 }
 0x321   :  { %v12263_v55 = vadd.f32 %v2113_v62, %v2032_v56  ;;  %10274 = vmatpush3.msra.mxu1 %v2516_v39  ;;  %v2529_v56 = vsub.f32 %v12357_v51, %v2528_v44  ;;  %v2902_v39 = vld [vmem:[%s14523_s11 + $0x18] sm:$0xff] }
 0x322   :  { %10275 = vmatprep.subr.mxu1 %v14559_v0 }
 0x323   :  { %v2530_v62 = vand.u32 4294901760, %v2529_v56  ;;  %v2900_v56 = vld [vmem:[%s14523_s11 + $0x8] sm:$0xff] }
 0x325   :  { %v2207_v57 = vpop.f32.mrf.mxu0 }
 0x326   :  { %v2208_v61 = vadd.f32 %v2207_v57, %v2112_v5 }
 0x328   :  { %v12265_v3 = vadd.f32 %v2287_v63, %v2208_v61 }
 0x32a   :  { %v2292_v9 = vadd.f32 1.0, %v12265_v3 }
 0x32c   :  { %2294 = vrot.lane.b32.xlu1 %v2292_v9, %s11512_s1 }
 0x37c   :  { %v1711_v24 = vpop.xlane.xlu0 %1710 }
 0x37d   :  { %v1712_v27 = vmul.f32 0.03125, %v1711_v24 }
 0x37f   :  { %v1713_v30 = vadd.f32 1e-05, %v1712_v27 }
 0x381   :  { %11339 = vrsqrt.f32 %v1713_v30 }
 0x38e   :  { %v11340_v47 = vpop.eup %11339 }
 0x38f   :  { %v1715_v58 = vmul.f32 %v11340_v47, %v1707_v41  ;;  %v2391_v41 = vld [vmem:[%s14522_s10 + $0x8] sm:$0xff] }
 0x390   :  { %v12334_v60 = vand.u32 4294901760, %v2391_v41 }
 0x391   :  { %v1720_v7 = vmul.f32 %v1719_v59, %v1715_v58 }
 0x392   :  { %v12346_v11 = vsub.f32 %v2391_v41, %v12334_v60  ;;  %10265 = vmatpush3.msra.mxu0 %v12334_v60 }
 0x393   :  { %v12276_v14 = vadd.f32 %v1724_v12, %v1720_v7  ;;  %10266 = vmatprep.subr.mxu0 %v14559_v0 }
 0x394   :  { %v2521_v40 = vand.u32 4294901760, %v12346_v11  ;;  %10267 = vmatpush3.msra.mxu0 %v12348_v15 }
 0x395   :  { %10282 = vmatprep.subr.mxu0 %v14559_v0 }
 0x396   :  { %v2522_v43 = vsub.f32 %v12346_v11, %v2521_v40 }
 0x398   :  { %v2523_v49 = vand.u32 4294901760, %v2522_v43  ;;  %v12424_v43 = vand.u32 4294901760, %v2902_v39 }
 0x39a   :  { %10276 = vmatpush3.msra.mxu1 %v2523_v49  ;;  %v2901_v49 = vld [vmem:[%s14523_s11 + $0x10] sm:$0xff] }
 0x39b   :  { %10277 = vmatprep.subr.mxu1 %v14559_v0 }
 0x39c   :  { %10278 = vmatpush3.msra.mxu1 %v2530_v62  ;;  %v12436_v62 = vand.u32 4294901760, %v2900_v56 }
 0x39d   :  { %10293 = vmatprep.subr.mxu1 %v14559_v0 }
 0x39e   :  { %v2295_v17 = vpop.permute.xlu1 %2294 }
 0x39f   :  { %v2297_v33 = vmul.f32 %v2295_v17, %v12276_v14  ;;  %v2314_v17 = vsub.s32 3, %v12189_v4 }
 0x3a1   :  { %v12280_v19 = vadd.f32 %v2297_v33, %v12265_v3 }
 0x3a3   :  { %v2299_v36 = vsel %vm1701_vm5, %v12280_v19, 0.0 }
 0x3a4   :  { %2300 = vadd.xlane.f32.xlu1 %v2299_v36 }
 0x42d   :  { %v2301_v20 = vpop.xlane.xlu1 %2300 }
 0x42e   :  { %v2302_v21 = vmul.f32 0.03125, %v2301_v20  ;;  %v2319_v20 = vsub.s32 4, %v12189_v4 }
 0x430   :  { %v12285_v22 = vsub.f32 %v12280_v19, %v2302_v21 }
 0x432   :  { %v2304_v45 = vmul.f32 %v12285_v22, %v12285_v22 }
 0x434   :  { %v2305_v35 = vsel %vm1701_vm5, %v2304_v45, 0.0 }
 0x435   :  { %2306 = vadd.xlane.f32.xlu0 %v2305_v35  ;;  %v2315_v35 = vrot.slane %v12197_v48, %v2314_v17 }
 0x439   :  { %2323 = vadd.xlane.f32.xlu0 %v2322_v38 }
 0x43d   :  { %2326 = vadd.xlane.f32.xlu0 %v2325_v13 }
 0x441   :  { %2329 = vadd.xlane.f32.xlu0 %v2328_v29  ;;  %v2320_v29 = vrot.slane %v12197_v48, %v2319_v20 }
 0x445   :  { %2332 = vadd.xlane.f32.xlu0 %v2331_v46 }
 0x4be   :  { %v2307_v50 = vpop.xlane.xlu0 %2306 }
 0x4bf   :  { %v2308_v5 = vmul.f32 0.03125, %v2307_v50  ;;  %v12441_v50 = vsub.f32 %v2902_v39, %v12424_v43 }
 0x4c1   :  { %v2309_v57 = vadd.f32 1e-05, %v2308_v5 }
 0x4c2   :  { %v2324_v61 = vpop.xlane.xlu0 %2323 }
 0x4c3   :  { %11341 = vrsqrt.f32 %v2309_v57  ;;  %v2334_v63 = vmul.f32 0.03125, %v2324_v61  ;;  %v12454_v57 = vand.u32 4294901760, %v12441_v50 }
 0x4c5   :  { %v12372_v9 = vsub.f32 %v1196_v23, %v2334_v63  ;;  %v2899_v63 = vld [vmem:[%s14523_s11] sm:$0xff]  ;;  %s11525_s11 = smov 24  }
 0x4c6   :  { %v2327_v24 = vpop.xlane.xlu0 %2326 }
 0x4c7   :  { %v2335_v27 = vmul.f32 0.03125, %v2327_v24  ;;  %v2342_v30 = vmul.f32 %v12372_v9, %v12372_v9  ;;  %v3052_v24 = vsub.f32 %v12441_v50, %v12454_v57 }
 0x4c9   :  { %v12376_v47 = vsub.f32 %v1197_v8, %v2335_v27  ;;  %v2346_v58 = vsel %vm137_vm1, %v2342_v30, 0.0  ;;  %v12472_v27 = vand.u32 4294901760, %v2899_v63 }
 0x4ca   :  { %2347 = vadd.xlane.f32.xlu0 %v2346_v58  ;;  %v2330_v59 = vpop.xlane.xlu0 %2329 }
 0x4cb   :  { %v2336_v7 = vmul.f32 0.03125, %v2330_v59  ;;  %v2343_v12 = vmul.f32 %v12376_v47, %v12376_v47  ;;  %v12483_v59 = vsub.f32 %v2899_v63, %v12472_v27 }
 0x4cd   :  { %v12383_v33 = vsub.f32 %v12301_v26, %v2336_v7  ;;  %v2349_v36 = vsel %vm137_vm1, %v2343_v12, 0.0 }
 0x4ce   :  { %2350 = vadd.xlane.f32.xlu0 %v2349_v36  ;;  %v2333_v21 = vpop.xlane.xlu0 %2332  ;;  %v12491_v36 = vand.u32 4294901760, %v12483_v59 }
 0x4cf   :  { %v2337_v45 = vmul.f32 0.03125, %v2333_v21  ;;  %v2344_v23 = vmul.f32 %v12383_v33, %v12383_v33 }
 0x4d0   :  { %v11342_v38 = vpop.eup %11341 }
 0x4d1   :  { %v12393_v8 = vsub.f32 %v12308_v34, %v2337_v45  ;;  %v2352_v13 = vsel %vm137_vm1, %v2344_v23, 0.0  ;;  %v2311_v26 = vmul.f32 %v11342_v38, %v12285_v22 }
 0x4d2   :  { %2353 = vadd.xlane.f32.xlu0 %v2352_v13  ;;  %v2376_v13 = vsub.s32 5, %v12189_v4 }
 0x4d3   :  { %v2345_v46 = vmul.f32 %v12393_v8, %v12393_v8  ;;  %v2316_v54 = vmul.f32 %v2315_v35, %v2311_v26 }
 0x4d5   :  { %v2355_v28 = vsel %vm137_vm1, %v2345_v46, 0.0  ;;  %v2321_v41 = vadd.f32 %v2320_v29, %v2316_v54  ;;  %v2384_v29 = vsub.s32 6, %v12189_v4  ;;  %v2377_v46 = vrot.slane %v12197_v48, %v2376_v13 }
 0x4d6   :  { %2356 = vadd.xlane.f32.xlu0 %v2355_v28 }
 0x4d7   :  { %v2399_v34 = vsel %vm137_vm1, %v2321_v41, 0  ;;  %v2385_v41 = vrot.slane %v12197_v48, %v2384_v29 }
 0x4d8   :  { %v12404_v1 = vand.u32 4294901760, %v2399_v34 }
 0x4da   :  { %v2471_v2 = vsub.f32 %v2399_v34, %v12404_v1  ;;  %10280 = vmatmul.mubr.f32.vlgmr.msra.gmra.mxu1 %v12404_v1 }
 0x4db   :  { %10294 = vmatpush3.msra.mxu1 %v12315_v25  ;;  %10301 = vmatprep.mubr.msk.f32.mxu1 %vm11511_vm0, %v14559_v0 }
 0x4dc   :  { %10295 = vmatprep.subr.mxu1 %v14559_v0  ;;  %v2472_v22 = vand.u32 4294901760, %v2471_v2 }
 0x4dd   :  { %10296 = vmatpush3.msra.mxu1 %v12323_v32 }
 0x4de   :  { %10297 = vmatprep.subr.mxu1 %v14559_v0  ;;  %v2473_v16 = vsub.f32 %v2471_v2, %v2472_v22 }
 0x4df   :  { %10298 = vmatpush3.msra.mxu1 %v12334_v60 }
 0x4e0   :  { %10299 = vmatprep.subr.mxu1 %v14559_v0  ;;  %v2474_v18 = vand.u32 4294901760, %v2473_v16 }
 0x4e1   :  { %10300 = vmatpush3.msra.mxu1 %v12348_v15 }
 0x4e2   :  { %10302 = vmatmul.mubr.f32.vlgmr.msra.gmra.mxu1 %v2472_v22  ;;  %10315 = vmatprep.subr.mxu1 %v14559_v0 }
 0x4e3   :  { %10269 = vmatmul.mubr.f32.vlgmr.msra.gmra.mxu0 %v2474_v18  ;;  %10316 = vmatpush3.msra.mxu1 %v12315_v25  ;;  %v12434_v25 = vand.u32 4294901760, %v2901_v49 }
 0x4e4   :  { %10283 = vmatpush3.msra.mxu0 %v12321_v31  ;;  %10317 = vmatprep.subr.mxu1 %v14559_v0  ;;  %v3073_v31 = vsub.f32 %v12483_v59, %v12491_v36 }
 0x4e5   :  { %10284 = vmatprep.subr.mxu0 %v14559_v0  ;;  %10318 = vmatpush3.msra.mxu1 %v12323_v32  ;;  %v12446_v5 = vsub.f32 %v2901_v49, %v12434_v25  ;;  %v12449_v32 = vsub.f32 %v2900_v56, %v12436_v62 }
 0x4e6   :  { %10285 = vmatpush3.msra.mxu0 %v12332_v52  ;;  %10319 = vmatprep.subr.mxu1 %v14559_v0 }
 0x4e7   :  { %10286 = vmatprep.subr.mxu0 %v14559_v0  ;;  %10320 = vmatpush3.msra.mxu1 %v12334_v60  ;;  %v12460_v60 = vand.u32 4294901760, %v12446_v5  ;;  %v12463_v61 = vand.u32 4294901760, %v12449_v32 }
 0x4e8   :  { %10287 = vmatpush3.msra.mxu0 %v12346_v11  ;;  %10321 = vmatprep.subr.mxu1 %v14559_v0 }
 0x4e9   :  { %10288 = vmatprep.subr.mxu0 %v14559_v0  ;;  %10290 = vmatprep.mubr.msk.f32.mxu0 %vm11511_vm0, %v14559_v0  ;;  %v3059_v30 = vsub.f32 %v12446_v5, %v12460_v60  ;;  %v3066_v58 = vsub.f32 %v12449_v32, %v12463_v61 }
 0x4ea   :  { %10289 = vmatpush3.msra.mxu0 %v12357_v51  ;;  %10322 = vmatpush3.msra.mxu1 %v12348_v15  ;;  %v3053_v15 = vand.u32 4294901760, %v3052_v24 }
 0x4eb   :  { %10323 = vmatprep.mubr.msk.f32.mxu1 %vm11511_vm0, %v14559_v0  ;;  %10291 = vmatmul.mubr.f32.vlgmr.msra.gmra.mxu0 %v2471_v2  ;;  %v3060_v7 = vand.u32 4294901760, %v3059_v30  ;;  %v3067_v12 = vand.u32 4294901760, %v3066_v58 }
 0x4ec   :  { %10304 = vmatprep.subr.mxu0 %v14559_v0  ;;  %10324 = vmatmul.mubr.f32.vlgmr.msra.gmra.mxu1 %v12404_v1 }
 0x4ed   :  { %10305 = vmatpush3.msra.mxu0 %v2507_v42  ;;  %10312 = vmatprep.mubr.msk.f32.mxu0 %vm11511_vm0, %v14559_v0  ;;  %v3074_v42 = vand.u32 4294901760, %v3073_v31 }
 0x4ee   :  { %10306 = vmatprep.subr.mxu0 %v14559_v0  ;;  %10340 = vmatprep.subr.mxu1 %v3053_v15 }
 0x4ef   :  { %10307 = vmatpush3.msra.mxu0 %v2514_v10  ;;  %10341 = vmatpush3.msra.mxu1 %v3053_v15 }
 0x4f0   :  { %10308 = vmatprep.subr.mxu0 %v14559_v0  ;;  %10342 = vmatprep.subr.mxu1 %v3060_v7 }
 0x4f1   :  { %10309 = vmatpush3.msra.mxu0 %v2521_v40  ;;  %10343 = vmatpush3.msra.mxu1 %v3060_v7 }
 0x4f2   :  { %10310 = vmatprep.subr.mxu0 %v14559_v0  ;;  %10344 = vmatprep.subr.mxu1 %v3067_v12 }
 0x4f3   :  { %10311 = vmatpush3.msra.mxu0 %v2528_v44  ;;  %10345 = vmatpush3.msra.mxu1 %v3067_v12 }
 0x4f4   :  { %10313 = vmatmul.mubr.f32.vlgmr.msra.gmra.mxu0 %v12404_v1  ;;  %10346 = vmatprep.subr.mxu1 %v3074_v42 }
 0x4f5   :  { %10347 = vmatpush3.msra.mxu1 %v3074_v42  ;;  %10326 = vmatprep.subr.mxu0 %v12424_v43 }
 0x4f6   :  { %10327 = vmatpush3.msra.mxu0 %v12424_v43  ;;  %10368 = vmatprep.subr.mxu1 %v12424_v43 }
 0x4f7   :  { %10328 = vmatprep.subr.mxu0 %v12434_v25 }
 0x4f8   :  { %10329 = vmatpush3.msra.mxu0 %v12434_v25 }
 0x4f9   :  { %10330 = vmatprep.subr.mxu0 %v12436_v62 }
 0x4fa   :  { %10331 = vmatpush3.msra.mxu0 %v12436_v62 }
 0x4fb   :  { %10332 = vmatprep.subr.mxu0 %v12472_v27 }
 0x4fc   :  { %10333 = vmatpush3.msra.mxu0 %v12472_v27 }
 0x4fd   :  { %10354 = vmatprep.subr.mxu0 %v12441_v50 }
 0x553   :  { %v2348_v52 = vpop.xlane.xlu0 %2347 }
 0x554   :  { %v2358_v10 = vmul.f32 0.03125, %v2348_v52 }
 0x556   :  { %v2362_v11 = vadd.f32 1e-05, %v2358_v10 }
 0x557   :  { %v2351_v40 = vpop.xlane.xlu0 %2350 }
 0x558   :  { %11343 = vrsqrt.f32 %v2362_v11  ;;  %v2359_v51 = vmul.f32 0.03125, %v2351_v40 }
 0x55a   :  { %v2363_v44 = vadd.f32 1e-05, %v2359_v51 }
 0x55b   :  { %v2354_v21 = vpop.xlane.xlu0 %2353 }
 0x55c   :  { %11345 = vrsqrt.f32 %v2363_v44  ;;  %v2360_v45 = vmul.f32 0.03125, %v2354_v21 }
 0x55e   :  { %v2364_v23 = vadd.f32 1e-05, %v2360_v45 }
 0x55f   :  { %v2357_v35 = vpop.xlane.xlu0 %2356 }
 0x560   :  { %11347 = vrsqrt.f32 %v2364_v23  ;;  %v2361_v38 = vmul.f32 0.03125, %v2357_v35 }
 0x562   :  { %v2365_v26 = vadd.f32 1e-05, %v2361_v38 }
 0x564   :  { %11349 = vrsqrt.f32 %v2365_v26 }
 0x565   :  { %v11344_v54 = vpop.eup %11343 }
 0x566   :  { %v2370_v28 = vmul.f32 %v11344_v54, %v12372_v9 }
 0x568   :  { %v2378_v34 = vmul.f32 %v2377_v46, %v2370_v28 }
 0x569   :  { %v11346_v1 = vpop.eup %11345 }
 0x56a   :  { %v2386_v2 = vadd.f32 %v2385_v41, %v2378_v34  ;;  %v2371_v22 = vmul.f32 %v11346_v1, %v12376_v47 }
 0x56c   :  { %v2904_v16 = vsel %vm137_vm1, %v2386_v2, 0  ;;  %v2379_v18 = vmul.f32 %v2377_v46, %v2371_v22 }
 0x56d   :  { %v11348_v39 = vpop.eup %11347  ;;  %v12525_v49 = vand.u32 4294901760, %v2904_v16 }
 0x56e   :  { %v2387_v56 = vadd.f32 %v2385_v41, %v2379_v18  ;;  %v2372_v63 = vmul.f32 %v11348_v39, %v12383_v33 }
 0x56f   :  { %10348 = vmatprep.mubr.f32.mxu1 %v12525_v49  ;;  %v2985_v9 = vsub.f32 %v2904_v16, %v12525_v49 }
 0x570   :  { %v2907_v24 = vsel %vm137_vm1, %v2387_v56, 0  ;;  %v2380_v30 = vmul.f32 %v2377_v46, %v2372_v63 }
 0x571   :  { %v11350_v58 = vpop.eup %11349  ;;  %v12531_v15 = vand.u32 4294901760, %v2907_v24  ;;  %v2986_v47 = vand.u32 4294901760, %v2985_v9 }
 0x572   :  { %v2388_v7 = vadd.f32 %v2385_v41, %v2380_v30  ;;  %v2373_v12 = vmul.f32 %v11350_v58, %v12393_v8 }
 0x573   :  { %v2995_v31 = vsub.f32 %v2907_v24, %v12531_v15  ;;  %10349 = vmatmul.mubr.f32.vlgmr.msra.gmra.mxu1 %v12531_v15  ;;  %v2987_v42 = vsub.f32 %v2985_v9, %v2986_v47 }
 0x574   :  { %v2910_v33 = vsel %vm137_vm1, %v2388_v7, 0  ;;  %10369 = vmatpush3.msra.mxu1 %v12424_v43  ;;  %v2381_v52 = vmul.f32 %v2377_v46, %v2373_v12 }
 0x575   :  { %v2988_v10 = vand.u32 4294901760, %v2987_v42  ;;  %v12538_v11 = vand.u32 4294901760, %v2910_v33  ;;  %10370 = vmatprep.subr.mxu1 %v12434_v25  ;;  %v2996_v40 = vand.u32 4294901760, %v2995_v31 }
 0x576   :  { %10371 = vmatpush3.msra.mxu1 %v12434_v25  ;;  %v2389_v51 = vadd.f32 %v2385_v41, %v2381_v52 }
 0x577   :  { %10334 = vmatprep.mubr.f32.mxu0 %v2988_v10  ;;  %10351 = vmatprep.mubr.f32.mxu1 %v12538_v11  ;;  %v2997_v8 = vsub.f32 %v2995_v31, %v2996_v40  ;;  %v3005_v44 = vsub.f32 %v2910_v33, %v12538_v11 }
 0x578   :  { %v2913_v21 = vsel %vm137_vm1, %v2389_v51, 0  ;;  %10372 = vmatprep.subr.mxu1 %v12436_v62 }
 0x579   :  { %v2998_v45 = vand.u32 4294901760, %v2997_v8  ;;  %v3014_v23 = vand.u32 4294901760, %v2913_v21  ;;  %10373 = vmatpush3.msra.mxu1 %v12436_v62  ;;  %v3006_v35 = vand.u32 4294901760, %v3005_v44 }
 0x57a   :  { %10374 = vmatprep.subr.mxu1 %v12472_v27 }
 0x57b   :  { %10335 = vmatmul.mubr.f32.vlgmr.msra.gmra.mxu0 %v2998_v45  ;;  %10352 = vmatmul.mubr.f32.gmra.mxu1 %v3014_v23  ;;  %v3007_v38 = vsub.f32 %v3005_v44, %v3006_v35  ;;  %v3015_v26 = vsub.f32 %v2913_v21, %v3014_v23 }
 0x57c   :  { %10376 = vmatprep.mubr.f32.mxu1 %v2986_v47  ;;  %10375 = vmatpush3.msra.mxu1 %v12472_v27 }
 0x57d   :  { %v3008_v46 = vand.u32 4294901760, %v3007_v38  ;;  %10355 = vmatpush3.msra.mxu0 %v12441_v50  ;;  %10396 = vmatprep.subr.mxu1 %v12424_v43  ;;  %v3016_v54 = vand.u32 4294901760, %v3015_v26  ;;  %v12580_v50 = vpop.f32.mrf.mxu0 }
 0x57e   :  { %10356 = vmatprep.subr.mxu0 %v12446_v5 }
 0x57f   :  { %10337 = vmatprep.mubr.f32.mxu0 %v3008_v46  ;;  %10377 = vmatmul.mubr.f32.vlgmr.msra.gmra.mxu1 %v2996_v40  ;;  %v3017_v28 = vsub.f32 %v3015_v26, %v3016_v54 }
 0x580   :  { %10379 = vmatprep.mubr.f32.mxu1 %v3006_v35  ;;  %10397 = vmatpush3.msra.mxu1 %v12424_v43  ;;  %v12578_v43 = vpop.f32.mrf.mxu1 }
 0x581   :  { %10357 = vmatpush3.msra.mxu0 %v12446_v5  ;;  %10398 = vmatprep.subr.mxu1 %v12434_v25  ;;  %v3018_v41 = vand.u32 4294901760, %v3017_v28  ;;  %v14542_v5 = vsub.s32 7, %v12189_v4 }
 0x582   :  { %10358 = vmatprep.subr.mxu0 %v12449_v32  ;;  %10399 = vmatpush3.msra.mxu1 %v12434_v25 }
 0x583   :  { %10338 = vmatmul.mubr.f32.gmra.mxu0 %v3018_v41  ;;  %10380 = vmatmul.mubr.f32.gmra.mxu1 %v3016_v54 }
 0x584   :  { %10359 = vmatpush3.msra.mxu0 %v12449_v32  ;;  %10400 = vmatprep.subr.mxu1 %v12436_v62 }
 0x585   :  { %10360 = vmatprep.subr.mxu0 %v12483_v59  ;;  %10362 = vmatprep.mubr.f32.mxu0 %v2985_v9 }
 0x586   :  { %10401 = vmatpush3.msra.mxu1 %v12436_v62  ;;  %10404 = vmatprep.mubr.f32.mxu1 %v12525_v49 }
 0x587   :  { %10361 = vmatpush3.msra.mxu0 %v12483_v59  ;;  %10402 = vmatprep.subr.mxu1 %v12472_v27 }
 0x588   :  { %10382 = vmatprep.subr.mxu0 %v12454_v57  ;;  %10403 = vmatpush3.msra.mxu1 %v12472_v27 }
 0x589   :  { %10363 = vmatmul.mubr.f32.vlgmr.msra.gmra.mxu0 %v2995_v31  ;;  %10405 = vmatmul.mubr.f32.vlgmr.msra.gmra.mxu1 %v12531_v15 }
 0x58a   :  { %10383 = vmatpush3.msra.mxu0 %v12454_v57  ;;  %10365 = vmatprep.mubr.f32.mxu0 %v3005_v44 }
 0x58b   :  { %10384 = vmatprep.subr.mxu0 %v12460_v60  ;;  %10407 = vmatprep.mubr.f32.mxu1 %v12538_v11 }
 0x58c   :  { %10385 = vmatpush3.msra.mxu0 %v12460_v60 }
 0x58d   :  { %10386 = vmatprep.subr.mxu0 %v12463_v61  ;;  %10366 = vmatmul.mubr.f32.gmra.mxu0 %v3015_v26 }
 0x58e   :  { %10387 = vmatpush3.msra.mxu0 %v12463_v61  ;;  %10408 = vmatmul.mubr.f32.gmra.mxu1 %v3014_v23  ;;  %v2397_v61 = vrot.slane %v12197_v48, %v14542_v5 }
 0x58f   :  { %10388 = vmatprep.subr.mxu0 %v12491_v36  ;;  %10390 = vmatprep.mubr.f32.mxu0 %v12525_v49 }
 0x590   :  { %10389 = vmatpush3.msra.mxu0 %v12491_v36 }
 0x591   :  { %10391 = vmatmul.mubr.f32.vlgmr.msra.gmra.mxu0 %v12531_v15 }
 0x592   :  { %10393 = vmatprep.mubr.f32.mxu0 %v12538_v11 }
 0x595   :  { %10394 = vmatmul.mubr.f32.gmra.mxu0 %v3014_v23 }
 0x59a   :  { %v2567_v25 = vpop.f32.mrf.mxu1 }
 0x59c   :  { %v10281_v62 = vpop.f32.mrf.mxu1 }
 0x5a2   :  { %v2724_v32 = vpop.f32.mrf.mxu1 }
 0x5a3   :  { %v2476_v57 = vpop.f32.mrf.mxu0 }
 0x5a4   :  { %v10303_v60 = vpop.f32.mrf.mxu1  ;;  %v2477_v59 = vadd.f32 %v2476_v57, %v2397_v61 }
 0x5a5   :  { %v10270_v27 = vpop.f32.mrf.mxu0 }
 0x5a6   :  { %v2568_v1 = vadd.f32 %v2567_v25, %v2477_v59  ;;  %v11513_v25 = vmov 1966171168  }
 0x5a7   :  { %v3591_v62 = vunpack.c.l.s4 %v11513_v25 }
 0x5ab   :  { %v2647_v36 = vpop.f32.mrf.mxu0 }
 0x5ac   :  { %v2882_v34 = vpop.f32.mrf.mxu1  ;;  %v2648_v16 = vadd.f32 %v2647_v36, %v2568_v1 }
 0x5ad   :  { %v10292_v2 = vpop.f32.mrf.mxu0 }
 0x5ae   :  { %v10325_v22 = vpop.f32.mrf.mxu1  ;;  %v2725_v18 = vadd.f32 %v2724_v32, %v2648_v16  ;;  %v3592_v2 = vunpack.c.0.s8 %v3591_v62 }
 0x5b4   :  { %v2807_v39 = vpop.f32.mrf.mxu0 }
 0x5b5   :  { %v2808_v49 = vadd.f32 %v2807_v39, %v2725_v18 }
 0x5b6   :  { %v10314_v56 = vpop.f32.mrf.mxu0 }
 0x5b7   :  { %v2883_v63 = vadd.f32 %v2882_v34, %v2808_v49  ;;  %v12594_v34 = vld [vmem:[%s14529_s17 + $0x8] sm:$0xff] }
 0x5b8   :  { %v2897_v39 = vrot.slane %v12594_v34, %v12272_v6  ;;  %v12604_v56 = vrot.slane %v12594_v34, %v12192_v37 }
 0x5b9   :  { %v2886_v9 = vmul.f32 %v2883_v63, %v2883_v63 }
 0x5bb   :  { %v2887_v24 = vsel %vm1701_vm5, %v2886_v9, 0.0 }
 0x5bc   :  { %2888 = vadd.xlane.f32.xlu1 %v2887_v24  ;;  %v3595_v24 = vsub.s32 %v3592_v2, %v12189_v4 }
 0x633   :  { %v10350_v30 = vpop.f32.mrf.mxu1 }
 0x635   :  { %v3111_v58 = vpop.f32.mrf.mxu1 }
 0x63b   :  { %v10336_v48 = vpop.f32.mrf.mxu0  ;;  %v10353_v15 = vpop.f32.mrf.mxu1 }
 0x63c   :  { %v3118_v47 = vadd.f32 %v10350_v30, %v10336_v48 }
 0x63d   :  { %v3123_v7 = vpop.f32.mrf.mxu1  ;;  %v2990_v31 = vpop.f32.mrf.mxu0 }
 0x63e   :  { %v3112_v35 = vadd.f32 %v3111_v58, %v2990_v31 }
 0x63f   :  { %v10378_v12 = vpop.f32.mrf.mxu1 }
 0x641   :  { %v3307_v33 = vpop.f32.mrf.mxu1 }
 0x643   :  { %v10339_v42 = vpop.f32.mrf.mxu0  ;;  %v10381_v44 = vpop.f32.mrf.mxu1 }
 0x644   :  { %v3130_v52 = vadd.f32 %v10353_v15, %v10339_v42 }
 0x645   :  { %v2889_v10 = vpop.xlane.xlu1 %2888  ;;  %v3010_v11 = vpop.f32.mrf.mxu0 }
 0x646   :  { %v2890_v40 = vmul.f32 0.03125, %v2889_v10  ;;  %v3124_v51 = vadd.f32 %v3123_v7, %v3010_v11  ;;  %v3323_v26 = vpop.f32.mrf.mxu1 }
 0x648   :  { %v2891_v8 = vadd.f32 1e-06, %v2890_v40 }
 0x649   :  { %v10364_v21 = vpop.f32.mrf.mxu0  ;;  %v10406_v60 = vpop.f32.mrf.mxu1 }
 0x64a   :  { %11351 = vrsqrt.f32 %v2891_v8  ;;  %v3217_v45 = vadd.f32 %v10364_v21, %v3118_v47 }
 0x64b   :  { %v3209_v23 = vpop.f32.mrf.mxu0  ;;  %v3507_v18 = vpop.f32.mrf.mxu1 }
 0x64c   :  { %v3316_v38 = vadd.f32 %v10378_v12, %v3217_v45  ;;  %v3210_v54 = vadd.f32 %v3209_v23, %v3112_v35 }
 0x64d   :  { %v10367_v46 = vpop.f32.mrf.mxu0 }
 0x64e   :  { %v3231_v28 = vadd.f32 %v10367_v46, %v3130_v52  ;;  %v3308_v59 = vadd.f32 %v3307_v33, %v3210_v54 }
 0x64f   :  { %v3223_v41 = vpop.f32.mrf.mxu0 }
 0x650   :  { %v3224_v32 = vadd.f32 %v3223_v41, %v3124_v51  ;;  %v12587_v57 = vadd.f32 %v10381_v44, %v3231_v28  ;;  %v10409_v44 = vpop.f32.mrf.mxu1 }
 0x651   :  { %v10392_v61 = vpop.f32.mrf.mxu0 }
 0x652   :  { %v3421_v27 = vadd.f32 %v10392_v61, %v3316_v38  ;;  %v12589_v36 = vadd.f32 %v3323_v26, %v3224_v32  ;;  %v3519_v45 = vpop.f32.mrf.mxu1 }
 0x653   :  { %v3414_v1 = vpop.f32.mrf.mxu0 }
 0x654   :  { %v12596_v22 = vadd.f32 %v10406_v60, %v3421_v27  ;;  %v3415_v16 = vadd.f32 %v3414_v1, %v3308_v59 }
 0x655   :  { %v10395_v51 = vpop.f32.mrf.mxu0 }
 0x656   :  { %v12600_v49 = vadd.f32 %v3507_v18, %v3415_v16  ;;  %v3433_v23 = vadd.f32 %v10395_v51, %v12587_v57  ;;  %v12652_v38 = vadd.f32 %v12604_v56, %v12596_v22 }
 0x657   :  { %v11352_v9 = vpop.eup %11351  ;;  %v3426_v8 = vpop.f32.mrf.mxu0 }
 0x658   :  { %v2893_v30 = vmul.f32 %v11352_v9, %v2883_v63  ;;  %v12609_v58 = vadd.f32 %v12604_v56, %v12600_v49  ;;  %v3427_v21 = vadd.f32 %v3426_v8, %v12589_v36  ;;  %v12654_v26 = vadd.f32 %v10409_v44, %v3433_v23  ;;  %v3881_v8 = vld [vmem:[%s14531_s19 + $0x10] sm:$0xff] }
 0x659   :  { %v3538_v46 = vmul.f32 %v12652_v38, %v12652_v38 }
 0x65a   :  { %v2898_v48 = vmul.f32 %v2897_v39, %v2893_v30  ;;  %v3537_v15 = vmul.f32 %v12609_v58, %v12609_v58  ;;  %v12648_v35 = vadd.f32 %v3519_v45, %v3427_v21  ;;  %v12667_v25 = vadd.f32 %v12604_v56, %v12654_v26 }
 0x65b   :  { %v3544_v28 = vsel %vm137_vm1, %v3538_v46, 0.0  ;;  %v12711_v45 = vand.u32 4294901760, %v3881_v8 }
 0x65c   :  { %v3596_v47 = vrot.slane %v2898_v48, %v3595_v24  ;;  %v3541_v7 = vsel %vm137_vm1, %v3537_v15, 0.0  ;;  %v12660_v54 = vadd.f32 %v12604_v56, %v12648_v35  ;;  %v3540_v32 = vmul.f32 %v12667_v25, %v12667_v25 }
 0x65d   :  { %3542 = vadd.xlane.f32.xlu0 %v3541_v7 }
 0x65e   :  { %v12614_v12 = vrot.slane %v3596_v47, %v3595_v24  ;;  %v3597_v63 = vcombine.high %v3596_v47, %v3596_v47  ;;  %v3539_v41 = vmul.f32 %v12660_v54, %v12660_v54  ;;  %v3550_v57 = vsel %vm137_vm1, %v3540_v32, 0.0 }
 0x660   :  { %v3621_v31 = vrot.slane %v12614_v12, %v12192_v37  ;;  %v12621_v42 = vrot.slane %v3597_v63, %v3595_v24  ;;  %v12628_v52 = vcombine.high %v12614_v12, %v12614_v12  ;;  %v3547_v62 = vsel %vm137_vm1, %v3539_v41, 0.0 }
 0x662   :  { %3646 = vrot.lane.b32.xlu1 %v3621_v31, %s11514_s18  ;;  %v3625_v33 = vrot.slane %v12621_v42, %v12192_v37  ;;  %v3629_v10 = vrot.slane %v12628_v52, %v12192_v37  ;;  %v12637_v11 = vcombine.high %v12621_v42, %v12621_v42 }
 0x664   :  { %v3633_v40 = vrot.slane %v12637_v11, %v12192_v37 }
 0x666   :  { %3682 = vrot.lane.b32.xlu1 %v3621_v31, %s11515_s23 }
 0x66a   :  { %3694 = vrot.lane.b32.xlu1 %v3621_v31, %s11516_s0 }
 0x66e   :  { %3706 = vrot.lane.b32.xlu1 %v3621_v31, %s11517_s7 }
 0x672   :  { %3636 = vrot.lane.b32.xlu1 %v3625_v33, %s11518_s30 }
 0x673   :  { %3634 = vrot.lane.b32.xlu0 %v3621_v31, %s11518_s30 }
 0x676   :  { %3648 = vrot.lane.b32.xlu1 %v3625_v33, %s11514_s18 }
 0x677   :  { %3658 = vrot.lane.b32.xlu0 %v3621_v31, %s11519_s3 }
 0x67a   :  { %3660 = vrot.lane.b32.xlu1 %v3625_v33, %s11519_s3 }
 0x67b   :  { %3670 = vrot.lane.b32.xlu0 %v3621_v31, %s11520_s25 }
 0x67e   :  { %3638 = vrot.lane.b32.xlu1 %v3629_v10, %s11518_s30 }
 0x67f   :  { %3672 = vrot.lane.b32.xlu0 %v3625_v33, %s11520_s25 }
 0x682   :  { %3650 = vrot.lane.b32.xlu1 %v3629_v10, %s11514_s18 }
 0x683   :  { %3684 = vrot.lane.b32.xlu0 %v3625_v33, %s11515_s23 }
 0x686   :  { %3662 = vrot.lane.b32.xlu1 %v3629_v10, %s11519_s3 }
 0x687   :  { %3696 = vrot.lane.b32.xlu0 %v3625_v33, %s11516_s0 }
 0x68a   :  { %3674 = vrot.lane.b32.xlu1 %v3629_v10, %s11520_s25 }
 0x68b   :  { %3708 = vrot.lane.b32.xlu0 %v3625_v33, %s11517_s7 }
 0x68e   :  { %3676 = vrot.lane.b32.xlu1 %v3633_v40, %s11520_s25 }
 0x68f   :  { %3686 = vrot.lane.b32.xlu0 %v3629_v10, %s11515_s23 }
 0x692   :  { %3688 = vrot.lane.b32.xlu1 %v3633_v40, %s11515_s23 }
 0x693   :  { %3698 = vrot.lane.b32.xlu0 %v3629_v10, %s11516_s0 }
 0x696   :  { %3700 = vrot.lane.b32.xlu1 %v3633_v40, %s11516_s0 }
 0x697   :  { %3710 = vrot.lane.b32.xlu0 %v3629_v10, %s11517_s7  ;;  %v3882_v10 = vld [vmem:[%s14531_s19 + $0x18] sm:$0xff] }
 0x69a   :  { %3712 = vrot.lane.b32.xlu1 %v3633_v40, %s11517_s7 }
 0x69b   :  { %3640 = vrot.lane.b32.xlu0 %v3633_v40, %s11518_s30  ;;  %s11528_s30 = smov 32  }
 0x69f   :  { %3652 = vrot.lane.b32.xlu0 %v3633_v40, %s11514_s18 }
 0x6a3   :  { %3664 = vrot.lane.b32.xlu0 %v3633_v40, %s11519_s3  ;;  %v12700_v40 = vand.u32 4294901760, %v3882_v10 }
 0x6a5   :  { %v12709_v21 = vsub.f32 %v3882_v10, %v12700_v40  ;;  %10410 = vmatprep.subr.mxu0 %v12700_v40 }
 0x6a6   :  { %10411 = vmatpush3.msra.mxu0 %v12700_v40 }
 0x6a7   :  { %v12725_v41 = vand.u32 4294901760, %v12709_v21  ;;  %10412 = vmatprep.subr.mxu0 %v12711_v45 }
 0x6a8   :  { %10413 = vmatpush3.msra.mxu0 %v12711_v45 }
 0x6be   :  { %3545 = vadd.xlane.f32.xlu1 %v3544_v28 }
 0x6c2   :  { %3548 = vadd.xlane.f32.xlu0 %v3547_v62  ;;  %v12728_v62 = vsub.f32 %v3881_v8, %v12711_v45 }
 0x6c6   :  { %3551 = vadd.xlane.f32.xlu0 %v3550_v57 }
 0x6d4   :  { %v3647_v60 = vpop.permute.xlu1 %3646 }
 0x6d8   :  { %v3683_v61 = vpop.permute.xlu1 %3682 }
 0x6dc   :  { %v3695_v27 = vpop.permute.xlu1 %3694 }
 0x6e0   :  { %v3707_v59 = vpop.permute.xlu1 %3706 }
 0x6e4   :  { %v3637_v36 = vpop.permute.xlu1 %3636 }
 0x6e5   :  { %v3720_v51 = vsel %vm3718_vm6, %v12621_v42, %v3637_v36  ;;  %v3880_v42 = vld [vmem:[%s14531_s19 + $0x8] sm:$0xff] }
 0x6e6   :  { %v12673_v1 = vpop.xlane.xlu0 %3542  ;;  %v12730_v32 = vand.u32 4294901760, %v3880_v42 }
 0x6e8   :  { %v3649_v2 = vpop.permute.xlu1 %3648  ;;  %v12743_v36 = vsub.f32 %v3880_v42, %v12730_v32  ;;  %10414 = vmatprep.subr.mxu0 %v12730_v32 }
 0x6e9   :  { %v3725_v44 = vsel %vm3723_vm7, %v3720_v51, %v3649_v2  ;;  %10415 = vmatpush3.msra.mxu0 %v12730_v32 }
 0x6ea   :  { %v3635_v16 = vpop.permute.xlu0 %3634 }
 0x6eb   :  { %v3719_v18 = vsel %vm3718_vm6, %v12614_v12, %v3635_v16 }
 0x6ec   :  { %v3661_v39 = vpop.permute.xlu1 %3660  ;;  %v3724_v9 = vsel %vm3723_vm7, %v3719_v18, %v3647_v60 }
 0x6ed   :  { %v3729_v23 = vsel %vm1212_vm3, %v3725_v44, %v3661_v39 }
 0x6ee   :  { %v3659_v56 = vpop.permute.xlu0 %3658 }
 0x6ef   :  { %v3728_v24 = vsel %vm1212_vm3, %v3724_v9, %v3659_v56 }
 0x6f0   :  { %v12680_v15 = vpop.permute.xlu1 %3638 }
 0x6f2   :  { %v3671_v30 = vpop.permute.xlu0 %3670 }
 0x6f3   :  { %v3733_v48 = vsel %vm3732_vm8, %v3728_v24, %v3671_v30  ;;  %v12758_v24 = vand.u32 4294901760, %v12743_v36 }
 0x6f4   :  { %v3738_v47 = vsel %vm3737_vm9, %v3733_v48, %v3683_v61  ;;  %v12691_v63 = vpop.permute.xlu1 %3650  ;;  %v3879_v61 = vld [vmem:[%s14531_s19] sm:$0xff]  ;;  %s11527_s19 = smov 28  }
 0x6f5   :  { %v3743_v7 = vsel %vm3742_vm10, %v3738_v47, %v3695_v27  ;;  %v4032_v27 = vsub.f32 %v12709_v21, %v12725_v41  ;;  %v12745_v2 = vand.u32 4294901760, %v3879_v61  ;;  %v4046_v47 = vsub.f32 %v12743_v36, %v12758_v24 }
 0x6f6   :  { %v12685_v12 = vsel %vm3747_vm11, %v3743_v7, %v3707_v59  ;;  %v3673_v31 = vpop.permute.xlu0 %3672  ;;  %v12740_v59 = vand.u32 4294901760, %v12728_v62 }
 0x6f7   :  { %3768 = vrot.lane.b32.xlu1 %v12685_v12, %s11521_s8  ;;  %3756 = vrot.lane.b32.xlu0 %v12685_v12, %s11522_s4  ;;  %v3734_v28 = vsel %vm3732_vm8, %v3729_v23, %v3673_v31  ;;  %v4033_v56 = vand.u32 4294901760, %v4032_v27  ;;  %v12764_v30 = vsub.f32 %v3879_v61, %v12745_v2  ;;  %v4047_v10 = vand.u32 4294901760, %v4046_v47 }
 0x6f8   :  { %v3663_v57 = vpop.permute.xlu1 %3662  ;;  %v4039_v9 = vsub.f32 %v12728_v62, %v12740_v59  ;;  %10416 = vmatprep.subr.mxu0 %v12745_v2  ;;  %v3721_v23 = vsel %vm3718_vm6, %v12628_v52, %v12680_v15 }
 0x6f9   :  { %10424 = vmatprep.subr.mxu1 %v4033_v56  ;;  %10417 = vmatpush3.msra.mxu0 %v12745_v2  ;;  %v3726_v42 = vsel %vm3723_vm7, %v3721_v23, %v12691_v63 }
 0x6fa   :  { %v3685_v33 = vpop.permute.xlu0 %3684  ;;  %v4040_v48 = vand.u32 4294901760, %v4039_v9  ;;  %10425 = vmatpush3.msra.mxu1 %v4033_v56  ;;  %10438 = vmatprep.subr.mxu0 %v12709_v21 }
 0x6fb   :  { %3804 = vrot.lane.b32.xlu1 %v12685_v12, %s11523_s27  ;;  %3780 = vrot.lane.b32.xlu0 %v12685_v12, %s11524_s9  ;;  %v3739_v60 = vsel %vm3737_vm9, %v3734_v28, %v3685_v33  ;;  %v12771_v33 = vand.u32 4294901760, %v12764_v30  ;;  %v3730_v28 = vsel %vm1212_vm3, %v3726_v42, %v3663_v57 }
 0x6fc   :  { %v3675_v7 = vpop.permute.xlu1 %3674  ;;  %10426 = vmatprep.subr.mxu1 %v4040_v48 }
 0x6fd   :  { %10427 = vmatpush3.msra.mxu1 %v4040_v48  ;;  %v4053_v51 = vsub.f32 %v12764_v30, %v12771_v33  ;;  %v3735_v61 = vsel %vm3732_vm8, %v3730_v28, %v3675_v7 }
 0x6fe   :  { %v3697_v46 = vpop.permute.xlu0 %3696  ;;  %10428 = vmatprep.subr.mxu1 %v4047_v10 }
 0x6ff   :  { %3816 = vrot.lane.b32.xlu1 %v12685_v12, %s11525_s11  ;;  %3792 = vrot.lane.b32.xlu0 %v12685_v12, %s11526_s29  ;;  %v3744_v16 = vsel %vm3742_vm10, %v3739_v60, %v3697_v46  ;;  %v4054_v44 = vand.u32 4294901760, %v4053_v51 }
 0x700   :  { %10429 = vmatpush3.msra.mxu1 %v4047_v10  ;;  %v3677_v46 = vpop.permute.xlu1 %3676 }
 0x701   :  { %10430 = vmatprep.subr.mxu1 %v4054_v44 }
 0x702   :  { %v3709_v18 = vpop.permute.xlu0 %3708  ;;  %10431 = vmatpush3.msra.mxu1 %v4054_v44 }
 0x703   :  { %v12751_v39 = vsel %vm3747_vm11, %v3744_v16, %v3709_v18  ;;  %3828 = vrot.lane.b32.xlu1 %v12685_v12, %s11527_s19  ;;  %10452 = vmatprep.subr.mxu1 %v12700_v40 }
 0x704   :  { %3794 = vrot.lane.b32.xlu0 %v12751_v39, %s11526_s29  ;;  %v3689_v27 = vpop.permute.xlu1 %3688 }
 0x706   :  { %v3687_v31 = vpop.permute.xlu0 %3686 }
 0x707   :  { %3758 = vrot.lane.b32.xlu1 %v12751_v39, %s11522_s4  ;;  %v3740_v52 = vsel %vm3737_vm9, %v3735_v61, %v3687_v31 }
 0x708   :  { %3806 = vrot.lane.b32.xlu0 %v12751_v39, %s11523_s27  ;;  %v3701_v18 = vpop.permute.xlu1 %3700 }
 0x70a   :  { %v3699_v8 = vpop.permute.xlu0 %3698 }
 0x70b   :  { %3770 = vrot.lane.b32.xlu1 %v12751_v39, %s11521_s8  ;;  %v3745_v15 = vsel %vm3742_vm10, %v3740_v52, %v3699_v8 }
 0x70c   :  { %3818 = vrot.lane.b32.xlu0 %v12751_v39, %s11525_s11  ;;  %v3713_v10 = vpop.permute.xlu1 %3712 }
 0x70e   :  { %v3711_v60 = vpop.permute.xlu0 %3710 }
 0x70f   :  { %3782 = vrot.lane.b32.xlu1 %v12751_v39, %s11524_s9  ;;  %v12799_v63 = vsel %vm3747_vm11, %v3745_v15, %v3711_v60 }
 0x710   :  { %3830 = vrot.lane.b32.xlu0 %v12751_v39, %s11527_s19 }
 0x712   :  { %v3641_v57 = vpop.permute.xlu0 %3640 }
 0x713   :  { %3760 = vrot.lane.b32.xlu1 %v12799_v63, %s11522_s4  ;;  %v3722_v56 = vsel %vm3718_vm6, %v12637_v11, %v3641_v57  ;;  %v3553_v11 = vmul.f32 0.03125, %v12673_v1  ;;  %vm5812_vm6 = vcmask 1041409  }
 0x714   :  { %3808 = vrot.lane.b32.xlu0 %v12799_v63, %s11523_s27 }
 0x715   :  { %v3557_v44 = vadd.f32 1e-06, %v3553_v11 }
 0x716   :  { %v3653_v16 = vpop.permute.xlu0 %3652 }
 0x717   :  { %3772 = vrot.lane.b32.xlu1 %v12799_v63, %s11521_s8  ;;  %v3727_v9 = vsel %vm3723_vm7, %v3722_v56, %v3653_v16  ;;  %11353 = vrsqrt.f32 %v3557_v44  ;;  %vm5815_vm7 = vcmask 1042434  }
 0x718   :  { %3820 = vrot.lane.b32.xlu0 %v12799_v63, %s11525_s11 }
 0x71a   :  { %v3665_v48 = vpop.permute.xlu0 %3664 }
 0x71b   :  { %v3731_v47 = vsel %vm1212_vm3, %v3727_v9, %v3665_v48  ;;  %3784 = vrot.lane.b32.xlu1 %v12799_v63, %s11524_s9  ;;  %vm3865_vm3 = vcmask 195584  }
 0x71c   :  { %v3736_v7 = vsel %vm3732_vm8, %v3731_v47, %v3677_v46  ;;  %vm5818_vm8 = vcmask 1043459  }
 0x71d   :  { %v3741_v31 = vsel %vm3737_vm9, %v3736_v7, %v3689_v27 }
 0x71e   :  { %v3746_v51 = vsel %vm3742_vm10, %v3741_v31, %v3701_v18  ;;  %v12846_v18 = vrot.slane %v12594_v34, %v2314_v17 }
 0x71f   :  { %v12819_v8 = vsel %vm3747_vm11, %v3746_v51, %v3713_v10  ;;  %3796 = vrot.lane.b32.xlu1 %v12799_v63, %s11526_s29 }
 0x720   :  { %3762 = vrot.lane.b32.xlu0 %v12819_v8, %s11522_s4 }
 0x723   :  { %3798 = vrot.lane.b32.xlu1 %v12819_v8, %s11526_s29 }
 0x724   :  { %3774 = vrot.lane.b32.xlu0 %v12819_v8, %s11521_s8  ;;  %v11354_v16 = vpop.eup %11353 }
 0x727   :  { %3810 = vrot.lane.b32.xlu1 %v12819_v8, %s11523_s27 }
 0x728   :  { %3786 = vrot.lane.b32.xlu0 %v12819_v8, %s11524_s9 }
 0x72b   :  { %3822 = vrot.lane.b32.xlu1 %v12819_v8, %s11525_s11 }
 0x72c   :  { %3832 = vrot.lane.b32.xlu0 %v12799_v63, %s11527_s19 }
 0x72f   :  { %3834 = vrot.lane.b32.xlu1 %v12819_v8, %s11527_s19 }
 0x747   :  { %v3546_v46 = vpop.xlane.xlu1 %3545 }
 0x748   :  { %v3554_v28 = vmul.f32 0.03125, %v3546_v46 }
 0x74a   :  { %v3558_v52 = vadd.f32 1e-06, %v3554_v28 }
 0x74b   :  { %v3549_v23 = vpop.xlane.xlu0 %3548 }
 0x74c   :  { %11355 = vrsqrt.f32 %v3558_v52 }
 0x74f   :  { %v3552_v42 = vpop.xlane.xlu0 %3551 }
 0x769   :  { %v3769_v60 = vpop.permute.xlu1 %3768  ;;  %v3757_v61 = vpop.permute.xlu0 %3756 }
 0x76a   :  { %v3841_v15 = vsel %vm3840_vm12, %v12685_v12, %v3757_v61  ;;  %v3565_v12 = vmul.f32 %v11354_v16, %v12609_v58 }
 0x76b   :  { %v3846_v1 = vsel %vm3845_vm13, %v3841_v15, %v3769_v60  ;;  %v11356_v15 = vpop.eup %11355 }
 0x76c   :  { %v3573_v10 = vmul.f32 %v12846_v18, %v3565_v12  ;;  %v3555_v12 = vmul.f32 0.03125, %v3549_v23 }
 0x76d   :  { %v3805_v27 = vpop.permute.xlu1 %3804  ;;  %v3781_v57 = vpop.permute.xlu0 %3780 }
 0x76e   :  { %v3851_v56 = vsel %vm3850_vm14, %v3846_v1, %v3781_v57 }
 0x771   :  { %v3817_v9 = vpop.permute.xlu1 %3816  ;;  %v3793_v48 = vpop.permute.xlu0 %3792 }
 0x772   :  { %v3856_v47 = vsel %vm3855_vm15, %v3851_v56, %v3793_v48  ;;  %v3566_v48 = vmul.f32 %v11356_v15, %v12652_v38 }
 0x773   :  { %v3861_v7 = vsel %vm3860_vm2, %v3856_v47, %v3805_v27 }
 0x774   :  { %v3866_v31 = vsel %vm3865_vm3, %v3861_v7, %v3817_v9 }
 0x775   :  { %v3829_v51 = vpop.permute.xlu1 %3828 }
 0x776   :  { %v3871_v17 = vsel %vm3870_vm4, %v3866_v31, %v3829_v51  ;;  %v3795_v11 = vpop.permute.xlu0 %3794 }
 0x777   :  { %v3875_v44 = vmul.f32 %v3871_v17, %v3573_v10  ;;  %v3574_v17 = vmul.f32 %v12846_v18, %v3566_v48 }
 0x779   :  { %v3884_v46 = vsel %vm137_vm1, %v3875_v44, 0  ;;  %v3759_v28 = vpop.permute.xlu1 %3758 }
 0x77a   :  { %v12856_v60 = vand.u32 4294901760, %v3884_v46  ;;  %v3807_v58 = vpop.permute.xlu0 %3806  ;;  %v3842_v16 = vsel %vm3840_vm12, %v12751_v39, %v3759_v28  ;;  %v3556_v39 = vmul.f32 0.03125, %v3552_v42  ;;  %v3559_v28 = vadd.f32 1e-06, %v3555_v12 }
 0x77c   :  { %v12859_v61 = vsub.f32 %v3884_v46, %v12856_v60  ;;  %10432 = vmatprep.mubr.f32.mxu1 %v12856_v60  ;;  %v3560_v15 = vadd.f32 1e-06, %v3556_v39  ;;  %11357 = vrsqrt.f32 %v3559_v28 }
 0x77d   :  { %v3771_v52 = vpop.permute.xlu1 %3770 }
 0x77e   :  { %v3819_v27 = vpop.permute.xlu0 %3818  ;;  %v3966_v57 = vand.u32 4294901760, %v12859_v61  ;;  %v3847_v56 = vsel %vm3845_vm13, %v3842_v16, %v3771_v52  ;;  %11359 = vrsqrt.f32 %v3560_v15 }
 0x780   :  { %v3967_v1 = vsub.f32 %v12859_v61, %v3966_v57 }
 0x781   :  { %v3783_v9 = vpop.permute.xlu1 %3782 }
 0x782   :  { %v3852_v47 = vsel %vm3850_vm14, %v3847_v56, %v3783_v9  ;;  %v3831_v7 = vpop.permute.xlu0 %3830  ;;  %v3968_v31 = vand.u32 4294901760, %v3967_v1 }
 0x783   :  { %v3857_v10 = vsel %vm3855_vm15, %v3852_v47, %v3795_v11 }
 0x784   :  { %v3862_v51 = vsel %vm3860_vm2, %v3857_v10, %v3807_v58  ;;  %10418 = vmatprep.mubr.f32.mxu0 %v3968_v31 }
 0x785   :  { %v3867_v44 = vsel %vm3865_vm3, %v3862_v51, %v3819_v27  ;;  %v3761_v46 = vpop.permute.xlu1 %3760 }
 0x786   :  { %v3872_v52 = vsel %vm3870_vm4, %v3867_v44, %v3831_v7  ;;  %v3809_v23 = vpop.permute.xlu0 %3808  ;;  %v3843_v7 = vsel %vm3840_vm12, %v12799_v63, %v3761_v46 }
 0x787   :  { %v3876_v38 = vmul.f32 %v3872_v52, %v3574_v17 }
 0x789   :  { %v3887_v16 = vsel %vm137_vm1, %v3876_v38, 0  ;;  %v3773_v1 = vpop.permute.xlu1 %3772  ;;  %v11358_v39 = vpop.eup %11357 }
 0x78a   :  { %v12877_v11 = vand.u32 4294901760, %v3887_v16  ;;  %v3821_v56 = vpop.permute.xlu0 %3820  ;;  %v3848_v10 = vsel %vm3845_vm13, %v3843_v7, %v3773_v1  ;;  %v3567_v38 = vmul.f32 %v11358_v39, %v12660_v54 }
 0x78c   :  { %v12880_v58 = vsub.f32 %v3887_v16, %v12877_v11  ;;  %10433 = vmatmul.mubr.f32.vlgmr.msra.gmra.mxu1 %v12877_v11 }
 0x78d   :  { %v3785_v42 = vpop.permute.xlu1 %3784  ;;  %10453 = vmatpush3.msra.mxu1 %v12700_v40 }
 0x78e   :  { %v3976_v27 = vand.u32 4294901760, %v12880_v58  ;;  %10454 = vmatprep.subr.mxu1 %v12711_v45  ;;  %v3853_v17 = vsel %vm3850_vm14, %v3848_v10, %v3785_v42  ;;  %v3575_v42 = vmul.f32 %v12846_v18, %v3567_v38 }
 0x78f   :  { %10455 = vmatpush3.msra.mxu1 %v12711_v45 }
 0x790   :  { %v3977_v9 = vsub.f32 %v12880_v58, %v3976_v27  ;;  %10456 = vmatprep.subr.mxu1 %v12730_v32 }
 0x791   :  { %v3797_v48 = vpop.permute.xlu1 %3796  ;;  %10457 = vmatpush3.msra.mxu1 %v12730_v32 }
 0x792   :  { %v3978_v12 = vand.u32 4294901760, %v3977_v9  ;;  %v3763_v47 = vpop.permute.xlu0 %3762  ;;  %10458 = vmatprep.subr.mxu1 %v12745_v2  ;;  %v3858_v44 = vsel %vm3855_vm15, %v3853_v17, %v3797_v48 }
 0x793   :  { %10459 = vmatpush3.msra.mxu1 %v12745_v2  ;;  %v3844_v63 = vsel %vm3840_vm12, %v12819_v8, %v3763_v47 }
 0x794   :  { %10419 = vmatmul.mubr.f32.vlgmr.msra.gmra.mxu0 %v3978_v12  ;;  %10480 = vmatprep.subr.mxu1 %v12700_v40 }
 0x795   :  { %v3799_v31 = vpop.permute.xlu1 %3798  ;;  %10439 = vmatpush3.msra.mxu0 %v12709_v21  ;;  %v11360_v21 = vpop.eup %11359 }
 0x796   :  { %v3775_v51 = vpop.permute.xlu0 %3774  ;;  %10440 = vmatprep.subr.mxu0 %v12728_v62 }
 0x797   :  { %10441 = vmatpush3.msra.mxu0 %v12728_v62  ;;  %v3849_v28 = vsel %vm3845_vm13, %v3844_v63, %v3775_v51  ;;  %v3863_v62 = vsel %vm3860_vm2, %v3858_v44, %v3809_v23 }
 0x798   :  { %10442 = vmatprep.subr.mxu0 %v12743_v36  ;;  %v3868_v54 = vsel %vm3865_vm3, %v3863_v62, %v3821_v56 }
 0x799   :  { %v3811_v46 = vpop.permute.xlu1 %3810  ;;  %10443 = vmatpush3.msra.mxu0 %v12743_v36  ;;  %v3568_v36 = vmul.f32 %v11360_v21, %v12667_v25 }
 0x79a   :  { %v3787_v52 = vpop.permute.xlu0 %3786  ;;  %10444 = vmatprep.subr.mxu0 %v12764_v30 }
 0x79b   :  { %v3854_v15 = vsel %vm3850_vm14, %v3849_v28, %v3787_v52  ;;  %10445 = vmatpush3.msra.mxu0 %v12764_v30  ;;  %v3576_v47 = vmul.f32 %v12846_v18, %v3568_v36 }
 0x79c   :  { %v3859_v16 = vsel %vm3855_vm15, %v3854_v15, %v3799_v31  ;;  %10466 = vmatprep.subr.mxu0 %v12725_v41 }
 0x79d   :  { %v3823_v8 = vpop.permute.xlu1 %3822  ;;  %v3864_v1 = vsel %vm3860_vm2, %v3859_v16, %v3811_v46 }
 0x79e   :  { %v3833_v9 = vpop.permute.xlu0 %3832  ;;  %v3869_v12 = vsel %vm3865_vm3, %v3864_v1, %v3823_v8 }
 0x79f   :  { %v3873_v23 = vsel %vm3870_vm4, %v3868_v54, %v3833_v9 }
 0x7a0   :  { %v3877_v48 = vmul.f32 %v3873_v23, %v3575_v42 }
 0x7a1   :  { %v3835_v30 = vpop.permute.xlu1 %3834 }
 0x7a2   :  { %v3890_v7 = vsel %vm137_vm1, %v3877_v48, 0  ;;  %v3874_v31 = vsel %vm3870_vm4, %v3869_v12, %v3835_v30 }
 0x7a3   :  { %v3984_v25 = vand.u32 4294901760, %v3890_v7  ;;  %v3878_v10 = vmul.f32 %v3874_v31, %v3576_v47 }
 0x7a5   :  { %v3985_v51 = vsub.f32 %v3890_v7, %v3984_v25  ;;  %v3893_v39 = vsel %vm137_vm1, %v3878_v10, 0  ;;  %10435 = vmatprep.mubr.f32.mxu1 %v3984_v25 }
 0x7a6   :  { %v3994_v56 = vand.u32 4294901760, %v3893_v39 }
 0x7a7   :  { %v3986_v17 = vand.u32 4294901760, %v3985_v51 }
 0x7a8   :  { %v3995_v44 = vsub.f32 %v3893_v39, %v3994_v56  ;;  %10436 = vmatmul.mubr.f32.gmra.mxu1 %v3994_v56 }
 0x7a9   :  { %10460 = vmatprep.mubr.f32.mxu1 %v3966_v57  ;;  %v3987_v63 = vsub.f32 %v3985_v51, %v3986_v17 }
 0x7aa   :  { %v3996_v46 = vand.u32 4294901760, %v3995_v44 }
 0x7ab   :  { %v3988_v18 = vand.u32 4294901760, %v3987_v63 }
 0x7ac   :  { %10461 = vmatmul.mubr.f32.vlgmr.msra.gmra.mxu1 %v3976_v27  ;;  %v3997_v21 = vsub.f32 %v3995_v44, %v3996_v46 }
 0x7ad   :  { %10421 = vmatprep.mubr.f32.mxu0 %v3988_v18  ;;  %10463 = vmatprep.mubr.f32.mxu1 %v3986_v17 }
 0x7ae   :  { %10481 = vmatpush3.msra.mxu1 %v12700_v40  ;;  %v3998_v28 = vand.u32 4294901760, %v3997_v21 }
 0x7af   :  { %10482 = vmatprep.subr.mxu1 %v12711_v45 }
 0x7b0   :  { %10483 = vmatpush3.msra.mxu1 %v12711_v45  ;;  %10422 = vmatmul.mubr.f32.gmra.mxu0 %v3998_v28 }
 0x7b1   :  { %10464 = vmatmul.mubr.f32.gmra.mxu1 %v3996_v46  ;;  %10484 = vmatprep.subr.mxu1 %v12730_v32 }
 0x7b2   :  { %10446 = vmatprep.mubr.f32.mxu0 %v12859_v61  ;;  %10485 = vmatpush3.msra.mxu1 %v12730_v32 }
 0x7b3   :  { %10488 = vmatprep.mubr.f32.mxu1 %v12856_v60  ;;  %10486 = vmatprep.subr.mxu1 %v12745_v2 }
 0x7b4   :  { %10487 = vmatpush3.msra.mxu1 %v12745_v2  ;;  %10447 = vmatmul.mubr.f32.vlgmr.msra.gmra.mxu0 %v12880_v58 }
 0x7b5   :  { %10467 = vmatpush3.msra.mxu0 %v12725_v41  ;;  %10489 = vmatmul.mubr.f32.vlgmr.msra.gmra.mxu1 %v12877_v11 }
 0x7b6   :  { %10449 = vmatprep.mubr.f32.mxu0 %v3985_v51  ;;  %10468 = vmatprep.subr.mxu0 %v12740_v59 }
 0x7b7   :  { %10491 = vmatprep.mubr.f32.mxu1 %v3984_v25  ;;  %10469 = vmatpush3.msra.mxu0 %v12740_v59 }
 0x7b8   :  { %10470 = vmatprep.subr.mxu0 %v12758_v24  ;;  %10450 = vmatmul.mubr.f32.gmra.mxu0 %v3995_v44 }
 0x7b9   :  { %10471 = vmatpush3.msra.mxu0 %v12758_v24  ;;  %10492 = vmatmul.mubr.f32.gmra.mxu1 %v3994_v56 }
 0x7ba   :  { %10472 = vmatprep.subr.mxu0 %v12771_v33  ;;  %10474 = vmatprep.mubr.f32.mxu0 %v12856_v60 }
 0x7bb   :  { %10473 = vmatpush3.msra.mxu0 %v12771_v33 }
 0x7bc   :  { %10475 = vmatmul.mubr.f32.vlgmr.msra.gmra.mxu0 %v12877_v11 }
 0x7bd   :  { %10477 = vmatprep.mubr.f32.mxu0 %v3984_v25 }
 0x7c0   :  { %10478 = vmatmul.mubr.f32.gmra.mxu0 %v3994_v56 }
 0x84c   :  { %v10434_v40 = vpop.f32.mrf.mxu1 }
 0x84e   :  { %v4091_v45 = vpop.f32.mrf.mxu1 }
 0x854   :  { %v10420_v32 = vpop.f32.mrf.mxu0 }
 0x855   :  { %v4098_v60 = vadd.f32 %v10434_v40, %v10420_v32 }
 0x856   :  { %v3970_v61 = vpop.f32.mrf.mxu0 }
 0x857   :  { %v4092_v33 = vadd.f32 %v4091_v45, %v3970_v61 }
 0x868   :  { %v10437_v41 = vpop.f32.mrf.mxu1 }
 0x86a   :  { %v4103_v59 = vpop.f32.mrf.mxu1 }
 0x86c   :  { %v10462_v2 = vpop.f32.mrf.mxu1 }
 0x86e   :  { %v4287_v57 = vpop.f32.mrf.mxu1 }
 0x870   :  { %v10423_v24 = vpop.f32.mrf.mxu0 }
 0x871   :  { %v10465_v58 = vpop.f32.mrf.mxu1  ;;  %v4110_v8 = vadd.f32 %v10437_v41, %v10423_v24 }
 0x872   :  { %v3990_v27 = vpop.f32.mrf.mxu0 }
 0x873   :  { %v4303_v52 = vpop.f32.mrf.mxu1  ;;  %v4104_v42 = vadd.f32 %v4103_v59, %v3990_v27 }
 0x874   :  { %v10448_v38 = vpop.f32.mrf.mxu0 }
 0x875   :  { %v4197_v15 = vadd.f32 %v10448_v38, %v4098_v60  ;;  %v10490_v11 = vpop.f32.mrf.mxu1 }
 0x876   :  { %v4189_v62 = vpop.f32.mrf.mxu0 }
 0x877   :  { %v4190_v36 = vadd.f32 %v4189_v62, %v4092_v33  ;;  %v4296_v9 = vadd.f32 %v10462_v2, %v4197_v15  ;;  %v4487_v23 = vpop.f32.mrf.mxu1 }
 0x878   :  { %v10451_v16 = vpop.f32.mrf.mxu0 }
 0x879   :  { %v4211_v54 = vadd.f32 %v10451_v16, %v4110_v8  ;;  %v4288_v47 = vadd.f32 %v4287_v57, %v4190_v36  ;;  %v10493_v51 = vpop.f32.mrf.mxu1 }
 0x87a   :  { %v4203_v1 = vpop.f32.mrf.mxu0 }
 0x87b   :  { %v4204_v12 = vadd.f32 %v4203_v1, %v4104_v42  ;;  %v4312_v10 = vadd.f32 %v10465_v58, %v4211_v54  ;;  %v4499_v40 = vpop.f32.mrf.mxu1 }
 0x87c   :  { %v10476_v48 = vpop.f32.mrf.mxu0 }
 0x87d   :  { %v4401_v30 = vadd.f32 %v10476_v48, %v4296_v9  ;;  %v4304_v44 = vadd.f32 %v4303_v52, %v4204_v12 }
 0x87e   :  { %v4394_v7 = vpop.f32.mrf.mxu0 }
 0x87f   :  { %v4494_v31 = vadd.f32 %v10490_v11, %v4401_v30  ;;  %v4395_v25 = vadd.f32 %v4394_v7, %v4288_v47  ;;  %v3580_v30 = vrot.slane %v12594_v34, %v12259_v53  ;;  %v4569_v47 = vld [vmem:[%s14532_s20] sm:$0xff] }
 0x880   :  { %v10479_v39 = vpop.f32.mrf.mxu0  ;;  %v12966_v7 = vand.u32 4294901760, %v4569_v47 }
 0x881   :  { %v4488_v56 = vadd.f32 %v4487_v23, %v4395_v25  ;;  %v4413_v17 = vadd.f32 %v10479_v39, %v4312_v10  ;;  %v4510_v63 = vmul.f32 0.5, %v4494_v31 }
 0x882   :  { %v4406_v46 = vpop.f32.mrf.mxu0  ;;  %v12969_v31 = vsub.f32 %v4569_v47, %v12966_v7  ;;  %10494 = vmatprep.subr.mxu0 %v12966_v7 }
 0x883   :  { %v4407_v18 = vadd.f32 %v4406_v46, %v4304_v44  ;;  %v4516_v21 = vsel %vm3845_vm13, %v4510_v63, -inf  ;;  %v4509_v28 = vmul.f32 0.5, %v4488_v56  ;;  %v4506_v45 = vadd.f32 %v10493_v51, %v4413_v17  ;;  %10495 = vmatpush3.msra.mxu0 %v12966_v7 }
 0x884   :  { %4517 = vmax.xlane.f32.xlu1 %v4516_v21  ;;  %v12974_v25 = vand.u32 4294901760, %v12969_v31  ;;  %10510 = vmatprep.subr.mxu0 %v12969_v31 }
 0x885   :  { %v4500_v41 = vadd.f32 %v4499_v40, %v4407_v18  ;;  %v4513_v32 = vsel %vm3845_vm13, %v4509_v28, -inf  ;;  %v4512_v61 = vmul.f32 0.5, %v4506_v45 }
 0x886   :  { %4514 = vmax.xlane.f32.xlu0 %v4513_v32  ;;  %v4722_v34 = vsub.f32 %v12969_v31, %v12974_v25 }
 0x887   :  { %v4511_v59 = vmul.f32 0.5, %v4500_v41  ;;  %v4522_v57 = vsel %vm3845_vm13, %v4512_v61, -inf }
 0x888   :  { %v4723_v10 = vand.u32 4294901760, %v4722_v34 }
 0x889   :  { %v4519_v2 = vsel %vm3845_vm13, %v4511_v59, -inf }
 0x88a   :  { %4520 = vmax.xlane.f32.xlu0 %v4519_v2  ;;  %10502 = vmatprep.subr.mxu1 %v4723_v10 }
 0x88b   :  { %10503 = vmatpush3.msra.mxu1 %v4723_v10 }
 0x88c   :  { %10518 = vmatprep.subr.mxu1 %v12966_v7 }
 0x88e   :  { %4523 = vmax.xlane.f32.xlu0 %v4522_v57 }
 0x90d   :  { %v4518_v24 = vpop.xlane.xlu1 %4517 }
 0x90e   :  { %v4526_v58 = vsub.f32 %v4510_v63, %v4518_v24 }
 0x90f   :  { %v4515_v27 = vpop.xlane.xlu0 %4514 }
 0x910   :  { %v4531_v52 = vmul.f32 1.442695, %v4526_v58  ;;  %v4525_v38 = vsub.f32 %v4509_v28, %v4515_v27 }
 0x912   :  { %11361 = vpow2.f32 %v4531_v52  ;;  %v4529_v60 = vmul.f32 1.442695, %v4525_v38 }
 0x913   :  { %v4521_v62 = vpop.xlane.xlu0 %4520 }
 0x914   :  { %11363 = vpow2.f32 %v4529_v60  ;;  %v4527_v33 = vsub.f32 %v4511_v59, %v4521_v62 }
 0x916   :  { %v4533_v15 = vmul.f32 1.442695, %v4527_v33 }
 0x917   :  { %v4524_v11 = vpop.xlane.xlu0 %4523 }
 0x918   :  { %11365 = vpow2.f32 %v4533_v15  ;;  %v4528_v16 = vsub.f32 %v4512_v61, %v4524_v11 }
 0x91a   :  { %v4535_v8 = vmul.f32 1.442695, %v4528_v16 }
 0x91c   :  { %11367 = vpow2.f32 %v4535_v8 }
 0x91f   :  { %v11362_v36 = vpop.eup %11361 }
 0x920   :  { %v4540_v1 = vsel %vm3845_vm13, %v11362_v36, 0.0 }
 0x921   :  { %v11364_v42 = vpop.eup %11363  ;;  %4541 = vadd.xlane.f32.xlu1 %v4540_v1 }
 0x922   :  { %v4537_v54 = vsel %vm3845_vm13, %v11364_v42, 0.0 }
 0x923   :  { %4538 = vadd.xlane.f32.xlu0 %v4537_v54 }
 0x925   :  { %v11366_v9 = vpop.eup %11365 }
 0x926   :  { %v4543_v23 = vsel %vm3845_vm13, %v11366_v9, 0.0 }
 0x927   :  { %4544 = vadd.xlane.f32.xlu0 %v4543_v23 }
 0x929   :  { %v12956_v48 = vpop.eup %11367 }
 0x92a   :  { %v4546_v12 = vsel %vm3845_vm13, %v12956_v48, 0.0 }
 0x92b   :  { %4547 = vadd.xlane.f32.xlu1 %v4546_v12 }
 0x93d   :  { %3582 = vrot.lane.b32.xlu0 %v3580_v30, %s11528_s30 }
 0x9aa   :  { %v4542_v51 = vpop.xlane.xlu1 %4541 }
 0x9ab   :  { %11369 = vrcp.f32 %v4542_v51 }
 0x9ac   :  { %v4539_v39 = vpop.xlane.xlu0 %4538 }
 0x9ad   :  { %11371 = vrcp.f32 %v4539_v39 }
 0x9b0   :  { %v4545_v56 = vpop.xlane.xlu0 %4544 }
 0x9b1   :  { %11373 = vrcp.f32 %v4545_v56 }
 0x9b4   :  { %v4548_v17 = vpop.xlane.xlu1 %4547  ;;  %v3583_v44 = vpop.permute.xlu0 %3582 }
 0x9b5   :  { %11375 = vrcp.f32 %v4548_v17  ;;  %v3588_v63 = vadd.f32 %v3583_v44, %v12654_v26  ;;  %v3585_v46 = vadd.f32 %v3583_v44, %v12600_v49  ;;  %v3586_v28 = vadd.f32 %v3583_v44, %v12596_v22 }
 0x9b6   :  { %v3587_v2 = vadd.f32 %v3583_v44, %v12648_v35 }
 0x9b7   :  { %5167 = vrot.lane.b32.xlu0 %v3588_v63, %s11512_s1  ;;  %5161 = vrot.lane.b32.xlu1 %v3585_v46, %s11512_s1 }
 0x9b8   :  { %v11370_v18 = vpop.eup %11369 }
 0x9b9   :  { %v4554_v21 = vmul.f32 %v11370_v18, %v4542_v51 }
 0x9ba   :  { %v11372_v40 = vpop.eup %11371 }
 0x9bb   :  { %v4558_v45 = vsub.f32 2.0, %v4554_v21  ;;  %v4553_v41 = vmul.f32 %v11372_v40, %v4539_v39  ;;  %5163 = vrot.lane.b32.xlu1 %v3586_v28, %s11512_s1  ;;  %v5178_v28 = vld [vmem:[%s14533_s21 + $0x8] sm:$0xff] }
 0x9bd   :  { %v4562_v32 = vmul.f32 %v11370_v18, %v4558_v45  ;;  %v4557_v59 = vsub.f32 2.0, %v4553_v41  ;;  %v5179_v18 = vld [vmem:[%s14533_s21 + $0x10] sm:$0xff]  ;;  %v13023_v41 = vand.u32 4294901760, %v5178_v28 }
 0x9be   :  { %v11374_v26 = vpop.eup %11373  ;;  %v13010_v21 = vand.u32 4294901760, %v5179_v18 }
 0x9bf   :  { %v4566_v61 = vmul.f32 %v11362_v36, %v4562_v32  ;;  %v4561_v49 = vmul.f32 %v11372_v40, %v4557_v59  ;;  %v4555_v57 = vmul.f32 %v11374_v26, %v4545_v56  ;;  %5165 = vrot.lane.b32.xlu1 %v3587_v2, %s11512_s1  ;;  %v5177_v32 = vld [vmem:[%s14533_s21] sm:$0xff] }
 0x9c0   :  { %v13021_v45 = vsub.f32 %v5179_v18, %v13010_v21 }
 0x9c1   :  { %v4574_v24 = vsel %vm3845_vm13, %v4566_v61, 0  ;;  %v4565_v58 = vmul.f32 %v11364_v42, %v4561_v49  ;;  %v4559_v27 = vsub.f32 2.0, %v4555_v57  ;;  %v13038_v61 = vand.u32 4294901760, %v5177_v32 }
 0x9c2   :  { %v11376_v22 = vpop.eup %11375  ;;  %v4658_v52 = vand.u32 4294901760, %v4574_v24  ;;  %v13033_v2 = vand.u32 4294901760, %v13021_v45 }
 0x9c3   :  { %v4571_v38 = vsel %vm3845_vm13, %v4565_v58, 0  ;;  %v4563_v60 = vmul.f32 %v11374_v26, %v4559_v27  ;;  %v4556_v62 = vmul.f32 %v11376_v22, %v4548_v17  ;;  %v13036_v26 = vsub.f32 %v5178_v28, %v13023_v41 }
 0x9c4   :  { %v4659_v33 = vsub.f32 %v4574_v24, %v4658_v52  ;;  %v4648_v15 = vand.u32 4294901760, %v4571_v38  ;;  %v5337_v57 = vsub.f32 %v13021_v45, %v13033_v2  ;;  %v13048_v58 = vsub.f32 %v5177_v32, %v13038_v61 }
 0x9c5   :  { %v4567_v11 = vmul.f32 %v11366_v9, %v4563_v60  ;;  %v4560_v35 = vsub.f32 2.0, %v4556_v62  ;;  %v13045_v24 = vand.u32 4294901760, %v13036_v26 }
 0x9c6   :  { %v4660_v16 = vand.u32 4294901760, %v4659_v33  ;;  %10504 = vmatprep.mubr.f32.mxu1 %v4648_v15  ;;  %v4649_v8 = vsub.f32 %v4571_v38, %v4648_v15  ;;  %v5338_v27 = vand.u32 4294901760, %v5337_v57 }
 0x9c7   :  { %v4577_v36 = vsel %vm3845_vm13, %v4567_v11, 0  ;;  %v4564_v1 = vmul.f32 %v11376_v22, %v4560_v35  ;;  %10505 = vmatmul.mubr.f32.vlgmr.msra.gmra.mxu1 %v4658_v52  ;;  %v5344_v22 = vsub.f32 %v13036_v26, %v13045_v24 }
 0x9c8   :  { %v4668_v54 = vand.u32 4294901760, %v4577_v36  ;;  %v4650_v42 = vand.u32 4294901760, %v4649_v8  ;;  %10519 = vmatpush3.msra.mxu1 %v12966_v7  ;;  %v4661_v12 = vsub.f32 %v4659_v33, %v4660_v16 }
 0x9c9   :  { %v4568_v23 = vmul.f32 %v12956_v48, %v4564_v1  ;;  %10534 = vmatprep.subr.mxu1 %v12966_v7  ;;  %v5345_v38 = vand.u32 4294901760, %v5344_v22 }
 0x9ca   :  { %10507 = vmatprep.mubr.f32.mxu1 %v4668_v54  ;;  %v4651_v30 = vsub.f32 %v4649_v8, %v4650_v42  ;;  %v4669_v9 = vsub.f32 %v4577_v36, %v4668_v54  ;;  %v4662_v39 = vand.u32 4294901760, %v4661_v12 }
 0x9cb   :  { %v4580_v47 = vsel %vm3845_vm13, %v4568_v23, 0 }
 0x9cc   :  { %v4652_v34 = vand.u32 4294901760, %v4651_v30  ;;  %v4678_v10 = vand.u32 4294901760, %v4580_v47  ;;  %v4670_v51 = vand.u32 4294901760, %v4669_v9 }
 0x9ce   :  { %10496 = vmatprep.mubr.f32.mxu0 %v4652_v34  ;;  %10508 = vmatmul.mubr.f32.gmra.mxu1 %v4678_v10  ;;  %v4671_v56 = vsub.f32 %v4669_v9, %v4670_v51  ;;  %v4679_v17 = vsub.f32 %v4580_v47, %v4678_v10 }
 0x9cf   :  { %10497 = vmatmul.mubr.f32.vlgmr.msra.gmra.mxu0 %v4662_v39  ;;  %10520 = vmatprep.mubr.f32.mxu1 %v4650_v42 }
 0x9d0   :  { %v4672_v44 = vand.u32 4294901760, %v4671_v56  ;;  %10511 = vmatpush3.msra.mxu0 %v12969_v31  ;;  %v4680_v48 = vand.u32 4294901760, %v4679_v17 }
 0x9d1   :  { %10526 = vmatprep.subr.mxu0 %v12974_v25 }
 0x9d2   :  { %10499 = vmatprep.mubr.f32.mxu0 %v4672_v44  ;;  %10521 = vmatmul.mubr.f32.vlgmr.msra.gmra.mxu1 %v4660_v16  ;;  %v4681_v63 = vsub.f32 %v4679_v17, %v4680_v48 }
 0x9d3   :  { %10523 = vmatprep.mubr.f32.mxu1 %v4670_v51  ;;  %10535 = vmatpush3.msra.mxu1 %v12966_v7  ;;  %v5180_v7 = vld [vmem:[%s14533_s21 + $0x18] sm:$0xff] }
 0x9d4   :  { %v4682_v46 = vand.u32 4294901760, %v4681_v63  ;;  %v13002_v31 = vand.u32 4294901760, %v5180_v7 }
 0x9d6   :  { %10500 = vmatmul.mubr.f32.gmra.mxu0 %v4682_v46  ;;  %10524 = vmatmul.mubr.f32.gmra.mxu1 %v4680_v48 }
 0x9d7   :  { %10512 = vmatprep.mubr.f32.mxu0 %v4649_v8  ;;  %10536 = vmatprep.mubr.f32.mxu1 %v4648_v15 }
 0x9da   :  { %10513 = vmatmul.mubr.f32.vlgmr.msra.gmra.mxu0 %v4659_v33  ;;  %10537 = vmatmul.mubr.f32.vlgmr.msra.gmra.mxu1 %v4658_v52 }
 0x9db   :  { %10527 = vmatpush3.msra.mxu0 %v12974_v25  ;;  %10515 = vmatprep.mubr.f32.mxu0 %v4669_v9  ;;  %v13008_v25 = vsub.f32 %v5180_v7, %v13002_v31 }
 0x9dc   :  { %10539 = vmatprep.mubr.f32.mxu1 %v4668_v54  ;;  %10542 = vmatprep.subr.mxu0 %v13002_v31 }
 0x9dd   :  { %v13018_v40 = vand.u32 4294901760, %v13008_v25 }
 0x9de   :  { %10516 = vmatmul.mubr.f32.gmra.mxu0 %v4679_v17  ;;  %10540 = vmatmul.mubr.f32.gmra.mxu1 %v4678_v10 }
 0x9df   :  { %10528 = vmatprep.mubr.f32.mxu0 %v4648_v15  ;;  %v5330_v59 = vsub.f32 %v13008_v25, %v13018_v40 }
 0x9e1   :  { %v5331_v49 = vand.u32 4294901760, %v5330_v59 }
 0x9e2   :  { %10529 = vmatmul.mubr.f32.vlgmr.msra.gmra.mxu0 %v4658_v52  ;;  %v13055_v52 = vand.u32 4294901760, %v13048_v58 }
 0x9e3   :  { %10531 = vmatprep.mubr.f32.mxu0 %v4668_v54  ;;  %10543 = vmatpush3.msra.mxu0 %v13002_v31 }
 0x9e4   :  { %10544 = vmatprep.subr.mxu0 %v13010_v21  ;;  %10556 = vmatprep.subr.mxu1 %v5331_v49  ;;  %v5351_v60 = vsub.f32 %v13048_v58, %v13055_v52 }
 0x9e5   :  { %10545 = vmatpush3.msra.mxu0 %v13010_v21  ;;  %10557 = vmatpush3.msra.mxu1 %v5331_v49 }
 0x9e6   :  { %10532 = vmatmul.mubr.f32.gmra.mxu0 %v4678_v10  ;;  %10546 = vmatprep.subr.mxu0 %v13023_v41  ;;  %v5352_v62 = vand.u32 4294901760, %v5351_v60 }
 0x9e7   :  { %10547 = vmatpush3.msra.mxu0 %v13023_v41  ;;  %10558 = vmatprep.subr.mxu1 %v5338_v27 }
 0x9e8   :  { %10548 = vmatprep.subr.mxu0 %v13038_v61  ;;  %10559 = vmatpush3.msra.mxu1 %v5338_v27 }
 0x9e9   :  { %10549 = vmatpush3.msra.mxu0 %v13038_v61  ;;  %10560 = vmatprep.subr.mxu1 %v5345_v38 }
 0x9ea   :  { %10570 = vmatprep.subr.mxu0 %v13008_v25  ;;  %10561 = vmatpush3.msra.mxu1 %v5345_v38 }
 0x9eb   :  { %10562 = vmatprep.subr.mxu1 %v5352_v62 }
 0x9ec   :  { %10563 = vmatpush3.msra.mxu1 %v5352_v62 }
 0x9ed   :  { %10584 = vmatprep.subr.mxu1 %v13002_v31 }
 0xa29   :  { %v5162_v56 = vpop.permute.xlu1 %5161 }
 0xa2d   :  { %v5164_v27 = vpop.permute.xlu1 %5163 }
 0xa87   :  { %v10506_v33 = vpop.f32.mrf.mxu1 }
 0xa89   :  { %v4760_v15 = vpop.f32.mrf.mxu1 }
 0xa8e   :  { %v10509_v11 = vpop.f32.mrf.mxu1 }
 0xa8f   :  { %v10498_v35 = vpop.f32.mrf.mxu0 }
 0xa90   :  { %v4772_v16 = vpop.f32.mrf.mxu1  ;;  %v4767_v9 = vadd.f32 %v10506_v33, %v10498_v35 }
 0xa91   :  { %v4654_v36 = vpop.f32.mrf.mxu0 }
 0xa92   :  { %v10522_v8 = vpop.f32.mrf.mxu1  ;;  %v4761_v34 = vadd.f32 %v4760_v15, %v4654_v36 }
 0xa94   :  { %v4947_v1 = vpop.f32.mrf.mxu1 }
 0xa96   :  { %v10501_v54 = vpop.f32.mrf.mxu0  ;;  %v10525_v42 = vpop.f32.mrf.mxu1 }
 0xa97   :  { %v4779_v17 = vadd.f32 %v10509_v11, %v10501_v54 }
 0xa98   :  { %v4674_v23 = vpop.f32.mrf.mxu0  ;;  %v4963_v12 = vpop.f32.mrf.mxu1 }
 0xa99   :  { %v4773_v63 = vadd.f32 %v4772_v16, %v4674_v23 }
 0xa9a   :  { %v10514_v30 = vpop.f32.mrf.mxu0  ;;  %v10538_v51 = vpop.f32.mrf.mxu1 }
 0xa9b   :  { %v4860_v10 = vadd.f32 %v10514_v30, %v4767_v9  ;;  %v5168_v9 = vpop.permute.xlu0 %5167 }
 0xa9c   :  { %v4852_v47 = vpop.f32.mrf.mxu0  ;;  %v5135_v18 = vpop.f32.mrf.mxu1 }
 0xa9d   :  { %v4853_v44 = vadd.f32 %v4852_v47, %v4761_v34  ;;  %v4956_v7 = vadd.f32 %v10522_v8, %v4860_v10 }
 0xa9e   :  { %v10517_v39 = vpop.f32.mrf.mxu0  ;;  %v10541_v62 = vpop.f32.mrf.mxu1 }
 0xa9f   :  { %v4874_v46 = vadd.f32 %v10517_v39, %v4779_v17  ;;  %v4948_v49 = vadd.f32 %v4947_v1, %v4853_v44 }
 0xaa0   :  { %v4866_v48 = vpop.f32.mrf.mxu0  ;;  %v5147_v47 = vpop.f32.mrf.mxu1 }
 0xaa1   :  { %v4867_v32 = vadd.f32 %v4866_v48, %v4773_v63  ;;  %v4972_v60 = vadd.f32 %v10525_v42, %v4874_v46 }
 0xaa2   :  { %v10530_v28 = vpop.f32.mrf.mxu0 }
 0xaa3   :  { %v5052_v59 = vadd.f32 %v10530_v28, %v4956_v7  ;;  %v4964_v36 = vadd.f32 %v4963_v12, %v4867_v32 }
 0xaa4   :  { %v5045_v57 = vpop.f32.mrf.mxu0 }
 0xaa5   :  { %v5142_v22 = vadd.f32 %v10538_v51, %v5052_v59  ;;  %v5046_v38 = vadd.f32 %v5045_v57, %v4948_v49  ;;  %v5166_v51 = vpop.permute.xlu1 %5165 }
 0xaa6   :  { %v10533_v33 = vpop.f32.mrf.mxu0 }
 0xaa7   :  { %v5174_v15 = vmul.f32 %v5164_v27, %v5142_v22  ;;  %v5136_v35 = vadd.f32 %v5135_v18, %v5046_v38  ;;  %v5064_v11 = vadd.f32 %v10533_v33, %v4972_v60 }
 0xaa8   :  { %v5057_v54 = vpop.f32.mrf.mxu0 }
 0xaa9   :  { %v5185_v16 = vsel %vm137_vm1, %v5174_v15, 0  ;;  %v5173_v8 = vmul.f32 %v5162_v56, %v5136_v35  ;;  %v5154_v23 = vadd.f32 %v10541_v62, %v5064_v11  ;;  %v5058_v30 = vadd.f32 %v5057_v54, %v4964_v36 }
 0xaaa   :  { %v13062_v1 = vand.u32 4294901760, %v5185_v16 }
 0xaab   :  { %v5182_v34 = vsel %vm137_vm1, %v5173_v8, 0  ;;  %v5176_v10 = vmul.f32 %v5168_v9, %v5154_v23  ;;  %v5148_v42 = vadd.f32 %v5147_v47, %v5058_v30 }
 0xaac   :  { %v5273_v39 = vsub.f32 %v5185_v16, %v13062_v1  ;;  %v13066_v17 = vand.u32 4294901760, %v5182_v34 }
 0xaad   :  { %v5191_v12 = vsel %vm137_vm1, %v5176_v10, 0  ;;  %v5175_v44 = vmul.f32 %v5166_v51, %v5148_v42 }
 0xaae   :  { %v5274_v48 = vand.u32 4294901760, %v5273_v39  ;;  %v5263_v56 = vsub.f32 %v5182_v34, %v13066_v17  ;;  %v13070_v63 = vand.u32 4294901760, %v5191_v12  ;;  %10564 = vmatprep.mubr.f32.mxu1 %v13066_v17 }
 0xaaf   :  { %v5188_v46 = vsel %vm137_vm1, %v5175_v44, 0  ;;  %10565 = vmatmul.mubr.f32.vlgmr.msra.gmra.mxu1 %v13062_v1 }
 0xab0   :  { %v5293_v7 = vsub.f32 %v5191_v12, %v13070_v63  ;;  %v13076_v18 = vand.u32 4294901760, %v5188_v46  ;;  %10585 = vmatpush3.msra.mxu1 %v13002_v31  ;;  %v5264_v28 = vand.u32 4294901760, %v5263_v56  ;;  %v5275_v32 = vsub.f32 %v5273_v39, %v5274_v48 }
 0xab1   :  { %10586 = vmatprep.subr.mxu1 %v13010_v21 }
 0xab2   :  { %v5283_v59 = vsub.f32 %v5188_v46, %v13076_v18  ;;  %10567 = vmatprep.mubr.f32.mxu1 %v13076_v18  ;;  %10587 = vmatpush3.msra.mxu1 %v13010_v21  ;;  %v5265_v49 = vsub.f32 %v5263_v56, %v5264_v28  ;;  %v5294_v57 = vand.u32 4294901760, %v5293_v7  ;;  %v5276_v38 = vand.u32 4294901760, %v5275_v32 }
 0xab3   :  { %10568 = vmatmul.mubr.f32.gmra.mxu1 %v13070_v63  ;;  %10588 = vmatprep.subr.mxu1 %v13023_v41 }
 0xab4   :  { %10589 = vmatpush3.msra.mxu1 %v13023_v41  ;;  %10592 = vmatprep.mubr.f32.mxu1 %v5264_v28  ;;  %v5266_v27 = vand.u32 4294901760, %v5265_v49  ;;  %v5284_v22 = vand.u32 4294901760, %v5283_v59  ;;  %v5295_v62 = vsub.f32 %v5293_v7, %v5294_v57 }
 0xab5   :  { %10590 = vmatprep.subr.mxu1 %v13038_v61 }
 0xab6   :  { %10550 = vmatprep.mubr.f32.mxu0 %v5266_v27  ;;  %10591 = vmatpush3.msra.mxu1 %v13038_v61  ;;  %v5285_v60 = vsub.f32 %v5283_v59, %v5284_v22  ;;  %v5296_v15 = vand.u32 4294901760, %v5295_v62 }
 0xab7   :  { %10551 = vmatmul.mubr.f32.vlgmr.msra.gmra.mxu0 %v5276_v38  ;;  %10593 = vmatmul.mubr.f32.vlgmr.msra.gmra.mxu1 %v5274_v48 }
 0xab8   :  { %10571 = vmatpush3.msra.mxu0 %v13008_v25  ;;  %10612 = vmatprep.subr.mxu1 %v13002_v31  ;;  %v5286_v33 = vand.u32 4294901760, %v5285_v60 }
 0xab9   :  { %10572 = vmatprep.subr.mxu0 %v13021_v45  ;;  %10595 = vmatprep.mubr.f32.mxu1 %v5284_v22 }
 0xaba   :  { %10613 = vmatpush3.msra.mxu1 %v13002_v31  ;;  %10573 = vmatpush3.msra.mxu0 %v13021_v45 }
 0xabb   :  { %10614 = vmatprep.subr.mxu1 %v13010_v21  ;;  %10553 = vmatprep.mubr.f32.mxu0 %v5286_v33 }
 0xabc   :  { %10574 = vmatprep.subr.mxu0 %v13036_v26  ;;  %10615 = vmatpush3.msra.mxu1 %v13010_v21 }
 0xabd   :  { %10554 = vmatmul.mubr.f32.gmra.mxu0 %v5296_v15  ;;  %10596 = vmatmul.mubr.f32.gmra.mxu1 %v5294_v57 }
 0xabe   :  { %10575 = vmatpush3.msra.mxu0 %v13036_v26  ;;  %10616 = vmatprep.subr.mxu1 %v13023_v41 }
 0xabf   :  { %10576 = vmatprep.subr.mxu0 %v13048_v58  ;;  %10578 = vmatprep.mubr.f32.mxu0 %v5263_v56 }
 0xac0   :  { %10617 = vmatpush3.msra.mxu1 %v13023_v41  ;;  %10620 = vmatprep.mubr.f32.mxu1 %v13066_v17 }
 0xac1   :  { %10577 = vmatpush3.msra.mxu0 %v13048_v58  ;;  %10618 = vmatprep.subr.mxu1 %v13038_v61 }
 0xac2   :  { %10598 = vmatprep.subr.mxu0 %v13018_v40  ;;  %10619 = vmatpush3.msra.mxu1 %v13038_v61 }
 0xac3   :  { %10579 = vmatmul.mubr.f32.vlgmr.msra.gmra.mxu0 %v5273_v39  ;;  %10621 = vmatmul.mubr.f32.vlgmr.msra.gmra.mxu1 %v13062_v1 }
 0xac4   :  { %10599 = vmatpush3.msra.mxu0 %v13018_v40  ;;  %10581 = vmatprep.mubr.f32.mxu0 %v5283_v59 }
 0xac5   :  { %10600 = vmatprep.subr.mxu0 %v13033_v2  ;;  %10623 = vmatprep.mubr.f32.mxu1 %v13076_v18 }
 0xac6   :  { %10601 = vmatpush3.msra.mxu0 %v13033_v2  ;;  %10637 = vmatprep.subr.mxu1 %v14559_v0 }
 0xac7   :  { %10602 = vmatprep.subr.mxu0 %v13045_v24  ;;  %10582 = vmatmul.mubr.f32.gmra.mxu0 %v5293_v7 }
 0xac8   :  { %10603 = vmatpush3.msra.mxu0 %v13045_v24  ;;  %10624 = vmatmul.mubr.f32.gmra.mxu1 %v13070_v63 }
 0xac9   :  { %10604 = vmatprep.subr.mxu0 %v13055_v52  ;;  %10606 = vmatprep.mubr.f32.mxu0 %v13066_v17 }
 0xaca   :  { %10605 = vmatpush3.msra.mxu0 %v13055_v52  ;;  %10645 = vmatprep.mubr.msk.f32.mxu1 %vm11511_vm0, %v14559_v0 }
 0xacb   :  { %10607 = vmatmul.mubr.f32.vlgmr.msra.gmra.mxu0 %v13062_v1  ;;  %10626 = vmatprep.subr.mxu0 %v14559_v0 }
 0xacc   :  { %10609 = vmatprep.mubr.f32.mxu0 %v13076_v18 }
 0xacf   :  { %10610 = vmatmul.mubr.f32.gmra.mxu0 %v13070_v63 }
 0xad0   :  { %10634 = vmatprep.mubr.msk.f32.mxu0 %vm11511_vm0, %v14559_v0 }
 0xb6f   :  { %v10566_v31 = vpop.f32.mrf.mxu1 }
 0xb71   :  { %v5389_v25 = vpop.f32.mrf.mxu1 }
 0xb73   :  { %v10569_v21 = vpop.f32.mrf.mxu1 }
 0xb75   :  { %v5401_v40 = vpop.f32.mrf.mxu1 }
 0xb77   :  { %v10552_v45 = vpop.f32.mrf.mxu0  ;;  %v10594_v41 = vpop.f32.mrf.mxu1 }
 0xb78   :  { %v5396_v11 = vadd.f32 %v10566_v31, %v10552_v45 }
 0xb79   :  { %v5268_v2 = vpop.f32.mrf.mxu0  ;;  %v5585_v26 = vpop.f32.mrf.mxu1 }
 0xb7a   :  { %v5390_v54 = vadd.f32 %v5389_v25, %v5268_v2 }
 0xb7d   :  { %v10555_v61 = vpop.f32.mrf.mxu0  ;;  %v10597_v24 = vpop.f32.mrf.mxu1 }
 0xb7e   :  { %v5408_v30 = vadd.f32 %v10569_v21, %v10555_v61 }
 0xb7f   :  { %v5288_v58 = vpop.f32.mrf.mxu0  ;;  %v5601_v52 = vpop.f32.mrf.mxu1 }
 0xb80   :  { %v5402_v1 = vadd.f32 %v5401_v40, %v5288_v58 }
 0xb83   :  { %v10580_v35 = vpop.f32.mrf.mxu0  ;;  %v10622_v8 = vpop.f32.mrf.mxu1 }
 0xb84   :  { %v5495_v16 = vadd.f32 %v10580_v35, %v5396_v11 }
 0xb85   :  { %v5487_v36 = vpop.f32.mrf.mxu0  ;;  %v5785_v42 = vpop.f32.mrf.mxu1 }
 0xb86   :  { %v5488_v9 = vadd.f32 %v5487_v36, %v5390_v54  ;;  %v5594_v10 = vadd.f32 %v10594_v41, %v5495_v16 }
 0xb87   :  { %v10583_v23 = vpop.f32.mrf.mxu0 }
 0xb88   :  { %v5509_v34 = vadd.f32 %v10583_v23, %v5408_v30  ;;  %v5586_v12 = vadd.f32 %v5585_v26, %v5488_v9  ;;  %v10625_v46 = vpop.f32.mrf.mxu1 }
 0xb89   :  { %v5501_v47 = vpop.f32.mrf.mxu0 }
 0xb8a   :  { %v5502_v39 = vadd.f32 %v5501_v47, %v5402_v1  ;;  %v5610_v63 = vadd.f32 %v10597_v24, %v5509_v34  ;;  %v5797_v60 = vpop.f32.mrf.mxu1 }
 0xb8b   :  { %v10608_v51 = vpop.f32.mrf.mxu0 }
 0xb8c   :  { %v5699_v17 = vadd.f32 %v10608_v51, %v5594_v10  ;;  %v5602_v32 = vadd.f32 %v5601_v52, %v5502_v39 }
 0xb8d   :  { %v5692_v44 = vpop.f32.mrf.mxu0 }
 0xb8e   :  { %v13125_v48 = vadd.f32 %v10622_v8, %v5699_v17  ;;  %v5693_v56 = vadd.f32 %v5692_v44, %v5586_v12  ;;  %v5897_v12 = vld [vmem:[%s14524_s12 + $0x10] sm:$0xff] }
 0xb8f   :  { %v10611_v7 = vpop.f32.mrf.mxu0 }
 0xb90   :  { %v13127_v18 = vadd.f32 %v5785_v42, %v5693_v56  ;;  %v5711_v28 = vadd.f32 %v10611_v7, %v5610_v63  ;;  %v5831_v49 = vrot.slane %v13125_v48, 1  ;;  %v5849_v33 = vrot.slane %v13125_v48, 3  ;;  %v5898_v42 = vld [vmem:[%s14524_s12 + $0x18] sm:$0xff]  ;;  %v5896_v7 = vld [vmem:[%s14524_s12 + $0x8] sm:$0xff] }
 0xb91   :  { %v5704_v59 = vpop.f32.mrf.mxu0  ;;  %v5840_v31 = vrot.slane %v13125_v48, 2  ;;  %v5869_v26 = vrot.slane %v13125_v48, 5  ;;  %v5859_v10 = vrot.slane %v13125_v48, 4  ;;  %v5879_v17 = vrot.slane %v13125_v48, 6 }
 0xb92   :  { %v13130_v57 = vadd.f32 %v10625_v46, %v5711_v28  ;;  %v5705_v27 = vadd.f32 %v5704_v59, %v5602_v32  ;;  %v5830_v22 = vrot.slane %v13127_v18, 2  ;;  %v5821_v38 = vrot.slane %v13127_v18, 1 }
 0xb93   :  { %v5848_v62 = vrot.slane %v13127_v18, 4  ;;  %v5839_v15 = vrot.slane %v13127_v18, 3  ;;  %v5868_v45 = vrot.slane %v13127_v18, 6  ;;  %v5858_v61 = vrot.slane %v13127_v18, 5 }
 0xb94   :  { %v13138_v25 = vadd.f32 %v5797_v60, %v5705_v27  ;;  %v5832_v21 = vsel %vm5812_vm6, %v5831_v49, %v5830_v22  ;;  %v5834_v40 = vrot.slane %v13130_v57, 7  ;;  %v5822_v41 = vsel %vm5812_vm6, %v13125_v48, %v5821_v38  ;;  %v5895_v27 = vld [vmem:[%s14524_s12] sm:$0xff] }
 0xb95   :  { %v5825_v2 = vrot.slane %v13130_v57, 6  ;;  %v5850_v36 = vsel %vm5812_vm6, %v5849_v33, %v5848_v62  ;;  %v5841_v54 = vsel %vm5812_vm6, %v5840_v31, %v5839_v15  ;;  %v5870_v9 = vsel %vm5812_vm6, %v5869_v26, %v5868_v45 }
 0xb96   :  { %v5833_v24 = vsel %vm5815_vm7, %v13138_v25, %v5832_v21  ;;  %v5823_v58 = vrot.slane %v13138_v25, 7  ;;  %v5851_v52 = vrot.slane %v13138_v25, 2  ;;  %v5842_v35 = vrot.slane %v13138_v25, 1 }
 0xb97   :  { %v5835_v11 = vsel %vm5818_vm8, %v5834_v40, %v5833_v24  ;;  %v5871_v16 = vrot.slane %v13138_v25, 4  ;;  %v5853_v1 = vrot.slane %v13130_v57, 1  ;;  %v5873_v51 = vrot.slane %v13130_v57, 3 }
 0xb98   :  { %5836 = vrot.lane.b32.xlu0 %v5835_v11, %s11521_s8  ;;  %v5824_v8 = vsel %vm5815_vm7, %v5823_v58, %v5822_v41  ;;  %v5852_v23 = vsel %vm5815_vm7, %v5851_v52, %v5850_v36  ;;  %v5843_v30 = vsel %vm5815_vm7, %v5842_v35, %v5841_v54  ;;  %v5861_v39 = vrot.slane %v13138_v25, 3 }
 0xb99   :  { %v5826_v47 = vsel %vm5818_vm8, %v5825_v2, %v5824_v8  ;;  %v5872_v34 = vsel %vm5815_vm7, %v5871_v16, %v5870_v9  ;;  %v5854_v44 = vsel %vm5818_vm8, %v5853_v1, %v5852_v23  ;;  %v5844_v56 = vsel %vm5818_vm8, %v13130_v57, %v5843_v30 }
 0xb9a   :  { %5827 = vrot.lane.b32.xlu1 %v5826_v47, %s11522_s4  ;;  %v5860_v63 = vsel %vm5812_vm6, %v5859_v10, %v5858_v61  ;;  %v5811_v46 = vrot.slane %v13125_v48, 7  ;;  %v5874_v28 = vsel %vm5818_vm8, %v5873_v51, %v5872_v34  ;;  %v5878_v32 = vrot.slane %v13127_v18, 7 }
 0xb9b   :  { %v5814_v59 = vrot.slane %v13138_v25, 6  ;;  %v13188_v49 = vand.u32 4294901760, %v5898_v42  ;;  %v5881_v48 = vrot.slane %v13138_v25, 5  ;;  %v5817_v38 = vrot.slane %v13130_v57, 5 }
 0xb9c   :  { %5855 = vrot.lane.b32.xlu0 %v5854_v44, %s11526_s29  ;;  %v5813_v22 = vsel %vm5812_vm6, %v5811_v46, %v13127_v18  ;;  %v13197_v60 = vand.u32 4294901760, %v5897_v12  ;;  %v5862_v62 = vsel %vm5815_vm7, %v5861_v39, %v5860_v63  ;;  %v13205_v31 = vand.u32 4294901760, %v5896_v7 }
 0xb9d   :  { %v5816_v33 = vsel %vm5815_vm7, %v5814_v59, %v5813_v22  ;;  %v13203_v15 = vsub.f32 %v5898_v42, %v13188_v49  ;;  %10627 = vmatpush3.msra.mxu0 %v13188_v49  ;;  %v5863_v25 = vrot.slane %v13130_v57, 2  ;;  %v13213_v40 = vand.u32 4294901760, %v5895_v27 }
 0xb9e   :  { %5845 = vrot.lane.b32.xlu1 %v5844_v56, %s11524_s9  ;;  %v5819_v18 = vsel %vm5818_vm8, %v5817_v38, %v5816_v33  ;;  %v13211_v21 = vsub.f32 %v5897_v12, %v13197_v60  ;;  %10628 = vmatprep.subr.mxu0 %v14559_v0  ;;  %v13219_v41 = vsub.f32 %v5896_v7, %v13205_v31  ;;  %v5883_v11 = vrot.slane %v13130_v57, 4  ;;  %s11529_s9 = smov 64  }
 0xb9f   :  { %v6012_v45 = vand.u32 4294901760, %v13203_v15  ;;  %10629 = vmatpush3.msra.mxu0 %v13197_v60  ;;  %v5864_v2 = vsel %vm5818_vm8, %v5863_v25, %v5862_v62  ;;  %v5880_v26 = vsel %vm5812_vm6, %v5879_v17, %v5878_v32  ;;  %v13226_v24 = vsub.f32 %v5895_v27, %v13213_v40 }
 0xba0   :  { %5875 = vrot.lane.b32.xlu0 %v5874_v28, %s11525_s11  ;;  %v6019_v61 = vand.u32 4294901760, %v13211_v21  ;;  %10630 = vmatprep.subr.mxu0 %v14559_v0  ;;  %v5882_v58 = vsel %vm5815_vm7, %v5881_v48, %v5880_v26  ;;  %v6026_v35 = vand.u32 4294901760, %v13219_v41 }
 0xba1   :  { %v6013_v52 = vsub.f32 %v13203_v15, %v6012_v45  ;;  %10631 = vmatpush3.msra.mxu0 %v13205_v31  ;;  %v6033_v54 = vand.u32 4294901760, %v13226_v24  ;;  %v5884_v23 = vsel %vm5818_vm8, %v5883_v11, %v5882_v58 }
 0xba2   :  { %5865 = vrot.lane.b32.xlu1 %v5864_v2, %s11523_s27  ;;  %v6020_v36 = vsub.f32 %v13211_v21, %v6019_v61  ;;  %10632 = vmatprep.subr.mxu0 %v14559_v0  ;;  %v6027_v8 = vsub.f32 %v13219_v41, %v6026_v35 }
 0xba3   :  { %v6014_v16 = vand.u32 4294901760, %v6013_v52  ;;  %10633 = vmatpush3.msra.mxu0 %v13213_v40  ;;  %v6034_v57 = vsub.f32 %v13226_v24, %v6033_v54 }
 0xba4   :  { %v6021_v30 = vand.u32 4294901760, %v6020_v36  ;;  %10648 = vmatprep.subr.mxu0 %v14559_v0  ;;  %v6028_v9 = vand.u32 4294901760, %v6027_v8 }
 0xba5   :  { %10638 = vmatpush3.msra.mxu1 %v6014_v16  ;;  %v6035_v47 = vand.u32 4294901760, %v6034_v57 }
 0xba6   :  { %5885 = vrot.lane.b32.xlu1 %v5884_v23, %s11527_s19  ;;  %10639 = vmatprep.subr.mxu1 %v14559_v0 }
 0xba7   :  { %10640 = vmatpush3.msra.mxu1 %v6021_v30 }
 0xba8   :  { %10641 = vmatprep.subr.mxu1 %v14559_v0 }
 0xba9   :  { %10642 = vmatpush3.msra.mxu1 %v6028_v9 }
 0xbaa   :  { %10643 = vmatprep.subr.mxu1 %v14559_v0 }
 0xbab   :  { %10644 = vmatpush3.msra.mxu1 %v6035_v47 }
 0xbac   :  { %10659 = vmatprep.subr.mxu1 %v14559_v0 }
 0xc0a   :  { %v5837_v1 = vpop.permute.xlu0 %5836 }
 0xc0c   :  { %v5828_v34 = vpop.permute.xlu1 %5827 }
 0xc0d   :  { %v5888_v10 = vsel %vm3840_vm12, %v5819_v18, %v5828_v34 }
 0xc0e   :  { %v5889_v51 = vsel %vm3845_vm13, %v5888_v10, %v5837_v1  ;;  %v5856_v39 = vpop.permute.xlu0 %5855 }
 0xc10   :  { %v5846_v42 = vpop.permute.xlu1 %5845 }
 0xc11   :  { %v5890_v17 = vsel %vm3850_vm14, %v5889_v51, %v5846_v42 }
 0xc12   :  { %v5891_v44 = vsel %vm3855_vm15, %v5890_v17, %v5856_v39  ;;  %v5876_v63 = vpop.permute.xlu0 %5875 }
 0xc14   :  { %v5866_v12 = vpop.permute.xlu1 %5865 }
 0xc15   :  { %v5892_v56 = vsel %vm3860_vm2, %v5891_v44, %v5866_v12 }
 0xc16   :  { %v5893_v7 = vsel %vm3865_vm3, %v5892_v56, %v5876_v63 }
 0xc18   :  { %v5886_v46 = vpop.permute.xlu1 %5885 }
 0xc19   :  { %v5894_v28 = vsel %vm3870_vm4, %v5893_v7, %v5886_v46  ;;  %v6418_v7 = vld [vmem:[%s14525_s13 + $0x18] sm:$0xff] }
 0xc1a   :  { %v5904_v32 = vsel %vm137_vm1, %v5894_v28, 0  ;;  %v6417_v28 = vld [vmem:[%s14525_s13 + $0x10] sm:$0xff] }
 0xc1b   :  { %v5975_v59 = vand.u32 4294901760, %v5904_v32 }
 0xc1d   :  { %v5976_v27 = vsub.f32 %v5904_v32, %v5975_v59  ;;  %10646 = vmatmul.mubr.f32.vlgmr.msra.gmra.mxu1 %v5975_v59  ;;  %v6416_v32 = vld [vmem:[%s14525_s13 + $0x8] sm:$0xff] }
 0xc1e   :  { %10660 = vmatpush3.msra.mxu1 %v13188_v49  ;;  %10667 = vmatprep.mubr.msk.f32.mxu1 %vm11511_vm0, %v14559_v0 }
 0xc1f   :  { %10661 = vmatprep.subr.mxu1 %v14559_v0  ;;  %v5977_v48 = vand.u32 4294901760, %v5976_v27 }
 0xc20   :  { %10662 = vmatpush3.msra.mxu1 %v13197_v60 }
 0xc21   :  { %10663 = vmatprep.subr.mxu1 %v14559_v0  ;;  %v5978_v22 = vsub.f32 %v5976_v27, %v5977_v48 }
 0xc22   :  { %10664 = vmatpush3.msra.mxu1 %v13205_v31 }
 0xc23   :  { %10665 = vmatprep.subr.mxu1 %v14559_v0  ;;  %v5979_v38 = vand.u32 4294901760, %v5978_v22  ;;  %v6415_v22 = vld [vmem:[%s14525_s13] sm:$0xff] }
 0xc24   :  { %10666 = vmatpush3.msra.mxu1 %v13213_v40 }
 0xc25   :  { %10668 = vmatmul.mubr.f32.vlgmr.msra.gmra.mxu1 %v5977_v48  ;;  %10681 = vmatprep.subr.mxu1 %v14559_v0  ;;  %v13349_v48 = vand.u32 4294901760, %v6416_v32 }
 0xc26   :  { %10635 = vmatmul.mubr.f32.vlgmr.msra.gmra.mxu0 %v5979_v38  ;;  %10682 = vmatpush3.msra.mxu1 %v13188_v49  ;;  %v13354_v38 = vand.u32 4294901760, %v6415_v22 }
 0xc27   :  { %10649 = vmatpush3.msra.mxu0 %v13203_v15  ;;  %10683 = vmatprep.subr.mxu1 %v14559_v0  ;;  %v2210_v15 = vadd.f32 %v12580_v50, %v12263_v55 }
 0xc28   :  { %10650 = vmatprep.subr.mxu0 %v14559_v0  ;;  %10684 = vmatpush3.msra.mxu1 %v13197_v60  ;;  %v7600_v60 = vsub.f32 0.0, %v12265_v3 }
 0xc29   :  { %10651 = vmatpush3.msra.mxu0 %v13211_v21  ;;  %10685 = vmatprep.subr.mxu1 %v14559_v0  ;;  %v2290_v18 = vadd.f32 %v12578_v43, %v2210_v15 }
 0xc2a   :  { %10652 = vmatprep.subr.mxu0 %v14559_v0  ;;  %10686 = vmatpush3.msra.mxu1 %v13205_v31  ;;  %v7601_v33 = vmul.f32 1.442695, %v7600_v60 }
 0xc2b   :  { %10653 = vmatpush3.msra.mxu0 %v13219_v41  ;;  %10687 = vmatprep.subr.mxu1 %v14559_v0  ;;  %v8838_v2 = vsub.f32 0.0, %v2290_v18  ;;  %v13329_v51 = vadd.f32 1.0, %v2290_v18 }
 0xc2c   :  { %10654 = vmatprep.subr.mxu0 %v14559_v0  ;;  %10656 = vmatprep.mubr.msk.f32.mxu0 %vm11511_vm0, %v14559_v0  ;;  %11377 = vpow2.f32 %v7601_v33  ;;  %v13367_v33 = vsub.f32 %v6415_v22, %v13354_v38  ;;  %v6948_v22 = vld [vmem:[%s14526_s14 + $0x50] sm:$0xff] }
 0xc2d   :  { %10655 = vmatpush3.msra.mxu0 %v13226_v24  ;;  %10688 = vmatpush3.msra.mxu1 %v13213_v40  ;;  %v13319_v40 = vld [vmem:[%s14529_s17 + $0x8] sm:$0xff]  ;;  %v8839_v55 = vmul.f32 1.442695, %v8838_v2 }
 0xc2e   :  { %10689 = vmatprep.mubr.msk.f32.mxu1 %vm11511_vm0, %v14559_v0  ;;  %10657 = vmatmul.mubr.f32.vlgmr.msra.gmra.mxu0 %v5976_v27  ;;  %v13347_v27 = vand.u32 4294901760, %v6417_v28 }
 0xc2f   :  { %10670 = vmatprep.subr.mxu0 %v14559_v0  ;;  %10690 = vmatmul.mubr.f32.vlgmr.msra.gmra.mxu1 %v5975_v59  ;;  %11379 = vpow2.f32 %v8839_v55 }
 0xc30   :  { %10671 = vmatpush3.msra.mxu0 %v6012_v45  ;;  %10678 = vmatprep.mubr.msk.f32.mxu0 %vm11511_vm0, %v14559_v0  ;;  %v5902_v45 = vrot.slane %v13319_v40, %v2319_v20  ;;  %v13360_v60 = vsub.f32 %v6417_v28, %v13347_v27 }
 0xc31   :  { %10672 = vmatprep.subr.mxu0 %v14559_v0  ;;  %10703 = vmatprep.subr.mxu1 %v14559_v0 }
 0xc32   :  { %10673 = vmatpush3.msra.mxu0 %v6019_v61  ;;  %10711 = vmatprep.mubr.msk.f32.mxu1 %vm11511_vm0, %v14559_v0 }
 0xc33   :  { %10674 = vmatprep.subr.mxu0 %v14559_v0 }
 0xc34   :  { %10675 = vmatpush3.msra.mxu0 %v6026_v35 }
 0xc35   :  { %10676 = vmatprep.subr.mxu0 %v14559_v0 }
 0xc36   :  { %10677 = vmatpush3.msra.mxu0 %v6033_v54 }
 0xc37   :  { %10679 = vmatmul.mubr.f32.vlgmr.msra.gmra.mxu0 %v5975_v59  ;;  %10692 = vmatprep.subr.mxu0 %v14559_v0  ;;  %v13345_v59 = vand.u32 4294901760, %v6418_v7 }
 0xc38   :  { %10700 = vmatprep.mubr.msk.f32.mxu0 %vm11511_vm0, %v14559_v0 }
 0xc39   :  { %v11378_v35 = vpop.eup %11377  ;;  %10693 = vmatpush3.msra.mxu0 %v13345_v59 }
 0xc3a   :  { %v7603_v54 = vadd.f32 1.0, %v11378_v35  ;;  %10694 = vmatprep.subr.mxu0 %v14559_v0 }
 0xc3b   :  { %10695 = vmatpush3.msra.mxu0 %v13347_v27 }
 0xc3c   :  { %11381 = vrcp.f32 %v7603_v54  ;;  %v11380_v57 = vpop.eup %11379  ;;  %10696 = vmatprep.subr.mxu0 %v14559_v0 }
 0xc3d   :  { %v8841_v9 = vadd.f32 1.0, %v11380_v57  ;;  %10697 = vmatpush3.msra.mxu0 %v13349_v48 }
 0xc3e   :  { %10698 = vmatprep.subr.mxu0 %v14559_v0 }
 0xc3f   :  { %11383 = vrcp.f32 %v8841_v9  ;;  %10699 = vmatpush3.msra.mxu0 %v13354_v38 }
 0xc40   :  { %10714 = vmatprep.subr.mxu0 %v14559_v0 }
 0xc49   :  { %v11382_v47 = vpop.eup %11381 }
 0xc4a   :  { %v7605_v1 = vmul.f32 %v11382_v47, %v7603_v54 }
 0xc4c   :  { %v7606_v34 = vsub.f32 2.0, %v7605_v1  ;;  %v11384_v42 = vpop.eup %11383  ;;  %v6952_v1 = vld [vmem:[%s14526_s14 + $0x70] sm:$0xff] }
 0xc4d   :  { %v8843_v39 = vmul.f32 %v11384_v42, %v8841_v9  ;;  %v6953_v9 = vld [vmem:[%s14526_s14 + $0x78] sm:$0xff] }
 0xc4e   :  { %v7607_v10 = vmul.f32 %v11382_v47, %v7606_v34  ;;  %v13454_v47 = vand.u32 4294901760, %v6953_v9 }
 0xc50   :  { %v13460_v34 = vsub.f32 %v6953_v9, %v13454_v47 }
 0xcdd   :  { %v6072_v49 = vpop.f32.mrf.mxu1 }
 0xcdf   :  { %v10647_v62 = vpop.f32.mrf.mxu1 }
 0xce0   :  { %v13363_v62 = vsub.f32 %v6416_v32, %v13349_v48 }
 0xce5   :  { %v6229_v31 = vpop.f32.mrf.mxu1 }
 0xce6   :  { %v5981_v25 = vpop.f32.mrf.mxu0 }
 0xce7   :  { %v10669_v21 = vpop.f32.mrf.mxu1  ;;  %v5982_v26 = vadd.f32 %v5981_v25, %v5902_v45  ;;  %v6546_v25 = vand.u32 4294901760, %v13363_v62 }
 0xce8   :  { %v10636_v41 = vpop.f32.mrf.mxu0 }
 0xce9   :  { %v6073_v24 = vadd.f32 %v6072_v49, %v5982_v26  ;;  %v13357_v49 = vsub.f32 %v6418_v7, %v13345_v59  ;;  %v6547_v41 = vsub.f32 %v13363_v62, %v6546_v25  ;;  %v6949_v7 = vld [vmem:[%s14526_s14 + $0x58] sm:$0xff] }
 0xceb   :  { %v6532_v15 = vand.u32 4294901760, %v13357_v49  ;;  %v6548_v55 = vand.u32 4294901760, %v6547_v41  ;;  %v6946_v41 = vld [vmem:[%s14526_s14 + $0x40] sm:$0xff] }
 0xced   :  { %v6533_v21 = vsub.f32 %v13357_v49, %v6532_v15 }
 0xcee   :  { %v6152_v61 = vpop.f32.mrf.mxu0 }
 0xcef   :  { %v6387_v50 = vpop.f32.mrf.mxu1  ;;  %v6153_v43 = vadd.f32 %v6152_v61, %v6073_v24  ;;  %v6534_v2 = vand.u32 4294901760, %v6533_v21 }
 0xcf0   :  { %v10658_v58 = vpop.f32.mrf.mxu0 }
 0xcf1   :  { %v10691_v52 = vpop.f32.mrf.mxu1  ;;  %v6230_v11 = vadd.f32 %v6229_v31, %v6153_v43  ;;  %v6539_v31 = vand.u32 4294901760, %v13360_v60  ;;  %10704 = vmatpush3.msra.mxu1 %v6534_v2  ;;  %v6408_v43 = vrot.slane %v13319_v40, %v2376_v13 }
 0xcf2   :  { %10705 = vmatprep.subr.mxu1 %v14559_v0 }
 0xcf3   :  { %v6540_v45 = vsub.f32 %v13360_v60, %v6539_v31 }
 0xcf5   :  { %v6541_v26 = vand.u32 4294901760, %v6540_v45 }
 0xcf7   :  { %v6312_v36 = vpop.f32.mrf.mxu0  ;;  %10706 = vmatpush3.msra.mxu1 %v6541_v26 }
 0xcf8   :  { %v6313_v16 = vadd.f32 %v6312_v36, %v6230_v11  ;;  %10707 = vmatprep.subr.mxu1 %v14559_v0  ;;  %v6413_v36 = vrot.slane %v13319_v40, %v2384_v29 }
 0xcf9   :  { %v10680_v8 = vpop.f32.mrf.mxu0  ;;  %10708 = vmatpush3.msra.mxu1 %v6548_v55  ;;  %v13541_v55 = vand.u32 4294901760, %v6946_v41 }
 0xcfa   :  { %v6388_v23 = vadd.f32 %v6387_v50, %v6313_v16  ;;  %10709 = vmatprep.subr.mxu1 %v14559_v0 }
 0xcfc   :  { %v13325_v20 = vadd.f32 %v6388_v23, %v12280_v19  ;;  %v8844_v19 = vsub.f32 2.0, %v8843_v39  ;;  %v14558_v39 = vand.u32 4294901760, %v13460_v34 }
 0xcfe   :  { %v6392_v30 = vsel %vm1701_vm5, %v13325_v20, 0.0  ;;  %v8845_v17 = vmul.f32 %v11384_v42, %v8844_v19  ;;  %v6951_v42 = vld [vmem:[%s14526_s14 + $0x68] sm:$0xff] }
 0xcff   :  { %6393 = vadd.xlane.f32.xlu0 %v6392_v30 }
 0xd15   :  { %7609 = vrot.lane.b32.xlu0 %v7607_v10, %s11529_s9  ;;  %v13462_v10 = vand.u32 4294901760, %v6952_v1 }
 0xd17   :  { %v13471_v19 = vsub.f32 %v6952_v1, %v13462_v10 }
 0xd19   :  { %8829 = vrot.lane.b32.xlu0 %v13329_v51, %s11529_s9 }
 0xd1d   :  { %8834 = vrot.lane.b32.xlu0 %v2290_v18, %s11512_s1  ;;  %v6553_v18 = vand.u32 4294901760, %v13367_v33 }
 0xd1f   :  { %v6554_v61 = vsub.f32 %v13367_v33, %v6553_v18 }
 0xd21   :  { %8847 = vrot.lane.b32.xlu0 %v8845_v17, %s11528_s30  ;;  %v6555_v50 = vand.u32 4294901760, %v6554_v61  ;;  %v13473_v17 = vand.u32 4294901760, %v6951_v42 }
 0xd23   :  { %10710 = vmatpush3.msra.mxu1 %v6555_v50 }
 0xd24   :  { %10725 = vmatprep.subr.mxu1 %v14559_v0 }
 0xd88   :  { %v6394_v12 = vpop.xlane.xlu0 %6393 }
 0xd89   :  { %v6395_v44 = vmul.f32 0.03125, %v6394_v12  ;;  %v6950_v12 = vld [vmem:[%s14526_s14 + $0x60] sm:$0xff] }
 0xd8b   :  { %v6396_v56 = vsub.f32 %v13325_v20, %v6395_v44  ;;  %v7053_v44 = vsub.f32 %v13460_v34, %v14558_v39 }
 0xd8d   :  { %v6397_v63 = vmul.f32 %v6396_v56, %v6396_v56  ;;  %v7054_v28 = vand.u32 4294901760, %v7053_v44 }
 0xd8f   :  { %v6398_v46 = vsel %vm1701_vm5, %v6397_v63, 0.0  ;;  %v13485_v63 = vsub.f32 %v6951_v42, %v13473_v17 }
 0xd90   :  { %6399 = vadd.xlane.f32.xlu1 %v6398_v46  ;;  %v13487_v46 = vand.u32 4294901760, %v6950_v12 }
 0xe19   :  { %v6400_v24 = vpop.xlane.xlu1 %6399 }
 0xe1a   :  { %v6401_v58 = vmul.f32 0.03125, %v6400_v24  ;;  %v6945_v24 = vld [vmem:[%s14526_s14 + $0x38] sm:$0xff] }
 0xe1c   :  { %v6402_v52 = vadd.f32 1e-05, %v6401_v58 }
 0xe1e   :  { %11385 = vrsqrt.f32 %v6402_v52 }
 0xe2b   :  { %v11386_v35 = vpop.eup %11385 }
 0xe2c   :  { %v6404_v11 = vmul.f32 %v11386_v35, %v6396_v56  ;;  %v14557_v56 = vand.u32 4294901760, %v13471_v19  ;;  %v13559_v35 = vand.u32 4294901760, %v6945_v24 }
 0xe2e   :  { %v6409_v54 = vmul.f32 %v6408_v43, %v6404_v11  ;;  %v7060_v32 = vsub.f32 %v13471_v19, %v14557_v56  ;;  %v13557_v43 = vsub.f32 %v6946_v41, %v13541_v55 }
 0xe30   :  { %v6414_v16 = vadd.f32 %v6413_v36, %v6409_v54  ;;  %v6944_v36 = vld [vmem:[%s14526_s14 + $0x30] sm:$0xff] }
 0xe32   :  { %v6424_v8 = vsel %vm137_vm1, %v6414_v16, 0 }
 0xe33   :  { %v6495_v23 = vand.u32 4294901760, %v6424_v8 }
 0xe35   :  { %v6496_v30 = vsub.f32 %v6424_v8, %v6495_v23  ;;  %10712 = vmatmul.mubr.f32.vlgmr.msra.gmra.mxu1 %v6495_v23  ;;  %v14551_v8 = vand.u32 4294901760, %v13557_v43 }
 0xe36   :  { %10726 = vmatpush3.msra.mxu1 %v13345_v59  ;;  %10733 = vmatprep.mubr.msk.f32.mxu1 %vm11511_vm0, %v14559_v0 }
 0xe37   :  { %10727 = vmatprep.subr.mxu1 %v14559_v0  ;;  %v6497_v13 = vand.u32 4294901760, %v6496_v30 }
 0xe38   :  { %10728 = vmatpush3.msra.mxu1 %v13347_v27 }
 0xe39   :  { %10729 = vmatprep.subr.mxu1 %v14559_v0  ;;  %v6498_v29 = vsub.f32 %v6496_v30, %v6497_v13 }
 0xe3a   :  { %10730 = vmatpush3.msra.mxu1 %v13349_v48 }
 0xe3b   :  { %10731 = vmatprep.subr.mxu1 %v14559_v0  ;;  %v6499_v57 = vand.u32 4294901760, %v6498_v29 }
 0xe3c   :  { %10732 = vmatpush3.msra.mxu1 %v13354_v38 }
 0xe3d   :  { %10734 = vmatmul.mubr.f32.vlgmr.msra.gmra.mxu1 %v6497_v13  ;;  %10747 = vmatprep.subr.mxu1 %v14559_v0  ;;  %v6943_v13 = vld [vmem:[%s14526_s14 + $0x28] sm:$0xff] }
 0xe3e   :  { %10701 = vmatmul.mubr.f32.vlgmr.msra.gmra.mxu0 %v6499_v57  ;;  %10748 = vmatpush3.msra.mxu1 %v13345_v59  ;;  %v14556_v59 = vand.u32 4294901760, %v13485_v63  ;;  %v7102_v57 = vsub.f32 %v13557_v43, %v14551_v8  ;;  %v13586_v1 = vand.u32 4294901760, %v6943_v13 }
 0xe3f   :  { %10715 = vmatpush3.msra.mxu0 %v13357_v49  ;;  %10749 = vmatprep.subr.mxu1 %v14559_v0 }
 0xe40   :  { %10716 = vmatprep.subr.mxu0 %v14559_v0  ;;  %10750 = vmatpush3.msra.mxu1 %v13347_v27  ;;  %v13499_v27 = vsub.f32 %v6950_v12, %v13487_v46  ;;  %v7067_v49 = vsub.f32 %v13485_v63, %v14556_v59  ;;  %v6942_v12 = vld [vmem:[%s14526_s14 + $0x20] sm:$0xff]  ;;  %v7103_v44 = vand.u32 4294901760, %v7102_v57 }
 0xe41   :  { %10717 = vmatpush3.msra.mxu0 %v13360_v60  ;;  %10751 = vmatprep.subr.mxu1 %v14559_v0 }
 0xe42   :  { %10718 = vmatprep.subr.mxu0 %v14559_v0  ;;  %10752 = vmatpush3.msra.mxu1 %v13349_v48  ;;  %v13502_v48 = vand.u32 4294901760, %v6949_v7  ;;  %v14555_v60 = vand.u32 4294901760, %v13499_v27 }
 0xe43   :  { %10719 = vmatpush3.msra.mxu0 %v13363_v62  ;;  %10753 = vmatprep.subr.mxu1 %v14559_v0  ;;  %v13512_v62 = vand.u32 4294901760, %v6948_v22 }
 0xe44   :  { %10720 = vmatprep.subr.mxu0 %v14559_v0  ;;  %10722 = vmatprep.mubr.msk.f32.mxu0 %vm11511_vm0, %v14559_v0 }
 0xe45   :  { %10721 = vmatpush3.msra.mxu0 %v13367_v33  ;;  %10754 = vmatpush3.msra.mxu1 %v13354_v38  ;;  %v7061_v38 = vand.u32 4294901760, %v7060_v32  ;;  %v13516_v33 = vsub.f32 %v6949_v7, %v13502_v48  ;;  %v13603_v32 = vand.u32 4294901760, %v6942_v12 }
 0xe46   :  { %10755 = vmatprep.mubr.msk.f32.mxu1 %vm11511_vm0, %v14559_v0  ;;  %10723 = vmatmul.mubr.f32.vlgmr.msra.gmra.mxu0 %v6496_v30  ;;  %v13575_v30 = vand.u32 4294901760, %v6944_v36 }
 0xe47   :  { %10736 = vmatprep.subr.mxu0 %v14559_v0  ;;  %10756 = vmatmul.mubr.f32.vlgmr.msra.gmra.mxu1 %v6495_v23  ;;  %v14554_v45 = vand.u32 4294901760, %v13516_v33 }
 0xe48   :  { %10737 = vmatpush3.msra.mxu0 %v6532_v15  ;;  %10744 = vmatprep.mubr.msk.f32.mxu0 %vm11511_vm0, %v14559_v0  ;;  %v6947_v15 = vld [vmem:[%s14526_s14 + $0x48] sm:$0xff]  ;;  %v13590_v42 = vsub.f32 %v6944_v36, %v13575_v30 }
 0xe49   :  { %10738 = vmatprep.subr.mxu0 %v14559_v0  ;;  %10793 = vmatprep.subr.mxu1 %v14559_v0  ;;  %v13528_v21 = vand.u32 4294901760, %v6947_v15  ;;  %v7081_v50 = vsub.f32 %v13516_v33, %v14554_v45 }
 0xe4a   :  { %10739 = vmatpush3.msra.mxu0 %v6539_v31  ;;  %10825 = vmatprep.mubr.msk.f32.mxu1 %vm11511_vm0, %v14559_v0  ;;  %v7068_v31 = vand.u32 4294901760, %v7067_v49 }
 0xe4b   :  { %10740 = vmatprep.subr.mxu0 %v14559_v0  ;;  %10794 = vmatpush3.msra.mxu1 %v7054_v28  ;;  %v13539_v61 = vsub.f32 %v6947_v15, %v13528_v21  ;;  %v7082_v11 = vand.u32 4294901760, %v7081_v50  ;;  %v13601_v28 = vsub.f32 %v6943_v13, %v13586_v1 }
 0xe4c   :  { %10741 = vmatpush3.msra.mxu0 %v6546_v25  ;;  %10795 = vmatprep.subr.mxu1 %v14559_v0  ;;  %v7074_v25 = vsub.f32 %v13499_v27, %v14555_v60 }
 0xe4d   :  { %10742 = vmatprep.subr.mxu0 %v14559_v0  ;;  %10796 = vmatpush3.msra.mxu1 %v7061_v38  ;;  %v14552_v52 = vand.u32 4294901760, %v13539_v61  ;;  %v6941_v38 = vld [vmem:[%s14526_s14 + $0x18] sm:$0xff]  ;;  %v14547_v15 = vand.u32 4294901760, %v13601_v28 }
 0xe4e   :  { %10743 = vmatpush3.msra.mxu0 %v6553_v18  ;;  %v13526_v18 = vsub.f32 %v6948_v22, %v13512_v62  ;;  %10797 = vmatprep.subr.mxu1 %v14559_v0  ;;  %v7075_v2 = vand.u32 4294901760, %v7074_v25  ;;  %v14549_v22 = vand.u32 4294901760, %v13590_v42  ;;  %v13616_v25 = vand.u32 4294901760, %v6941_v38 }
 0xe4f   :  { %10745 = vmatmul.mubr.f32.vlgmr.msra.gmra.mxu0 %v6495_v23  ;;  %10758 = vmatprep.subr.mxu0 %v14559_v0  ;;  %v7095_v16 = vsub.f32 %v13539_v61, %v14552_v52  ;;  %v13572_v23 = vsub.f32 %v6945_v24, %v13559_v35  ;;  %v7123_v50 = vsub.f32 %v13601_v28, %v14547_v15 }
 0xe50   :  { %10790 = vmatprep.mubr.msk.f32.mxu0 %vm11511_vm0, %v14559_v0  ;;  %10759 = vmatpush3.msra.mxu0 %v13454_v47  ;;  %v14553_v26 = vand.u32 4294901760, %v13526_v18  ;;  %v7116_v41 = vsub.f32 %v13590_v42, %v14549_v22 }
 0xe51   :  { %10760 = vmatprep.subr.mxu0 %v14559_v0  ;;  %10798 = vmatpush3.msra.mxu1 %v7068_v31  ;;  %v7096_v29 = vand.u32 4294901760, %v7095_v16  ;;  %v14550_v9 = vand.u32 4294901760, %v13572_v23  ;;  %v13614_v31 = vsub.f32 %v6942_v12, %v13603_v32  ;;  %v7124_v16 = vand.u32 4294901760, %v7123_v50 }
 0xe52   :  { %10761 = vmatpush3.msra.mxu0 %v13462_v10  ;;  %10799 = vmatprep.subr.mxu1 %v14559_v0  ;;  %v7088_v58 = vsub.f32 %v13526_v18, %v14553_v26  ;;  %v7117_v36 = vand.u32 4294901760, %v7116_v41 }
 0xe53   :  { %10762 = vmatprep.subr.mxu0 %v14559_v0  ;;  %10800 = vmatpush3.msra.mxu1 %v7075_v2  ;;  %v7109_v7 = vsub.f32 %v13572_v23, %v14550_v9  ;;  %v6940_v2 = vld [vmem:[%s14526_s14 + $0x10] sm:$0xff]  ;;  %v14546_v24 = vand.u32 4294901760, %v13614_v31 }
 0xe54   :  { %10763 = vmatpush3.msra.mxu0 %v13473_v17  ;;  %10801 = vmatprep.subr.mxu1 %v14559_v0  ;;  %v7089_v54 = vand.u32 4294901760, %v7088_v58  ;;  %v13632_v58 = vsub.f32 %v6941_v38, %v13616_v25 }
 0xe55   :  { %10764 = vmatprep.subr.mxu0 %v14559_v0  ;;  %10802 = vmatpush3.msra.mxu1 %v7082_v11  ;;  %v7110_v49 = vand.u32 4294901760, %v7109_v7  ;;  %v13634_v11 = vand.u32 4294901760, %v6940_v2  ;;  %v7130_v13 = vsub.f32 %v13614_v31, %v14546_v24 }
 0xe56   :  { %10765 = vmatpush3.msra.mxu0 %v13487_v46  ;;  %10803 = vmatprep.subr.mxu1 %v14559_v0 }
 0xe57   :  { %10766 = vmatprep.subr.mxu0 %v14559_v0  ;;  %10804 = vmatpush3.msra.mxu1 %v7089_v54  ;;  %v6939_v54 = vld [vmem:[%s14526_s14 + $0x8] sm:$0xff]  ;;  %v13647_v57 = vsub.f32 %v6940_v2, %v13634_v11  ;;  %v7131_v7 = vand.u32 4294901760, %v7130_v13 }
 0xe58   :  { %10767 = vmatpush3.msra.mxu0 %v13502_v48  ;;  %10805 = vmatprep.subr.mxu1 %v14559_v0  ;;  %v13650_v12 = vand.u32 4294901760, %v6939_v54 }
 0xe59   :  { %10768 = vmatprep.subr.mxu0 %v14559_v0  ;;  %10806 = vmatpush3.msra.mxu1 %v7096_v29  ;;  %v14545_v29 = vand.u32 4294901760, %v13632_v58 }
 0xe5a   :  { %10769 = vmatpush3.msra.mxu0 %v13512_v62  ;;  %10807 = vmatprep.subr.mxu1 %v14559_v0  ;;  %v13665_v2 = vsub.f32 %v6939_v54, %v13650_v12 }
 0xe5b   :  { %10770 = vmatprep.subr.mxu0 %v14559_v0  ;;  %10808 = vmatpush3.msra.mxu1 %v7103_v44  ;;  %v6938_v44 = vld [vmem:[%s14526_s14] sm:$0xff]  ;;  %v7137_v38 = vsub.f32 %v13632_v58, %v14545_v29 }
 0xe5c   :  { %10771 = vmatpush3.msra.mxu0 %v13528_v21  ;;  %10809 = vmatprep.subr.mxu1 %v14559_v0  ;;  %v13661_v41 = vand.u32 4294901760, %v6938_v44  ;;  %v13691_v29 = vld [vmem:[#allocation7] sm:$0x3] }
 0xe5d   :  { %10772 = vmatprep.subr.mxu0 %v14559_v0  ;;  %10810 = vmatpush3.msra.mxu1 %v7110_v49  ;;  %v14543_v49 = vand.u32 4294901760, %v13647_v57  ;;  %v7138_v50 = vand.u32 4294901760, %v7137_v38  ;;  %14593 = vst [vmem:[#allocation16_spill] sm:$0xff] %v13691_v29 }
 0xe5e   :  { %10773 = vmatpush3.msra.mxu0 %v13541_v55  ;;  %10811 = vmatprep.subr.mxu1 %v14559_v0  ;;  %v13673_v13 = vsub.f32 %v6938_v44, %v13661_v41 }
 0xe5f   :  { %10774 = vmatprep.subr.mxu0 %v14559_v0  ;;  %10812 = vmatpush3.msra.mxu1 %v7117_v36  ;;  %v7144_v36 = vsub.f32 %v13647_v57, %v14543_v49 }
 0xe60   :  { %10775 = vmatpush3.msra.mxu0 %v13559_v35  ;;  %10813 = vmatprep.subr.mxu1 %v14559_v0  ;;  %v14548_v5 = vand.u32 4294901760, %v13673_v13 }
 0xe61   :  { %10776 = vmatprep.subr.mxu0 %v14559_v0  ;;  %10814 = vmatpush3.msra.mxu1 %v7124_v16  ;;  %v14544_v16 = vand.u32 4294901760, %v13665_v2  ;;  %v7145_v54 = vand.u32 4294901760, %v7144_v36 }
 0xe62   :  { %10777 = vmatpush3.msra.mxu0 %v13575_v30  ;;  %10815 = vmatprep.subr.mxu1 %v14559_v0 }
 0xe63   :  { %10778 = vmatprep.subr.mxu0 %v14559_v0  ;;  %10816 = vmatpush3.msra.mxu1 %v7131_v7  ;;  %v7151_v44 = vsub.f32 %v13665_v2, %v14544_v16  ;;  %v7158_v7 = vsub.f32 %v13673_v13, %v14548_v5 }
 0xe64   :  { %10779 = vmatpush3.msra.mxu0 %v13586_v1  ;;  %10817 = vmatprep.subr.mxu1 %v14559_v0 }
 0xe65   :  { %10780 = vmatprep.subr.mxu0 %v14559_v0  ;;  %10818 = vmatpush3.msra.mxu1 %v7138_v50  ;;  %v7152_v38 = vand.u32 4294901760, %v7151_v44  ;;  %v7159_v36 = vand.u32 4294901760, %v7158_v7 }
 0xe66   :  { %10781 = vmatpush3.msra.mxu0 %v13603_v32  ;;  %10819 = vmatprep.subr.mxu1 %v14559_v0 }
 0xe67   :  { %10782 = vmatprep.subr.mxu0 %v14559_v0  ;;  %10820 = vmatpush3.msra.mxu1 %v7145_v54  ;;  %v6422_v54 = vrot.slane %v13691_v29, %v12192_v37 }
 0xe68   :  { %10783 = vmatpush3.msra.mxu0 %v13616_v25  ;;  %10821 = vmatprep.subr.mxu1 %v14559_v0 }
 0xe69   :  { %10784 = vmatprep.subr.mxu0 %v14559_v0  ;;  %10822 = vmatpush3.msra.mxu1 %v7152_v38 }
 0xe6a   :  { %10785 = vmatpush3.msra.mxu0 %v13634_v11  ;;  %10823 = vmatprep.subr.mxu1 %v14559_v0 }
 0xe6b   :  { %10786 = vmatprep.subr.mxu0 %v14559_v0  ;;  %10824 = vmatpush3.msra.mxu1 %v7159_v36 }
 0xe6c   :  { %10787 = vmatpush3.msra.mxu0 %v13650_v12  ;;  %10863 = vmatprep.subr.mxu1 %v14559_v0 }
 0xe6d   :  { %10788 = vmatprep.subr.mxu0 %v14559_v0 }
 0xe6e   :  { %10789 = vmatpush3.msra.mxu0 %v13661_v41 }
 0xe6f   :  { %10828 = vmatprep.subr.mxu0 %v14559_v0 }
 0xef5   :  { %v6592_v50 = vpop.f32.mrf.mxu1 }
 0xef7   :  { %v10713_v49 = vpop.f32.mrf.mxu1 }
 0xefd   :  { %v6749_v16 = vpop.f32.mrf.mxu1 }
 0xefe   :  { %v6501_v24 = vpop.f32.mrf.mxu0 }
 0xeff   :  { %v10735_v15 = vpop.f32.mrf.mxu1  ;;  %v6502_v5 = vadd.f32 %v6501_v24, %v6422_v54 }
 0xf00   :  { %v10702_v44 = vpop.f32.mrf.mxu0 }
 0xf01   :  { %v6593_v38 = vadd.f32 %v6592_v50, %v6502_v5 }
 0xf06   :  { %v6672_v22 = vpop.f32.mrf.mxu0 }
 0xf07   :  { %v6907_v7 = vpop.f32.mrf.mxu1  ;;  %v6673_v36 = vadd.f32 %v6672_v22, %v6593_v38 }
 0xf08   :  { %v10724_v9 = vpop.f32.mrf.mxu0 }
 0xf09   :  { %v10757_v8 = vpop.f32.mrf.mxu1  ;;  %v6750_v52 = vadd.f32 %v6749_v16, %v6673_v36 }
 0xf0f   :  { %v6832_v26 = vpop.f32.mrf.mxu0 }
 0xf10   :  { %v6833_v45 = vadd.f32 %v6832_v26, %v6750_v52 }
 0xf11   :  { %v10746_v49 = vpop.f32.mrf.mxu0 }
 0xf12   :  { %v6908_v60 = vadd.f32 %v6907_v7, %v6833_v45 }
 0xf14   :  { %v6912_v59 = vmul.f32 0.70710677, %v6908_v60  ;;  %v6911_v36 = vmul.f32 0.5, %v6908_v60 }
 0xf16   :  { %v6913_v56 = vand.u32 2147483647, %v6912_v59  ;;  %vm6933_vm9 = vcmp.ge.f32.partialorder %v6912_v59, 0.0 }
 0xf18   :  { %v6914_v39 = vmul.f32 0.3275911, %v6913_v56  ;;  %v6927_v0 = vsub.f32 0.0, %v6913_v56 }
 0xf1a   :  { %v6915_v15 = vadd.f32 1.0, %v6914_v39  ;;  %v6928_v6 = vmul.f32 %v6927_v0, %v6913_v56 }
 0xf1c   :  { %11387 = vrcp.f32 %v6915_v15  ;;  %v6929_v54 = vmul.f32 1.442695, %v6928_v6 }
 0xf1e   :  { %11389 = vpow2.f32 %v6929_v54 }
 0xf29   :  { %v11388_v44 = vpop.eup %11387 }
 0xf2a   :  { %v6918_v24 = vmul.f32 1.0614054, %v11388_v44 }
 0xf2b   :  { %v11390_v45 = vpop.eup %11389 }
 0xf2c   :  { %v6919_v29 = vadd.f32 -1.4531521, %v6918_v24 }
 0xf2e   :  { %v6920_v5 = vmul.f32 %v11388_v44, %v6919_v29  ;;  %v14594_v29 = vmov 0.0  }
 0xf30   :  { %v6921_v8 = vadd.f32 1.4214138, %v6920_v5 }
 0xf32   :  { %v6922_v9 = vmul.f32 %v11388_v44, %v6921_v8 }
 0xf34   :  { %v6923_v22 = vadd.f32 -0.28449672, %v6922_v9  ;;  %v7610_v9 = vpop.permute.xlu0 %7609 }
 0xf36   :  { %v6924_v16 = vmul.f32 %v11388_v44, %v6923_v22 }
 0xf38   :  { %v6925_v26 = vadd.f32 0.2548296, %v6924_v16 }
 0xf3a   :  { %v6926_v52 = vmul.f32 %v11388_v44, %v6925_v26 }
 0xf3c   :  { %v6931_v50 = vmul.f32 %v11390_v45, %v6926_v52 }
 0xf3e   :  { %v6932_v7 = vsub.f32 1.0, %v6931_v50 }
 0xf40   :  { %v6934_v38 = vsub.f32 0.0, %v6932_v7 }
 0xf42   :  { %v6935_v39 = vsel %vm6933_vm9, %v6932_v7, %v6934_v38  ;;  %v7646_v7 = vld [vmem:[%s14527_s15 + $0x10] sm:$0xff] }
 0xf43   :  { %v6936_v0 = vadd.f32 1.0, %v6935_v39  ;;  %v13886_v39 = vand.u32 4294901760, %v7646_v7 }
 0xf45   :  { %v6937_v56 = vmul.f32 %v6936_v0, %v6911_v36  ;;  %v13895_v0 = vsub.f32 %v7646_v7, %v13886_v39  ;;  %v8177_v7 = vld [vmem:[%s14528_s16 + $0x50] sm:$0xff] }
 0xf47   :  { %v13695_v49 = vand.u32 4294901760, %v6937_v56 }
 0xf49   :  { %10826 = vmatmul.mubr.f32.vlgmr.msra.gmra.mxu1 %v13695_v49  ;;  %v13699_v6 = vsub.f32 %v6937_v56, %v13695_v49 }
 0xf4a   :  { %10864 = vmatpush3.msra.mxu1 %v13454_v47  ;;  %10895 = vmatprep.mubr.msk.f32.mxu1 %vm11511_vm0, %v14594_v29 }
 0xf4b   :  { %10865 = vmatprep.subr.mxu1 %v14594_v29  ;;  %v7041_v59 = vand.u32 4294901760, %v13699_v6 }
 0xf4c   :  { %10866 = vmatpush3.msra.mxu1 %v13462_v10 }
 0xf4d   :  { %10867 = vmatprep.subr.mxu1 %v14594_v29  ;;  %v7042_v60 = vsub.f32 %v13699_v6, %v7041_v59 }
 0xf4e   :  { %10868 = vmatpush3.msra.mxu1 %v13473_v17 }
 0xf4f   :  { %10869 = vmatprep.subr.mxu1 %v14594_v29  ;;  %v7043_v15 = vand.u32 4294901760, %v7042_v60 }
 0xf50   :  { %10870 = vmatpush3.msra.mxu1 %v13487_v46 }
 0xf51   :  { %10871 = vmatprep.subr.mxu1 %v14594_v29  ;;  %10791 = vmatmul.mubr.f32.vlgmr.msra.gmra.mxu0 %v7043_v15 }
 0xf52   :  { %10829 = vmatpush3.msra.mxu0 %v13460_v34  ;;  %10872 = vmatpush3.msra.mxu1 %v13502_v48 }
 0xf53   :  { %10830 = vmatprep.subr.mxu0 %v14594_v29  ;;  %10873 = vmatprep.subr.mxu1 %v14594_v29 }
 0xf54   :  { %10831 = vmatpush3.msra.mxu0 %v13471_v19  ;;  %10874 = vmatpush3.msra.mxu1 %v13512_v62 }
 0xf55   :  { %10832 = vmatprep.subr.mxu0 %v14594_v29  ;;  %10875 = vmatprep.subr.mxu1 %v14594_v29 }
 0xf56   :  { %10833 = vmatpush3.msra.mxu0 %v13485_v63  ;;  %10876 = vmatpush3.msra.mxu1 %v13528_v21 }
 0xf57   :  { %10834 = vmatprep.subr.mxu0 %v14594_v29  ;;  %10877 = vmatprep.subr.mxu1 %v14594_v29 }
 0xf58   :  { %10835 = vmatpush3.msra.mxu0 %v13499_v27  ;;  %10878 = vmatpush3.msra.mxu1 %v13541_v55 }
 0xf59   :  { %10836 = vmatprep.subr.mxu0 %v14594_v29  ;;  %10879 = vmatprep.subr.mxu1 %v14594_v29 }
 0xf5a   :  { %10837 = vmatpush3.msra.mxu0 %v13516_v33  ;;  %10880 = vmatpush3.msra.mxu1 %v13559_v35 }
 0xf5b   :  { %10838 = vmatprep.subr.mxu0 %v14594_v29  ;;  %10881 = vmatprep.subr.mxu1 %v14594_v29 }
 0xf5c   :  { %10839 = vmatpush3.msra.mxu0 %v13526_v18  ;;  %10882 = vmatpush3.msra.mxu1 %v13575_v30 }
 0xf5d   :  { %10840 = vmatprep.subr.mxu0 %v14594_v29  ;;  %10883 = vmatprep.subr.mxu1 %v14594_v29 }
 0xf5e   :  { %10841 = vmatpush3.msra.mxu0 %v13539_v61  ;;  %10884 = vmatpush3.msra.mxu1 %v13586_v1 }
 0xf5f   :  { %10842 = vmatprep.subr.mxu0 %v14594_v29  ;;  %10885 = vmatprep.subr.mxu1 %v14594_v29 }
 0xf60   :  { %10843 = vmatpush3.msra.mxu0 %v13557_v43  ;;  %10886 = vmatpush3.msra.mxu1 %v13603_v32 }
 0xf61   :  { %10844 = vmatprep.subr.mxu0 %v14594_v29  ;;  %10887 = vmatprep.subr.mxu1 %v14594_v29 }
 0xf62   :  { %10845 = vmatpush3.msra.mxu0 %v13572_v23  ;;  %10888 = vmatpush3.msra.mxu1 %v13616_v25 }
 0xf63   :  { %10846 = vmatprep.subr.mxu0 %v14594_v29  ;;  %10889 = vmatprep.subr.mxu1 %v14594_v29 }
 0xf64   :  { %10847 = vmatpush3.msra.mxu0 %v13590_v42  ;;  %10890 = vmatpush3.msra.mxu1 %v13634_v11 }
 0xf65   :  { %10848 = vmatprep.subr.mxu0 %v14594_v29  ;;  %10891 = vmatprep.subr.mxu1 %v14594_v29 }
 0xf66   :  { %10849 = vmatpush3.msra.mxu0 %v13601_v28  ;;  %10892 = vmatpush3.msra.mxu1 %v13650_v12 }
 0xf67   :  { %10850 = vmatprep.subr.mxu0 %v14594_v29  ;;  %10893 = vmatprep.subr.mxu1 %v14594_v29 }
 0xf68   :  { %10851 = vmatpush3.msra.mxu0 %v13614_v31  ;;  %10894 = vmatpush3.msra.mxu1 %v13661_v41 }
 0xf69   :  { %10852 = vmatprep.subr.mxu0 %v14594_v29  ;;  %10896 = vmatmul.mubr.f32.vlgmr.msra.gmra.mxu1 %v7041_v59  ;;  %v7768_v59 = vand.u32 4294901760, %v13895_v0 }
 0xf6a   :  { %10933 = vmatprep.subr.mxu1 %v14594_v29  ;;  %10853 = vmatpush3.msra.mxu0 %v13632_v58 }
 0xf6b   :  { %10934 = vmatpush3.msra.mxu1 %v13454_v47  ;;  %10854 = vmatprep.subr.mxu0 %v14594_v29  ;;  %v14595_v47 = vand.u32 4294901760, %v13460_v34  ;;  %v14598_v34 = vand.u32 4294901760, %v13499_v27  ;;  %v14602_v27 = vand.u32 4294901760, %v13557_v43  ;;  %v14610_v43 = vand.u32 4294901760, %v13673_v13 }
 0xf6c   :  { %10935 = vmatprep.subr.mxu1 %v14594_v29  ;;  %10855 = vmatpush3.msra.mxu0 %v13647_v57 }
 0xf6d   :  { %10936 = vmatpush3.msra.mxu1 %v13462_v10  ;;  %10856 = vmatprep.subr.mxu0 %v14594_v29  ;;  %v14596_v10 = vand.u32 4294901760, %v13471_v19  ;;  %v14599_v19 = vand.u32 4294901760, %v13516_v33  ;;  %v14605_v33 = vand.u32 4294901760, %v13601_v28 }
 0xf6e   :  { %10937 = vmatprep.subr.mxu1 %v14594_v29  ;;  %10857 = vmatpush3.msra.mxu0 %v13665_v2 }
 0xf6f   :  { %10938 = vmatpush3.msra.mxu1 %v13473_v17  ;;  %10858 = vmatprep.subr.mxu0 %v14594_v29  ;;  %v14597_v17 = vand.u32 4294901760, %v13485_v63  ;;  %v14600_v63 = vand.u32 4294901760, %v13526_v18  ;;  %v14606_v18 = vand.u32 4294901760, %v13614_v31 }
 0xf70   :  { %10939 = vmatprep.subr.mxu1 %v14594_v29  ;;  %10859 = vmatpush3.msra.mxu0 %v13673_v13 }
 0xf71   :  { %10860 = vmatprep.mubr.msk.f32.mxu0 %vm11511_vm0, %v14594_v29  ;;  %10940 = vmatpush3.msra.mxu1 %v13487_v46  ;;  %v14601_v46 = vand.u32 4294901760, %v13539_v61  ;;  %v14608_v61 = vand.u32 4294901760, %v13647_v57 }
 0xf72   :  { %10861 = vmatmul.mubr.f32.vlgmr.msra.gmra.mxu0 %v13699_v6  ;;  %10898 = vmatprep.subr.mxu0 %v14594_v29 }
 0xf73   :  { %10941 = vmatprep.subr.mxu1 %v14594_v29  ;;  %10899 = vmatpush3.msra.mxu0 %v14595_v47 }
 0xf74   :  { %10942 = vmatpush3.msra.mxu1 %v13502_v48  ;;  %10900 = vmatprep.subr.mxu0 %v14594_v29  ;;  %v14603_v48 = vand.u32 4294901760, %v13572_v23 }
 0xf75   :  { %10943 = vmatprep.subr.mxu1 %v14594_v29  ;;  %10901 = vmatpush3.msra.mxu0 %v14596_v10  ;;  %v7769_v10 = vsub.f32 %v13895_v0, %v7768_v59 }
 0xf76   :  { %10944 = vmatpush3.msra.mxu1 %v13512_v62  ;;  %10902 = vmatprep.subr.mxu0 %v14594_v29  ;;  %v14604_v62 = vand.u32 4294901760, %v13590_v42 }
 0xf77   :  { %10945 = vmatprep.subr.mxu1 %v14594_v29  ;;  %10903 = vmatpush3.msra.mxu0 %v14597_v17 }
 0xf78   :  { %10946 = vmatpush3.msra.mxu1 %v13528_v21  ;;  %10904 = vmatprep.subr.mxu0 %v14594_v29  ;;  %v14607_v21 = vand.u32 4294901760, %v13632_v58 }
 0xf79   :  { %10947 = vmatprep.subr.mxu1 %v14594_v29  ;;  %10905 = vmatpush3.msra.mxu0 %v14598_v34 }
 0xf7a   :  { %10948 = vmatpush3.msra.mxu1 %v13541_v55  ;;  %10906 = vmatprep.subr.mxu0 %v14594_v29  ;;  %v14609_v55 = vand.u32 4294901760, %v13665_v2 }
 0xf7b   :  { %10949 = vmatprep.subr.mxu1 %v14594_v29  ;;  %10907 = vmatpush3.msra.mxu0 %v14599_v19  ;;  %v7770_v19 = vand.u32 4294901760, %v7769_v10 }
 0xf7c   :  { %10950 = vmatpush3.msra.mxu1 %v13559_v35  ;;  %10908 = vmatprep.subr.mxu0 %v14594_v29 }
 0xf7d   :  { %10951 = vmatprep.subr.mxu1 %v14594_v29  ;;  %10909 = vmatpush3.msra.mxu0 %v14600_v63 }
 0xf7e   :  { %10952 = vmatpush3.msra.mxu1 %v13575_v30  ;;  %10910 = vmatprep.subr.mxu0 %v14594_v29 }
 0xf7f   :  { %10953 = vmatprep.subr.mxu1 %v14594_v29  ;;  %10911 = vmatpush3.msra.mxu0 %v14601_v46 }
 0xf80   :  { %10954 = vmatpush3.msra.mxu1 %v13586_v1  ;;  %10912 = vmatprep.subr.mxu0 %v14594_v29 }
 0xf81   :  { %10955 = vmatprep.subr.mxu1 %v14594_v29  ;;  %10913 = vmatpush3.msra.mxu0 %v14602_v27 }
 0xf82   :  { %10956 = vmatpush3.msra.mxu1 %v13603_v32  ;;  %10914 = vmatprep.subr.mxu0 %v14594_v29 }
 0xf83   :  { %10957 = vmatprep.subr.mxu1 %v14594_v29  ;;  %10915 = vmatpush3.msra.mxu0 %v14603_v48 }
 0xf84   :  { %10958 = vmatpush3.msra.mxu1 %v13616_v25  ;;  %10916 = vmatprep.subr.mxu0 %v14594_v29  ;;  %v14611_v25 = vsub.s32 7, %v12189_v4 }
 0xf85   :  { %10959 = vmatprep.subr.mxu1 %v14594_v29  ;;  %10917 = vmatpush3.msra.mxu0 %v14604_v62 }
 0xf86   :  { %10960 = vmatpush3.msra.mxu1 %v13634_v11  ;;  %10918 = vmatprep.subr.mxu0 %v14594_v29  ;;  %v6957_v58 = vrot.slane %v13319_v40, %v14611_v25 }
 0xf87   :  { %10961 = vmatprep.subr.mxu1 %v14594_v29  ;;  %10919 = vmatpush3.msra.mxu0 %v14605_v33 }
 0xf88   :  { %10962 = vmatpush3.msra.mxu1 %v13650_v12  ;;  %10920 = vmatprep.subr.mxu0 %v14594_v29 }
 0xf89   :  { %10963 = vmatprep.subr.mxu1 %v14594_v29  ;;  %10921 = vmatpush3.msra.mxu0 %v14606_v18 }
 0xf8a   :  { %10964 = vmatpush3.msra.mxu1 %v13661_v41  ;;  %10965 = vmatprep.mubr.msk.f32.mxu1 %vm11511_vm0, %v14594_v29 }
 0xf8b   :  { %10922 = vmatprep.subr.mxu0 %v14594_v29  ;;  %10966 = vmatmul.mubr.f32.vlgmr.msra.gmra.mxu1 %v13695_v49 }
 0xf8c   :  { %10923 = vmatpush3.msra.mxu0 %v14607_v21  ;;  %10930 = vmatprep.mubr.msk.f32.mxu0 %vm11511_vm0, %v14594_v29 }
 0xf8d   :  { %10924 = vmatprep.subr.mxu0 %v14594_v29  ;;  %10979 = vmatprep.subr.mxu1 %v14594_v29 }
 0xf8e   :  { %10925 = vmatpush3.msra.mxu0 %v14608_v61  ;;  %10987 = vmatprep.mubr.msk.f32.mxu1 %vm11511_vm0, %v14594_v29  ;;  %v13938_v61 = vld [vmem:[%s14529_s17 + $0x10] sm:$0x7] }
 0xf8f   :  { %10926 = vmatprep.subr.mxu0 %v14594_v29 }
 0xf90   :  { %10927 = vmatpush3.msra.mxu0 %v14609_v55  ;;  %v7630_v55 = vrot.slane %v13938_v61, %v12192_v37 }
 0xf91   :  { %10928 = vmatprep.subr.mxu0 %v14594_v29 }
 0xf92   :  { %10929 = vmatpush3.msra.mxu0 %v14610_v43 }
 0xf93   :  { %10931 = vmatmul.mubr.f32.vlgmr.msra.gmra.mxu0 %v13695_v49  ;;  %10968 = vmatprep.subr.mxu0 %v14594_v29  ;;  %v7644_v49 = vld [vmem:[%s14527_s15] sm:$0xff] }
 0xf94   :  { %10976 = vmatprep.mubr.msk.f32.mxu0 %vm11511_vm0, %v14594_v29  ;;  %v13911_v15 = vand.u32 4294901760, %v7644_v49 }
 0xf96   :  { %v13920_v34 = vsub.f32 %v7644_v49, %v13911_v15 }
 0xf98   :  { %v7782_v46 = vand.u32 4294901760, %v13920_v34 }
 0xf9a   :  { %v7783_v48 = vsub.f32 %v13920_v34, %v7782_v46 }
 0xf9c   :  { %v7784_v62 = vand.u32 4294901760, %v7783_v48 }
0x1009   :  { %v7196_v35 = vpop.f32.mrf.mxu1 }
0x100b   :  { %v10827_v23 = vpop.f32.mrf.mxu1 }
0x100c   :  { %v7635_v23 = vrot.slane %v13938_v61, %v12259_v53 }
0x1011   :  { %v7045_v30 = vpop.f32.mrf.mxu0 }
0x1012   :  { %v7046_v11 = vadd.f32 %v7045_v30, %v6957_v58 }
0x1013   :  { %v10792_v1 = vpop.f32.mrf.mxu0 }
0x1014   :  { %v7197_v12 = vadd.f32 %v7196_v35, %v7046_v11 }
0x1029   :  { %v7389_v42 = vpop.f32.mrf.mxu1 }
0x102b   :  { %v10897_v28 = vpop.f32.mrf.mxu1 }
0x1032   :  { %v7300_v32 = vpop.f32.mrf.mxu0 }
0x1033   :  { %v7301_v2 = vadd.f32 %v7300_v32, %v7197_v12 }
0x1034   :  { %v10862_v31 = vpop.f32.mrf.mxu0 }
0x1035   :  { %v7390_v13 = vadd.f32 %v7389_v42, %v7301_v2 }
0x104b   :  { %v7595_v57 = vpop.f32.mrf.mxu1 }
0x104d   :  { %v10967_v41 = vpop.f32.mrf.mxu1 }
0x104e   :  { %v8181_v41 = vld [vmem:[%s14528_s16 + $0x70] sm:$0xff] }
0x1053   :  { %v7508_v44 = vpop.f32.mrf.mxu0 }
0x1054   :  { %v7509_v24 = vadd.f32 %v7508_v44, %v7390_v13  ;;  %v14005_v13 = vand.u32 4294901760, %v8181_v41  ;;  %v8180_v44 = vld [vmem:[%s14528_s16 + $0x68] sm:$0xff] }
0x1055   :  { %v10932_v54 = vpop.f32.mrf.mxu0 }
0x1056   :  { %v7596_v5 = vadd.f32 %v7595_v57, %v7509_v24  ;;  %v8182_v57 = vld [vmem:[%s14528_s16 + $0x78] sm:$0xff]  ;;  %v14014_v54 = vsub.f32 %v8181_v41, %v14005_v13 }
0x1057   :  { %v13997_v12 = vand.u32 4294901760, %v8182_v57 }
0x1058   :  { %v7599_v8 = vadd.f32 %v7596_v5, %v13325_v20  ;;  %v14016_v5 = vand.u32 4294901760, %v8180_v44 }
0x1059   :  { %v14003_v2 = vsub.f32 %v8182_v57, %v13997_v12 }
0x105a   :  { %v7612_v22 = vmul.f32 %v7610_v9, %v7599_v8  ;;  %v8179_v8 = vld [vmem:[%s14528_s16 + $0x60] sm:$0xff] }
0x105b   :  { %v8281_v24 = vand.u32 4294901760, %v14003_v2 }
0x105c   :  { %v13867_v16 = vadd.f32 %v7612_v22, %v12276_v14  ;;  %v7647_v14 = vld [vmem:[%s14527_s15 + $0x18] sm:$0xff]  ;;  %v8288_v22 = vand.u32 4294901760, %v14014_v54 }
0x105d   :  { %v13878_v20 = vand.u32 4294901760, %v7647_v14  ;;  %v8282_v9 = vsub.f32 %v14003_v2, %v8281_v24 }
0x105e   :  { %v7614_v4 = vsel %vm1701_vm5, %v13867_v16, 0.0 }
0x105f   :  { %7615 = vadd.xlane.f32.xlu1 %v7614_v4  ;;  %v13884_v38 = vsub.f32 %v7647_v14, %v13878_v20  ;;  %10969 = vmatpush3.msra.mxu0 %v13878_v20  ;;  %v14028_v4 = vsub.f32 %v8180_v44, %v14016_v5  ;;  %v8170_v44 = vld [vmem:[%s14528_s16 + $0x18] sm:$0xff] }
0x1060   :  { %10970 = vmatprep.subr.mxu0 %v14594_v29 }
0x1061   :  { %v7761_v36 = vand.u32 4294901760, %v13884_v38  ;;  %10971 = vmatpush3.msra.mxu0 %v13886_v39 }
0x1062   :  { %10972 = vmatprep.subr.mxu0 %v14594_v29 }
0x1063   :  { %v7762_v6 = vsub.f32 %v13884_v38, %v7761_v36 }
0x1065   :  { %v7763_v47 = vand.u32 4294901760, %v7762_v6 }
0x1067   :  { %10980 = vmatpush3.msra.mxu1 %v7763_v47  ;;  %v8175_v47 = vld [vmem:[%s14528_s16 + $0x40] sm:$0xff] }
0x1068   :  { %10981 = vmatprep.subr.mxu1 %v14594_v29 }
0x1069   :  { %10982 = vmatpush3.msra.mxu1 %v7770_v19  ;;  %v14084_v19 = vand.u32 4294901760, %v8175_v47 }
0x106a   :  { %10983 = vmatprep.subr.mxu1 %v14594_v29 }
0x10e8   :  { %v7616_v40 = vpop.xlane.xlu1 %7615 }
0x10e9   :  { %v7617_v26 = vmul.f32 0.03125, %v7616_v40  ;;  %v14030_v40 = vand.u32 4294901760, %v8179_v8 }
0x10eb   :  { %v7618_v52 = vsub.f32 %v13867_v16, %v7617_v26  ;;  %v8178_v26 = vld [vmem:[%s14528_s16 + $0x58] sm:$0xff]  ;;  %v14042_v14 = vsub.f32 %v8179_v8, %v14030_v40 }
0x10ed   :  { %v7619_v45 = vmul.f32 %v7618_v52, %v7618_v52 }
0x10ef   :  { %v7620_v50 = vsel %vm1701_vm5, %v7619_v45, 0.0  ;;  %v8289_v45 = vsub.f32 %v14014_v54, %v8288_v22 }
0x10f0   :  { %7621 = vadd.xlane.f32.xlu1 %v7620_v50  ;;  %v8295_v50 = vand.u32 4294901760, %v14028_v4 }
0x1101   :  { %7640 = vrot.lane.b32.xlu1 %v12265_v3, %s11528_s30  ;;  %v7645_v3 = vld [vmem:[%s14527_s15 + $0x8] sm:$0xff] }
0x1102   :  { %v13897_v56 = vand.u32 4294901760, %v7645_v3 }
0x1104   :  { %v13909_v60 = vsub.f32 %v7645_v3, %v13897_v56  ;;  %10973 = vmatpush3.msra.mxu0 %v13897_v56  ;;  %v8302_v3 = vand.u32 4294901760, %v14042_v14 }
0x1105   :  { %10974 = vmatprep.subr.mxu0 %v14594_v29 }
0x1106   :  { %v7775_v17 = vand.u32 4294901760, %v13909_v60  ;;  %10975 = vmatpush3.msra.mxu0 %v13911_v15  ;;  %v8303_v6 = vsub.f32 %v14042_v14, %v8302_v3 }
0x1107   :  { %10990 = vmatprep.subr.mxu0 %v14594_v29 }
0x1108   :  { %v7776_v63 = vsub.f32 %v13909_v60, %v7775_v17  ;;  %v8304_v10 = vand.u32 4294901760, %v8303_v6 }
0x110a   :  { %v7777_v27 = vand.u32 4294901760, %v7776_v63 }
0x110c   :  { %10984 = vmatpush3.msra.mxu1 %v7777_v27 }
0x110d   :  { %10985 = vmatprep.subr.mxu1 %v14594_v29 }
0x110e   :  { %10986 = vmatpush3.msra.mxu1 %v7784_v62  ;;  %v14100_v62 = vsub.f32 %v8175_v47, %v14084_v19  ;;  %v8168_v47 = vld [vmem:[%s14528_s16 + $0x8] sm:$0xff] }
0x110f   :  { %11001 = vmatprep.subr.mxu1 %v14594_v29 }
0x1179   :  { %v7622_v33 = vpop.xlane.xlu1 %7621 }
0x117a   :  { %v7623_v18 = vmul.f32 0.03125, %v7622_v33 }
0x117c   :  { %v7624_v21 = vadd.f32 1e-05, %v7623_v18 }
0x117d   :  { %v7641_v28 = vpop.permute.xlu1 %7640 }
0x117e   :  { %11391 = vrsqrt.f32 %v7624_v21  ;;  %v8173_v21 = vld [vmem:[%s14528_s16 + $0x30] sm:$0xff] }
0x118b   :  { %v11392_v43 = vpop.eup %11391 }
0x118c   :  { %v7626_v35 = vmul.f32 %v11392_v43, %v7618_v52  ;;  %v8283_v52 = vand.u32 4294901760, %v8282_v9 }
0x118e   :  { %v7631_v30 = vmul.f32 %v7630_v55, %v7626_v35  ;;  %v14571_v35 = vand.u32 4294901760, %v14100_v62 }
0x1190   :  { %v7636_v1 = vadd.f32 %v7635_v23, %v7631_v30  ;;  %v14118_v30 = vand.u32 4294901760, %v8173_v21 }
0x1192   :  { %v7638_v42 = vmul.f32 %v13329_v51, %v7636_v1  ;;  %v8172_v1 = vld [vmem:[%s14528_s16 + $0x28] sm:$0xff] }
0x1194   :  { %v7643_v32 = vadd.f32 %v7641_v28, %v7638_v42  ;;  %v8331_v28 = vsub.f32 %v14100_v62, %v14571_v35 }
0x1196   :  { %v7653_v31 = vsel %vm137_vm1, %v7643_v32, 0 }
0x1197   :  { %v7724_v25 = vand.u32 4294901760, %v7653_v31 }
0x1199   :  { %v7725_v58 = vsub.f32 %v7653_v31, %v7724_v25  ;;  %10988 = vmatmul.mubr.f32.vlgmr.msra.gmra.mxu1 %v7724_v25  ;;  %v14129_v31 = vand.u32 4294901760, %v8172_v1 }
0x119a   :  { %11002 = vmatpush3.msra.mxu1 %v13878_v20  ;;  %11009 = vmatprep.mubr.msk.f32.mxu1 %vm11511_vm0, %v14594_v29 }
0x119b   :  { %11003 = vmatprep.subr.mxu1 %v14594_v29  ;;  %v7726_v37 = vand.u32 4294901760, %v7725_v58 }
0x119c   :  { %11004 = vmatpush3.msra.mxu1 %v13886_v39 }
0x119d   :  { %11005 = vmatprep.subr.mxu1 %v14594_v29  ;;  %v7727_v51 = vsub.f32 %v7725_v58, %v7726_v37 }
0x119e   :  { %11006 = vmatpush3.msra.mxu1 %v13897_v56 }
0x119f   :  { %11007 = vmatprep.subr.mxu1 %v14594_v29  ;;  %v7728_v11 = vand.u32 4294901760, %v7727_v51 }
0x11a0   :  { %11008 = vmatpush3.msra.mxu1 %v13911_v15 }
0x11a1   :  { %11010 = vmatmul.mubr.f32.vlgmr.msra.gmra.mxu1 %v7726_v37  ;;  %11023 = vmatprep.subr.mxu1 %v14594_v29  ;;  %v8332_v37 = vand.u32 4294901760, %v8331_v28 }
0x11a2   :  { %10977 = vmatmul.mubr.f32.vlgmr.msra.gmra.mxu0 %v7728_v11  ;;  %11024 = vmatpush3.msra.mxu1 %v13878_v20  ;;  %v14045_v20 = vand.u32 4294901760, %v8178_v26  ;;  %v14144_v11 = vsub.f32 %v8172_v1, %v14129_v31 }
0x11a3   :  { %10991 = vmatpush3.msra.mxu0 %v13884_v38  ;;  %11025 = vmatprep.subr.mxu1 %v14594_v29  ;;  %v8290_v38 = vand.u32 4294901760, %v8289_v45 }
0x11a4   :  { %10992 = vmatprep.subr.mxu0 %v14594_v29  ;;  %11026 = vmatpush3.msra.mxu1 %v13886_v39  ;;  %v8296_v39 = vsub.f32 %v14028_v4, %v8295_v50  ;;  %v14568_v9 = vand.u32 4294901760, %v14144_v11 }
0x11a5   :  { %10993 = vmatpush3.msra.mxu0 %v13895_v0  ;;  %11027 = vmatprep.subr.mxu1 %v14594_v29  ;;  %v14059_v0 = vsub.f32 %v8178_v26, %v14045_v20 }
0x11a6   :  { %10994 = vmatprep.subr.mxu0 %v14594_v29  ;;  %11028 = vmatpush3.msra.mxu1 %v13897_v56  ;;  %v8176_v56 = vld [vmem:[%s14528_s16 + $0x48] sm:$0xff]  ;;  %v8297_v49 = vand.u32 4294901760, %v8296_v39 }
0x11a7   :  { %10995 = vmatpush3.msra.mxu0 %v13909_v60  ;;  %11029 = vmatprep.subr.mxu1 %v14594_v29  ;;  %v14071_v60 = vand.u32 4294901760, %v8176_v56 }
0x11a8   :  { %10996 = vmatprep.subr.mxu0 %v14594_v29  ;;  %10998 = vmatprep.mubr.msk.f32.mxu0 %vm11511_vm0, %v14594_v29 }
0x11a9   :  { %10997 = vmatpush3.msra.mxu0 %v13920_v34  ;;  %11030 = vmatpush3.msra.mxu1 %v13911_v15  ;;  %v8309_v15 = vand.u32 4294901760, %v14059_v0  ;;  %v14082_v34 = vsub.f32 %v8176_v56, %v14071_v60 }
0x11aa   :  { %11031 = vmatprep.mubr.msk.f32.mxu1 %vm11511_vm0, %v14594_v29  ;;  %10999 = vmatmul.mubr.f32.vlgmr.msra.gmra.mxu0 %v7725_v58  ;;  %v8171_v58 = vld [vmem:[%s14528_s16 + $0x20] sm:$0xff] }
0x11ab   :  { %11012 = vmatprep.subr.mxu0 %v14594_v29  ;;  %11032 = vmatmul.mubr.f32.vlgmr.msra.gmra.mxu1 %v7724_v25  ;;  %v8310_v63 = vsub.f32 %v14059_v0, %v8309_v15  ;;  %v14572_v48 = vand.u32 4294901760, %v14082_v34  ;;  %v14146_v57 = vand.u32 4294901760, %v8171_v58 }
0x11ac   :  { %11013 = vmatpush3.msra.mxu0 %v7761_v36  ;;  %11020 = vmatprep.mubr.msk.f32.mxu0 %vm11511_vm0, %v14594_v29  ;;  %v14055_v36 = vand.u32 4294901760, %v8177_v7 }
0x11ad   :  { %11014 = vmatprep.subr.mxu0 %v14594_v29  ;;  %11069 = vmatprep.subr.mxu1 %v14594_v29  ;;  %v8311_v18 = vand.u32 4294901760, %v8310_v63  ;;  %v8324_v43 = vsub.f32 %v14082_v34, %v14572_v48  ;;  %v14157_v26 = vsub.f32 %v8171_v58, %v14146_v57 }
0x11ae   :  { %11015 = vmatpush3.msra.mxu0 %v7768_v59  ;;  %11101 = vmatprep.mubr.msk.f32.mxu1 %vm11511_vm0, %v14594_v29  ;;  %v14069_v59 = vsub.f32 %v8177_v7, %v14055_v36  ;;  %v8169_v7 = vld [vmem:[%s14528_s16 + $0x10] sm:$0xff] }
0x11af   :  { %11016 = vmatprep.subr.mxu0 %v14594_v29  ;;  %11070 = vmatpush3.msra.mxu1 %v8283_v52  ;;  %v8325_v42 = vand.u32 4294901760, %v8324_v43  ;;  %v14159_v52 = vand.u32 4294901760, %v8170_v44  ;;  %v14567_v39 = vand.u32 4294901760, %v14157_v26 }
0x11b0   :  { %11017 = vmatpush3.msra.mxu0 %v7775_v17  ;;  %11071 = vmatprep.subr.mxu1 %v14594_v29  ;;  %v14573_v17 = vand.u32 4294901760, %v14069_v59 }
0x11b1   :  { %11018 = vmatprep.subr.mxu0 %v14594_v29  ;;  %11072 = vmatpush3.msra.mxu1 %v8290_v38  ;;  %v8352_v38 = vsub.f32 %v14144_v11, %v14568_v9  ;;  %v14175_v56 = vsub.f32 %v8170_v44, %v14159_v52  ;;  %v8359_v63 = vsub.f32 %v14157_v26, %v14567_v39 }
0x11b2   :  { %11019 = vmatpush3.msra.mxu0 %v7782_v46  ;;  %11073 = vmatprep.subr.mxu1 %v14594_v29  ;;  %v8174_v46 = vld [vmem:[%s14528_s16 + $0x38] sm:$0xff]  ;;  %v8317_v27 = vsub.f32 %v14069_v59, %v14573_v17 }
0x11b3   :  { %11021 = vmatmul.mubr.f32.vlgmr.msra.gmra.mxu0 %v7724_v25  ;;  %11034 = vmatprep.subr.mxu0 %v14594_v29  ;;  %v14102_v33 = vand.u32 4294901760, %v8174_v46  ;;  %v14133_v25 = vsub.f32 %v8173_v21, %v14118_v30  ;;  %v8167_v21 = vld [vmem:[%s14528_s16] sm:$0xff] }
0x11b4   :  { %11066 = vmatprep.mubr.msk.f32.mxu0 %vm11511_vm0, %v14594_v29  ;;  %11035 = vmatpush3.msra.mxu0 %v13997_v12  ;;  %v8318_v55 = vand.u32 4294901760, %v8317_v27 }
0x11b5   :  { %11036 = vmatprep.subr.mxu0 %v14594_v29  ;;  %11074 = vmatpush3.msra.mxu1 %v8297_v49  ;;  %v14115_v23 = vsub.f32 %v8174_v46, %v14102_v33  ;;  %v14569_v41 = vand.u32 4294901760, %v14133_v25  ;;  %v14177_v49 = vand.u32 4294901760, %v8169_v7  ;;  %v14566_v46 = vand.u32 4294901760, %v14175_v56 }
0x11b6   :  { %11037 = vmatpush3.msra.mxu0 %v14005_v13  ;;  %11075 = vmatprep.subr.mxu1 %v14594_v29 }
0x11b7   :  { %11038 = vmatprep.subr.mxu0 %v14594_v29  ;;  %11076 = vmatpush3.msra.mxu1 %v8304_v10  ;;  %v14570_v32 = vand.u32 4294901760, %v14115_v23  ;;  %v8345_v45 = vsub.f32 %v14133_v25, %v14569_v41  ;;  %v8353_v10 = vand.u32 4294901760, %v8352_v38  ;;  %v14190_v27 = vsub.f32 %v8169_v7, %v14177_v49 }
0x11b8   :  { %11039 = vmatpush3.msra.mxu0 %v14016_v5  ;;  %11077 = vmatprep.subr.mxu1 %v14594_v29  ;;  %v8366_v43 = vsub.f32 %v14175_v56, %v14566_v46 }
0x11b9   :  { %11040 = vmatprep.subr.mxu0 %v14594_v29  ;;  %11078 = vmatpush3.msra.mxu1 %v8311_v18  ;;  %v8338_v51 = vsub.f32 %v14115_v23, %v14570_v32  ;;  %v8346_v6 = vand.u32 4294901760, %v8345_v45  ;;  %v14193_v18 = vand.u32 4294901760, %v8168_v47  ;;  %v14565_v1 = vand.u32 4294901760, %v14190_v27 }
0x11ba   :  { %11041 = vmatpush3.msra.mxu0 %v14030_v40  ;;  %11079 = vmatprep.subr.mxu1 %v14594_v29  ;;  %v8367_v58 = vand.u32 4294901760, %v8366_v43 }
0x11bb   :  { %11042 = vmatprep.subr.mxu0 %v14594_v29  ;;  %11080 = vmatpush3.msra.mxu1 %v8318_v55  ;;  %v8339_v8 = vand.u32 4294901760, %v8338_v51  ;;  %v8360_v55 = vand.u32 4294901760, %v8359_v63  ;;  %v14208_v28 = vsub.f32 %v8168_v47, %v14193_v18 }
0x11bc   :  { %11043 = vmatpush3.msra.mxu0 %v14045_v20  ;;  %11081 = vmatprep.subr.mxu1 %v14594_v29 }
0x11bd   :  { %11044 = vmatprep.subr.mxu0 %v14594_v29  ;;  %11082 = vmatpush3.msra.mxu1 %v8325_v42  ;;  %v14204_v42 = vand.u32 4294901760, %v8167_v21  ;;  %v14564_v44 = vand.u32 4294901760, %v14208_v28 }
0x11be   :  { %11045 = vmatpush3.msra.mxu0 %v14055_v36  ;;  %11083 = vmatprep.subr.mxu1 %v14594_v29 }
0x11bf   :  { %11046 = vmatprep.subr.mxu0 %v14594_v29  ;;  %11084 = vmatpush3.msra.mxu1 %v8332_v37  ;;  %v8373_v37 = vsub.f32 %v14190_v27, %v14565_v1  ;;  %v14216_v51 = vsub.f32 %v8167_v21, %v14204_v42  ;;  %v8380_v7 = vsub.f32 %v14208_v28, %v14564_v44 }
0x11c0   :  { %11047 = vmatpush3.msra.mxu0 %v14071_v60  ;;  %11085 = vmatprep.subr.mxu1 %v14594_v29 }
0x11c1   :  { %11048 = vmatprep.subr.mxu0 %v14594_v29  ;;  %11086 = vmatpush3.msra.mxu1 %v8339_v8  ;;  %v8374_v8 = vand.u32 4294901760, %v8373_v37  ;;  %v14563_v45 = vand.u32 4294901760, %v14216_v51 }
0x11c2   :  { %11049 = vmatpush3.msra.mxu0 %v14084_v19  ;;  %11087 = vmatprep.subr.mxu1 %v14594_v29 }
0x11c3   :  { %11050 = vmatprep.subr.mxu0 %v14594_v29  ;;  %11088 = vmatpush3.msra.mxu1 %v8346_v6  ;;  %v8387_v38 = vsub.f32 %v14216_v51, %v14563_v45  ;;  %v8381_v6 = vand.u32 4294901760, %v8380_v7 }
0x11c4   :  { %11051 = vmatpush3.msra.mxu0 %v14102_v33  ;;  %11089 = vmatprep.subr.mxu1 %v14594_v29 }
0x11c5   :  { %11052 = vmatprep.subr.mxu0 %v14594_v29  ;;  %11090 = vmatpush3.msra.mxu1 %v8353_v10  ;;  %v8388_v47 = vand.u32 4294901760, %v8387_v38 }
0x11c6   :  { %11053 = vmatpush3.msra.mxu0 %v14118_v30  ;;  %11091 = vmatprep.subr.mxu1 %v14594_v29 }
0x11c7   :  { %11054 = vmatprep.subr.mxu0 %v14594_v29  ;;  %11092 = vmatpush3.msra.mxu1 %v8360_v55 }
0x11c8   :  { %11055 = vmatpush3.msra.mxu0 %v14129_v31  ;;  %11093 = vmatprep.subr.mxu1 %v14594_v29 }
0x11c9   :  { %11056 = vmatprep.subr.mxu0 %v14594_v29  ;;  %11094 = vmatpush3.msra.mxu1 %v8367_v58  ;;  %v14612_v58 = vld [vmem:[#allocation16_spill] sm:$0xff] }
0x11ca   :  { %11057 = vmatpush3.msra.mxu0 %v14146_v57  ;;  %11095 = vmatprep.subr.mxu1 %v14594_v29  ;;  %v7651_v37 = vrot.slane %v14612_v58, %v12259_v53 }
0x11cb   :  { %11058 = vmatprep.subr.mxu0 %v14594_v29  ;;  %11096 = vmatpush3.msra.mxu1 %v8374_v8 }
0x11cc   :  { %11059 = vmatpush3.msra.mxu0 %v14159_v52  ;;  %11097 = vmatprep.subr.mxu1 %v14594_v29 }
0x11cd   :  { %11060 = vmatprep.subr.mxu0 %v14594_v29  ;;  %11098 = vmatpush3.msra.mxu1 %v8381_v6 }
0x11ce   :  { %11061 = vmatpush3.msra.mxu0 %v14177_v49  ;;  %11099 = vmatprep.subr.mxu1 %v14594_v29 }
0x11cf   :  { %11062 = vmatprep.subr.mxu0 %v14594_v29  ;;  %11100 = vmatpush3.msra.mxu1 %v8388_v47 }
0x11d0   :  { %11063 = vmatpush3.msra.mxu0 %v14193_v18  ;;  %11139 = vmatprep.subr.mxu1 %v14594_v29 }
0x11d1   :  { %11064 = vmatprep.subr.mxu0 %v14594_v29 }
0x11d2   :  { %11065 = vmatpush3.msra.mxu0 %v14204_v42 }
0x11d3   :  { %11104 = vmatprep.subr.mxu0 %v14594_v29 }
0x1259   :  { %v7821_v10 = vpop.f32.mrf.mxu1 }
0x125b   :  { %v10989_v63 = vpop.f32.mrf.mxu1 }
0x1261   :  { %v7978_v21 = vpop.f32.mrf.mxu1 }
0x1262   :  { %v7730_v55 = vpop.f32.mrf.mxu0 }
0x1263   :  { %v11011_v43 = vpop.f32.mrf.mxu1  ;;  %v7731_v8 = vadd.f32 %v7730_v55, %v7651_v37 }
0x1264   :  { %v10978_v45 = vpop.f32.mrf.mxu0 }
0x1265   :  { %v7822_v1 = vadd.f32 %v7821_v10, %v7731_v8 }
0x126a   :  { %v7901_v7 = vpop.f32.mrf.mxu0 }
0x126b   :  { %v8136_v44 = vpop.f32.mrf.mxu1  ;;  %v7902_v46 = vadd.f32 %v7901_v7, %v7822_v1 }
0x126c   :  { %v11000_v38 = vpop.f32.mrf.mxu0 }
0x126d   :  { %v11033_v6 = vpop.f32.mrf.mxu1  ;;  %v7979_v39 = vadd.f32 %v7978_v21, %v7902_v46 }
0x1273   :  { %v8061_v47 = vpop.f32.mrf.mxu0 }
0x1274   :  { %v8062_v9 = vadd.f32 %v8061_v47, %v7979_v39 }
0x1275   :  { %v11022_v41 = vpop.f32.mrf.mxu0 }
0x1276   :  { %v8137_v32 = vadd.f32 %v8136_v44, %v8062_v9 }
0x1278   :  { %v8141_v63 = vmul.f32 0.70710677, %v8137_v32  ;;  %v8140_v6 = vmul.f32 0.5, %v8137_v32 }
0x127a   :  { %v8142_v35 = vand.u32 2147483647, %v8141_v63  ;;  %vm8162_vm5 = vcmp.ge.f32.partialorder %v8141_v63, 0.0 }
0x127c   :  { %v8143_v48 = vmul.f32 0.3275911, %v8142_v35  ;;  %v8156_v17 = vsub.f32 0.0, %v8142_v35 }
0x127e   :  { %v8144_v43 = vadd.f32 1.0, %v8143_v48  ;;  %v8157_v53 = vmul.f32 %v8156_v17, %v8142_v35 }
0x1280   :  { %11393 = vrcp.f32 %v8144_v43  ;;  %v8158_v58 = vmul.f32 1.442695, %v8157_v53 }
0x1282   :  { %11395 = vpow2.f32 %v8158_v58 }
0x128d   :  { %v11394_v45 = vpop.eup %11393 }
0x128e   :  { %v8147_v55 = vmul.f32 1.0614054, %v11394_v45 }
0x128f   :  { %v11396_v9 = vpop.eup %11395 }
0x1290   :  { %v8148_v37 = vadd.f32 -1.4531521, %v8147_v55 }
0x1292   :  { %v8149_v10 = vmul.f32 %v11394_v45, %v8148_v37 }
0x1294   :  { %v8150_v8 = vadd.f32 1.4214138, %v8149_v10 }
0x1296   :  { %v8151_v1 = vmul.f32 %v11394_v45, %v8150_v8 }
0x1298   :  { %v8152_v46 = vadd.f32 -0.28449672, %v8151_v1  ;;  %v14624_v1 = vld [vmem:[#allocation15_spill] sm:$0xff] }
0x129a   :  { %v8153_v21 = vmul.f32 %v11394_v45, %v8152_v46  ;;  %v8186_v46 = vrot.slane %v13938_v61, %v14624_v1 }
0x129c   :  { %v8154_v39 = vadd.f32 0.2548296, %v8153_v21 }
0x129e   :  { %v8155_v41 = vmul.f32 %v11394_v45, %v8154_v39 }
0x12a0   :  { %v8160_v44 = vmul.f32 %v11396_v9, %v8155_v41 }
0x12a2   :  { %v8161_v7 = vsub.f32 1.0, %v8160_v44 }
0x12a4   :  { %v8163_v38 = vsub.f32 0.0, %v8161_v7 }
0x12a6   :  { %v8164_v48 = vsel %vm8162_vm5, %v8161_v7, %v8163_v38  ;;  %v8830_v7 = vpop.permute.xlu0 %8829 }
0x12a7   :  { %v8165_v17 = vadd.f32 1.0, %v8164_v48 }
0x12a9   :  { %v8166_v35 = vmul.f32 %v8165_v17, %v8140_v6 }
0x12aa   :  { %v8835_v17 = vpop.permute.xlu0 %8834 }
0x12ab   :  { %v14236_v47 = vand.u32 4294901760, %v8166_v35 }
0x12ad   :  { %11102 = vmatmul.mubr.f32.vlgmr.msra.gmra.mxu1 %v14236_v47  ;;  %v14240_v43 = vsub.f32 %v8166_v35, %v14236_v47 }
0x12ae   :  { %11140 = vmatpush3.msra.mxu1 %v13997_v12  ;;  %11171 = vmatprep.mubr.msk.f32.mxu1 %vm11511_vm0, %v14594_v29 }
0x12af   :  { %11141 = vmatprep.subr.mxu1 %v14594_v29  ;;  %v8270_v63 = vand.u32 4294901760, %v14240_v43 }
0x12b0   :  { %11142 = vmatpush3.msra.mxu1 %v14005_v13 }
0x12b1   :  { %11143 = vmatprep.subr.mxu1 %v14594_v29  ;;  %v8271_v32 = vsub.f32 %v14240_v43, %v8270_v63 }
0x12b2   :  { %11144 = vmatpush3.msra.mxu1 %v14016_v5 }
0x12b3   :  { %11145 = vmatprep.subr.mxu1 %v14594_v29  ;;  %v8272_v53 = vand.u32 4294901760, %v8271_v32  ;;  %v8848_v32 = vpop.permute.xlu0 %8847 }
0x12b4   :  { %11146 = vmatpush3.msra.mxu1 %v14030_v40 }
0x12b5   :  { %11147 = vmatprep.subr.mxu1 %v14594_v29  ;;  %11067 = vmatmul.mubr.f32.vlgmr.msra.gmra.mxu0 %v8272_v53 }
0x12b6   :  { %11105 = vmatpush3.msra.mxu0 %v14003_v2  ;;  %11148 = vmatpush3.msra.mxu1 %v14045_v20  ;;  %v14614_v2 = vand.u32 4294901760, %v14082_v34 }
0x12b7   :  { %11106 = vmatprep.subr.mxu0 %v14594_v29  ;;  %11149 = vmatprep.subr.mxu1 %v14594_v29 }
0x12b8   :  { %11107 = vmatpush3.msra.mxu0 %v14014_v54  ;;  %11150 = vmatpush3.msra.mxu1 %v14055_v36  ;;  %v14617_v54 = vand.u32 4294901760, %v14133_v25 }
0x12b9   :  { %11108 = vmatprep.subr.mxu0 %v14594_v29  ;;  %11151 = vmatprep.subr.mxu1 %v14594_v29 }
0x12ba   :  { %11109 = vmatpush3.msra.mxu0 %v14028_v4  ;;  %11152 = vmatpush3.msra.mxu1 %v14071_v60  ;;  %v14620_v4 = vand.u32 4294901760, %v14175_v56 }
0x12bb   :  { %11110 = vmatprep.subr.mxu0 %v14594_v29  ;;  %11153 = vmatprep.subr.mxu1 %v14594_v29 }
0x12bc   :  { %11111 = vmatpush3.msra.mxu0 %v14042_v14  ;;  %11154 = vmatpush3.msra.mxu1 %v14084_v19  ;;  %v14623_v14 = vand.u32 4294901760, %v14216_v51 }
0x12bd   :  { %11112 = vmatprep.subr.mxu0 %v14594_v29  ;;  %11155 = vmatprep.subr.mxu1 %v14594_v29 }
0x12be   :  { %11113 = vmatpush3.msra.mxu0 %v14059_v0  ;;  %11156 = vmatpush3.msra.mxu1 %v14102_v33 }
0x12bf   :  { %11114 = vmatprep.subr.mxu0 %v14594_v29  ;;  %11157 = vmatprep.subr.mxu1 %v14594_v29 }
0x12c0   :  { %11115 = vmatpush3.msra.mxu0 %v14069_v59  ;;  %11158 = vmatpush3.msra.mxu1 %v14118_v30 }
0x12c1   :  { %11116 = vmatprep.subr.mxu0 %v14594_v29  ;;  %11159 = vmatprep.subr.mxu1 %v14594_v29 }
0x12c2   :  { %11117 = vmatpush3.msra.mxu0 %v14082_v34  ;;  %11160 = vmatpush3.msra.mxu1 %v14129_v31 }
0x12c3   :  { %11118 = vmatprep.subr.mxu0 %v14594_v29  ;;  %11161 = vmatprep.subr.mxu1 %v14594_v29 }
0x12c4   :  { %11119 = vmatpush3.msra.mxu0 %v14100_v62  ;;  %11162 = vmatpush3.msra.mxu1 %v14146_v57 }
0x12c5   :  { %11120 = vmatprep.subr.mxu0 %v14594_v29  ;;  %11163 = vmatprep.subr.mxu1 %v14594_v29 }
0x12c6   :  { %11121 = vmatpush3.msra.mxu0 %v14115_v23  ;;  %11164 = vmatpush3.msra.mxu1 %v14159_v52 }
0x12c7   :  { %11122 = vmatprep.subr.mxu0 %v14594_v29  ;;  %11165 = vmatprep.subr.mxu1 %v14594_v29 }
0x12c8   :  { %11123 = vmatpush3.msra.mxu0 %v14133_v25  ;;  %11166 = vmatpush3.msra.mxu1 %v14177_v49 }
0x12c9   :  { %11124 = vmatprep.subr.mxu0 %v14594_v29  ;;  %11167 = vmatprep.subr.mxu1 %v14594_v29 }
0x12ca   :  { %11125 = vmatpush3.msra.mxu0 %v14144_v11  ;;  %11168 = vmatpush3.msra.mxu1 %v14193_v18 }
0x12cb   :  { %11126 = vmatprep.subr.mxu0 %v14594_v29  ;;  %11169 = vmatprep.subr.mxu1 %v14594_v29 }
0x12cc   :  { %11127 = vmatpush3.msra.mxu0 %v14157_v26  ;;  %11170 = vmatpush3.msra.mxu1 %v14204_v42 }
0x12cd   :  { %11128 = vmatprep.subr.mxu0 %v14594_v29  ;;  %11172 = vmatmul.mubr.f32.vlgmr.msra.gmra.mxu1 %v8270_v63 }
0x12ce   :  { %11209 = vmatprep.subr.mxu1 %v14594_v29  ;;  %11129 = vmatpush3.msra.mxu0 %v14175_v56 }
0x12cf   :  { %11210 = vmatpush3.msra.mxu1 %v13997_v12  ;;  %11130 = vmatprep.subr.mxu0 %v14594_v29  ;;  %v14613_v12 = vand.u32 4294901760, %v14069_v59 }
0x12d0   :  { %11211 = vmatprep.subr.mxu1 %v14594_v29  ;;  %11131 = vmatpush3.msra.mxu0 %v14190_v27 }
0x12d1   :  { %11212 = vmatpush3.msra.mxu1 %v14005_v13  ;;  %11132 = vmatprep.subr.mxu0 %v14594_v29  ;;  %v14615_v13 = vand.u32 4294901760, %v14100_v62  ;;  %v8852_v62 = vld [vmem:[%s14534_s22] sm:$0xff] }
0x12d2   :  { %11213 = vmatprep.subr.mxu1 %v14594_v29  ;;  %11133 = vmatpush3.msra.mxu0 %v14208_v28 }
0x12d3   :  { %11214 = vmatpush3.msra.mxu1 %v14016_v5  ;;  %11134 = vmatprep.subr.mxu0 %v14594_v29  ;;  %v14618_v5 = vand.u32 4294901760, %v14144_v11 }
0x12d4   :  { %11215 = vmatprep.subr.mxu1 %v14594_v29  ;;  %11135 = vmatpush3.msra.mxu0 %v14216_v51 }
0x12d5   :  { %11136 = vmatprep.mubr.msk.f32.mxu0 %vm11511_vm0, %v14594_v29  ;;  %11216 = vmatpush3.msra.mxu1 %v14030_v40  ;;  %v14621_v40 = vand.u32 4294901760, %v14190_v27 }
0x12d6   :  { %11137 = vmatmul.mubr.f32.vlgmr.msra.gmra.mxu0 %v14240_v43  ;;  %11174 = vmatprep.subr.mxu0 %v14594_v29 }
0x12d7   :  { %11217 = vmatprep.subr.mxu1 %v14594_v29  ;;  %11175 = vmatpush3.msra.mxu0 %v8281_v24  ;;  %v14616_v24 = vand.u32 4294901760, %v14115_v23 }
0x12d8   :  { %11218 = vmatpush3.msra.mxu1 %v14045_v20  ;;  %11176 = vmatprep.subr.mxu0 %v14594_v29  ;;  %v8855_v20 = vld [vmem:[%s14534_s22 + $0x18] sm:$0xff] }
0x12d9   :  { %11219 = vmatprep.subr.mxu1 %v14594_v29  ;;  %11177 = vmatpush3.msra.mxu0 %v8288_v22  ;;  %v14619_v22 = vand.u32 4294901760, %v14157_v26 }
0x12da   :  { %11220 = vmatpush3.msra.mxu1 %v14055_v36  ;;  %11178 = vmatprep.subr.mxu0 %v14594_v29  ;;  %v8854_v36 = vld [vmem:[%s14534_s22 + $0x10] sm:$0xff] }
0x12db   :  { %11221 = vmatprep.subr.mxu1 %v14594_v29  ;;  %11179 = vmatpush3.msra.mxu0 %v8295_v50  ;;  %v14622_v50 = vand.u32 4294901760, %v14208_v28  ;;  %v14414_v59 = vand.u32 4294901760, %v8854_v36 }
0x12dc   :  { %11222 = vmatpush3.msra.mxu1 %v14071_v60  ;;  %11180 = vmatprep.subr.mxu0 %v14594_v29  ;;  %v8853_v60 = vld [vmem:[%s14534_s22 + $0x8] sm:$0xff]  ;;  %s11530_s22 = smov [#allocation10]  }
0x12dd   :  { %11223 = vmatprep.subr.mxu1 %v14594_v29  ;;  %11181 = vmatpush3.msra.mxu0 %v8302_v3  ;;  %v14406_v3 = vand.u32 4294901760, %v8855_v20  ;;  %v14423_v34 = vsub.f32 %v8854_v36, %v14414_v59  ;;  %s9358_s5 = sshll.u32 %s11530_s22, 4  ;;  %s9359_s5 = int_to_ptr.vmem [resolvable:$true] %s9358_s5 }
0x12de   :  { %11224 = vmatpush3.msra.mxu1 %v14084_v19  ;;  %11182 = vmatprep.subr.mxu0 %v14594_v29  ;;  %v14425_v19 = vand.u32 4294901760, %v8853_v60  ;;  %s11478_s26 = scalar_lea.vmem %s9359_s5, 64  ;;  %p11483_p7 = scmp.lt.s32.totalorder %s9359_s5, %s9359_s5 }
0x12df   :  { %11225 = vmatprep.subr.mxu1 %v14594_v29  ;;  %11183 = vmatpush3.msra.mxu0 %v8309_v15  ;;  %v14412_v0 = vsub.f32 %v8855_v20, %v14406_v3  ;;  %v8979_v23 = vand.u32 4294901760, %v14423_v34  ;;  %v9371_v20 = vld [vmem:[#allocation8] ss:$0 sm:$0xff]  ;;  %p11479_p6 = scmp.ne.s32.totalorder %s9359_s5, %s11478_s26  ;;  %p11484_p8 = scmp.lt.s32.totalorder %s11478_s26, %s11478_s26 }
0x12e0   :  { %11226 = vmatpush3.msra.mxu1 %v14102_v33  ;;  %11184 = vmatprep.subr.mxu0 %v14594_v29 }
0x12e1   :  { %11227 = vmatprep.subr.mxu1 %v14594_v29  ;;  %11185 = vmatpush3.msra.mxu0 %v14613_v12  ;;  %v8972_v15 = vand.u32 4294901760, %v14412_v0  ;;  %v8980_v11 = vsub.f32 %v14423_v34, %v8979_v23  ;;  %p11485_p9 = por %p11484_p8, %p11483_p7 }
0x12e2   :  { %11228 = vmatpush3.msra.mxu1 %v14118_v30  ;;  %11186 = vmatprep.subr.mxu0 %v14594_v29  ;;  %v14437_v30 = vsub.f32 %v8853_v60, %v14425_v19 }
0x12e3   :  { %11229 = vmatprep.subr.mxu1 %v14594_v29  ;;  %11187 = vmatpush3.msra.mxu0 %v14614_v2  ;;  %v8973_v33 = vsub.f32 %v14412_v0, %v8972_v15  ;;  %p11486_p10 = pnand %p11485_p9, %p11479_p6 }
0x12e4   :  { %11230 = vmatpush3.msra.mxu1 %v14129_v31  ;;  %11188 = vmatprep.subr.mxu0 %v14594_v29  ;;  %v14439_v31 = vand.u32 4294901760, %v8852_v62 }
0x12e5   :  { %11231 = vmatprep.subr.mxu1 %v14594_v29  ;;  %11189 = vmatpush3.msra.mxu0 %v14615_v13  ;;  %v8974_v25 = vand.u32 4294901760, %v8973_v33 }
0x12e6   :  { %11232 = vmatpush3.msra.mxu1 %v14146_v57  ;;  %11190 = vmatprep.subr.mxu0 %v14594_v29  ;;  %v8986_v57 = vand.u32 4294901760, %v14437_v30  ;;  %v14448_v26 = vsub.f32 %v8852_v62, %v14439_v31 }
0x12e7   :  { %11233 = vmatprep.subr.mxu1 %v14594_v29  ;;  %11191 = vmatpush3.msra.mxu0 %v14616_v24 }
0x12e8   :  { %11234 = vmatpush3.msra.mxu1 %v14159_v52  ;;  %11192 = vmatprep.subr.mxu0 %v14594_v29  ;;  %v8981_v52 = vand.u32 4294901760, %v8980_v11  ;;  %v8987_v56 = vsub.f32 %v14437_v30, %v8986_v57 }
0x12e9   :  { %11235 = vmatprep.subr.mxu1 %v14594_v29  ;;  %11193 = vmatpush3.msra.mxu0 %v14617_v54 }
0x12ea   :  { %11236 = vmatpush3.msra.mxu1 %v14177_v49  ;;  %11194 = vmatprep.subr.mxu0 %v14594_v29  ;;  %v8993_v49 = vand.u32 4294901760, %v14448_v26  ;;  %v8988_v27 = vand.u32 4294901760, %v8987_v56 }
0x12eb   :  { %11237 = vmatprep.subr.mxu1 %v14594_v29  ;;  %11195 = vmatpush3.msra.mxu0 %v14618_v5 }
0x12ec   :  { %11238 = vmatpush3.msra.mxu1 %v14193_v18  ;;  %11196 = vmatprep.subr.mxu0 %v14594_v29  ;;  %v8994_v18 = vsub.f32 %v14448_v26, %v8993_v49 }
0x12ed   :  { %11239 = vmatprep.subr.mxu1 %v14594_v29  ;;  %11197 = vmatpush3.msra.mxu0 %v14619_v22 }
0x12ee   :  { %11240 = vmatpush3.msra.mxu1 %v14204_v42  ;;  %11241 = vmatprep.mubr.msk.f32.mxu1 %vm11511_vm0, %v14594_v29  ;;  %v8995_v42 = vand.u32 4294901760, %v8994_v18 }
0x12ef   :  { %11198 = vmatprep.subr.mxu0 %v14594_v29  ;;  %11242 = vmatmul.mubr.f32.vlgmr.msra.gmra.mxu1 %v14236_v47 }
0x12f0   :  { %11199 = vmatpush3.msra.mxu0 %v14620_v4  ;;  %11206 = vmatprep.mubr.msk.f32.mxu0 %vm11511_vm0, %v14594_v29 }
0x12f1   :  { %11200 = vmatprep.subr.mxu0 %v14594_v29  ;;  %11255 = vmatprep.subr.mxu1 %v14594_v29 }
0x12f2   :  { %11201 = vmatpush3.msra.mxu0 %v14621_v40  ;;  %11263 = vmatprep.mubr.msk.f32.mxu1 %vm11511_vm0, %v14594_v29 }
0x12f3   :  { %11202 = vmatprep.subr.mxu0 %v14594_v29  ;;  %11256 = vmatpush3.msra.mxu1 %v8974_v25 }
0x12f4   :  { %11203 = vmatpush3.msra.mxu0 %v14622_v50  ;;  %11257 = vmatprep.subr.mxu1 %v14594_v29 }
0x12f5   :  { %11204 = vmatprep.subr.mxu0 %v14594_v29  ;;  %11258 = vmatpush3.msra.mxu1 %v8981_v52 }
0x12f6   :  { %11205 = vmatpush3.msra.mxu0 %v14623_v14  ;;  %11259 = vmatprep.subr.mxu1 %v14594_v29 }
0x12f7   :  { %11207 = vmatmul.mubr.f32.vlgmr.msra.gmra.mxu0 %v14236_v47  ;;  %11244 = vmatprep.subr.mxu0 %v14594_v29 }
0x12f8   :  { %11252 = vmatprep.mubr.msk.f32.mxu0 %vm11511_vm0, %v14594_v29  ;;  %11245 = vmatpush3.msra.mxu0 %v14406_v3 }
0x12f9   :  { %11246 = vmatprep.subr.mxu0 %v14594_v29  ;;  %11260 = vmatpush3.msra.mxu1 %v8988_v27 }
0x12fa   :  { %11247 = vmatpush3.msra.mxu0 %v14414_v59  ;;  %11261 = vmatprep.subr.mxu1 %v14594_v29 }
0x12fb   :  { %11248 = vmatprep.subr.mxu0 %v14594_v29  ;;  %11262 = vmatpush3.msra.mxu1 %v8995_v42 }
0x12fc   :  { %11249 = vmatpush3.msra.mxu0 %v14425_v19  ;;  %11277 = vmatprep.subr.mxu1 %v14594_v29 }
0x12fd   :  { %11250 = vmatprep.subr.mxu0 %v14594_v29 }
0x12fe   :  { %11251 = vmatpush3.msra.mxu0 %v14439_v31 }
0x12ff   :  { %11266 = vmatprep.subr.mxu0 %v14594_v29 }
0x136d   :  { %v8425_v28 = vpop.f32.mrf.mxu1 }
0x136f   :  { %v11103_v51 = vpop.f32.mrf.mxu1 }
0x1375   :  { %v8274_v45 = vpop.f32.mrf.mxu0 }
0x1376   :  { %v8275_v21 = vadd.f32 %v8274_v45, %v8186_v46 }
0x1377   :  { %v11068_v55 = vpop.f32.mrf.mxu0 }
0x1378   :  { %v8426_v41 = vadd.f32 %v8425_v28, %v8275_v21 }
0x138d   :  { %v8618_v58 = vpop.f32.mrf.mxu1 }
0x138f   :  { %v11173_v37 = vpop.f32.mrf.mxu1 }
0x1396   :  { %v8529_v10 = vpop.f32.mrf.mxu0 }
0x1397   :  { %v8530_v44 = vadd.f32 %v8529_v10, %v8426_v41 }
0x1398   :  { %v11138_v8 = vpop.f32.mrf.mxu0 }
0x1399   :  { %v8619_v38 = vadd.f32 %v8618_v58, %v8530_v44 }
0x13af   :  { %v8824_v39 = vpop.f32.mrf.mxu1 }
0x13b1   :  { %v11243_v9 = vpop.f32.mrf.mxu1 }
0x13b7   :  { %v8737_v48 = vpop.f32.mrf.mxu0 }
0x13b8   :  { %v8738_v6 = vadd.f32 %v8737_v48, %v8619_v38 }
0x13b9   :  { %v11208_v35 = vpop.f32.mrf.mxu0 }
0x13ba   :  { %v8825_v47 = vadd.f32 %v8824_v39, %v8738_v6 }
0x13bc   :  { %v8832_v43 = vmul.f32 %v8830_v7, %v8825_v47 }
0x13be   :  { %v8837_v63 = vadd.f32 %v8835_v17, %v8832_v43 }
0x13c0   :  { %v8850_v53 = vmul.f32 %v8848_v32, %v8837_v63 }
0x13c2   :  { %v8851_v12 = vadd.f32 %v8850_v53, %v13867_v16 }
0x13c4   :  { %v8864_v61 = vsel %vm137_vm1, %v8851_v12, 0 }
0x13c5   :  { %v8935_v2 = vand.u32 4294901760, %v8864_v61 }
0x13c7   :  { %v8936_v13 = vsub.f32 %v8864_v61, %v8935_v2  ;;  %11264 = vmatmul.mubr.f32.vlgmr.msra.gmra.mxu1 %v8935_v2 }
0x13c8   :  { %11278 = vmatpush3.msra.mxu1 %v14406_v3  ;;  %11285 = vmatprep.mubr.msk.f32.mxu1 %vm11511_vm0, %v14594_v29 }
0x13c9   :  { %11279 = vmatprep.subr.mxu1 %v14594_v29  ;;  %v8937_v24 = vand.u32 4294901760, %v8936_v13 }
0x13ca   :  { %11280 = vmatpush3.msra.mxu1 %v14414_v59 }
0x13cb   :  { %11281 = vmatprep.subr.mxu1 %v14594_v29  ;;  %v8938_v54 = vsub.f32 %v8936_v13, %v8937_v24 }
0x13cc   :  { %11282 = vmatpush3.msra.mxu1 %v14425_v19 }
0x13cd   :  { %11283 = vmatprep.subr.mxu1 %v14594_v29  ;;  %v8939_v16 = vand.u32 4294901760, %v8938_v54 }
0x13ce   :  { %11284 = vmatpush3.msra.mxu1 %v14439_v31 }
0x13cf   :  { %11286 = vmatmul.mubr.f32.vlgmr.msra.gmra.mxu1 %v8937_v24  ;;  %11299 = vmatprep.subr.mxu1 %v14594_v29 }
0x13d0   :  { %11253 = vmatmul.mubr.f32.vlgmr.msra.gmra.mxu0 %v8939_v16  ;;  %11300 = vmatpush3.msra.mxu1 %v14406_v3 }
0x13d1   :  { %11267 = vmatpush3.msra.mxu0 %v14412_v0  ;;  %11301 = vmatprep.subr.mxu1 %v14594_v29 }
0x13d2   :  { %11268 = vmatprep.subr.mxu0 %v14594_v29  ;;  %11302 = vmatpush3.msra.mxu1 %v14414_v59 }
0x13d3   :  { %11269 = vmatpush3.msra.mxu0 %v14423_v34  ;;  %11303 = vmatprep.subr.mxu1 %v14594_v29 }
0x13d4   :  { %11270 = vmatprep.subr.mxu0 %v14594_v29  ;;  %11304 = vmatpush3.msra.mxu1 %v14425_v19 }
0x13d5   :  { %11271 = vmatpush3.msra.mxu0 %v14437_v30  ;;  %11305 = vmatprep.subr.mxu1 %v14594_v29 }
0x13d6   :  { %11272 = vmatprep.subr.mxu0 %v14594_v29  ;;  %11274 = vmatprep.mubr.msk.f32.mxu0 %vm11511_vm0, %v14594_v29 }
0x13d7   :  { %11273 = vmatpush3.msra.mxu0 %v14448_v26  ;;  %11306 = vmatpush3.msra.mxu1 %v14439_v31 }
0x13d8   :  { %11307 = vmatprep.mubr.msk.f32.mxu1 %vm11511_vm0, %v14594_v29  ;;  %11275 = vmatmul.mubr.f32.vlgmr.msra.gmra.mxu0 %v8936_v13 }
0x13d9   :  { %11288 = vmatprep.subr.mxu0 %v14594_v29  ;;  %11308 = vmatmul.mubr.f32.vlgmr.msra.gmra.mxu1 %v8935_v2 }
0x13da   :  { %11289 = vmatpush3.msra.mxu0 %v8972_v15  ;;  %11296 = vmatprep.mubr.msk.f32.mxu0 %vm11511_vm0, %v14594_v29 }
0x13db   :  { %11290 = vmatprep.subr.mxu0 %v14594_v29 }
0x13dc   :  { %11291 = vmatpush3.msra.mxu0 %v8979_v23 }
0x13dd   :  { %11292 = vmatprep.subr.mxu0 %v14594_v29 }
0x13de   :  { %11293 = vmatpush3.msra.mxu0 %v8986_v57 }
0x13df   :  { %11294 = vmatprep.subr.mxu0 %v14594_v29 }
0x13e0   :  { %11295 = vmatpush3.msra.mxu0 %v8993_v49 }
0x13e1   :  { %11297 = vmatmul.mubr.f32.vlgmr.msra.gmra.mxu0 %v8935_v2 }
0x1487   :  { %v9032_v5 = vpop.f32.mrf.mxu1 }
0x1489   :  { %v11265_v22 = vpop.f32.mrf.mxu1 }
0x148f   :  { %v9189_v4 = vpop.f32.mrf.mxu1 }
0x1490   :  { %v8941_v40 = vpop.f32.mrf.mxu0 }
0x1491   :  { %v11287_v50 = vpop.f32.mrf.mxu1  ;;  %v8942_v3 = vadd.f32 %v9371_v20, %v8941_v40 }
0x1492   :  { %v11254_v14 = vpop.f32.mrf.mxu0 }
0x1493   :  { %v9033_v59 = vadd.f32 %v9032_v5, %v8942_v3 }
0x1498   :  { %v9112_v36 = vpop.f32.mrf.mxu0 }
0x1499   :  { %v9347_v0 = vpop.f32.mrf.mxu1  ;;  %v9113_v34 = vadd.f32 %v9112_v36, %v9033_v59 }
0x149a   :  { %v11276_v60 = vpop.f32.mrf.mxu0 }
0x149b   :  { %v11309_v15 = vpop.f32.mrf.mxu1  ;;  %v9190_v19 = vadd.f32 %v9189_v4, %v9113_v34 }
0x14a1   :  { %v9272_v29 = vpop.f32.mrf.mxu0 }
0x14a2   :  { %v9273_v62 = vadd.f32 %v9272_v29, %v9190_v19 }
0x14a3   :  { %v11298_v33 = vpop.f32.mrf.mxu0 }
0x14a4   :  { %v9348_v23 = vadd.f32 %v9347_v0, %v9273_v62 }
0x14a6   :  { %9351 = vst [vmem:[#allocation10] sm:$0xf] %v9348_v23 }
0x14a7   :  { %11489 = shalt.err (!%p11486_p10)
}
0x14a8   :  { %9361 = dma.vmem_to_hbm [thread:$0]  %s9359_s5, 64, %s14536_s24, [#allocation4]  }
0x14a9   :  { %11504 = dma.done.wait [#allocation4], 64  }
0x14aa   :  { %11505 = vsyncadd [#allocation4], 4294967232 }
0x14ab   :  { %9365 = vsyncpa [#allocation3], 1 }
0x14ac   :  { %9366 = vsyncpa [#allocation6], 1 }
0x14ad   :  { %9367 = vsyncpa [#allocation9], 1 }
0x14ae   :  { %9368 = vsyncpa [#allocation4], 1 }

</bundles_post_ra>
